<compile_context>
chip_gen: v6e
topology: v6e:2x2x1
jax: 0.10.0
libtpu: 0.0.40
codegen_flags: <defaults>
</compile_context>

<pallas_src>
import functools

import jax
import jax.numpy as jnp
from jax.experimental import pallas as pl
from jax.experimental.pallas import tpu as pltpu

_LN_EPS = 1e-5  # PyTorch LayerNorm default

_PARAM_ORDER = ("ln1_w", "ln1_b", "wqkv", "bqkv", "wo", "bo",
                "ln2_w", "ln2_b", "wfc", "bfc", "wproj", "bproj")


def _layer_norm(v, w, b):
    """Row-wise LayerNorm in f32. v: (M, E); w, b: (1, E) broadcast over rows."""
    mu = jnp.mean(v, axis=-1, keepdims=True)
    var = jnp.mean((v - mu) ** 2, axis=-1, keepdims=True)
    return (v - mu) * jax.lax.rsqrt(var + _LN_EPS) * w + b


def residual_stack_kernel(
    x_ref, mask_ref,
    ln1_w_ref, ln1_b_ref, wqkv_ref, bqkv_ref, wo_ref, bo_ref,
    ln2_w_ref, ln2_b_ref, wfc_ref, bfc_ref, wproj_ref, bproj_ref,
    o_ref,
    acc_ref, q_buf, k_buf, v_buf,
    *, n_head, cs, n_sc, use_mask):
    """One grid step = one residual attention block applied to bt sequences.

    grid = (batch_blocks, n_layers); the layer axis is innermost and activations are
    carried across it in the f32 VMEM scratch `acc_ref` (shape (bt, lp, E)).  All big
    per-layer intermediates are bounded by chunking over `n_sc` sequence tiles of `cs`
    positions each (QKV projection, attention query tiles, MLP rows).
    """
    layer = pl.program_id(1)
    n_layers = pl.num_programs(1)

    bt, lp, e = x_ref.shape
    hd = e // n_head
    w_dtype = wqkv_ref.dtype

    # Load the fresh (bf16) batch block into the resident f32 accumulator at layer 0.
    @pl.when(layer == 0)
    def _():
        acc_ref[...] = x_ref[...].astype(jnp.float32)

    def to_heads(t, length):                  # (bt, length, E) -> (bt*H, length, hd)
        t = t.reshape(bt, length, n_head, hd)
        t = jnp.transpose(t, (0, 2, 1, 3))
        return t.reshape(bt * n_head, length, hd)

    # ------- QKV projection, chunked over sequence tiles (bounds the f32 (M,3E) buf).
    # Softmax scale is already folded into the q columns of wqkv/bqkv (host-side prep).
    @pl.loop(0, n_sc)
    def _(c):
        r0 = pl.multiple_of(c * cs, 8)
        xc = acc_ref[:, pl.ds(r0, cs), :].reshape(bt * cs, e)
        h = _layer_norm(xc, ln1_w_ref[0], ln1_b_ref[0]).astype(w_dtype)
        qkv = jnp.dot(h, wqkv_ref[0], preferred_element_type=jnp.float32) + bqkv_ref[0]
        q_buf[:, pl.ds(r0, cs), :] = qkv[:, :e].astype(w_dtype).reshape(bt, cs, e)
        k_buf[:, pl.ds(r0, cs), :] = qkv[:, e:2 * e].astype(w_dtype).reshape(bt, cs, e)
        v_buf[:, pl.ds(r0, cs), :] = qkv[:, 2 * e:].astype(w_dtype).reshape(bt, cs, e)

    # Full K/V in head layout (bf16 before the relayout -> half the transpose traffic).
    kh = to_heads(k_buf[...], lp)
    vh = to_heads(v_buf[...], lp)

    # ------- attention branch, chunked over query tiles: x += out_proj(MHA(LN1(x))).
    @pl.loop(0, n_sc)
    def _(c):
        q0 = pl.multiple_of(c * cs, 8)
        qh = to_heads(q_buf[:, pl.ds(q0, cs), :], cs)            # (bt*H, cs, hd) bf16
        s = jnp.einsum("bqd,bkd->bqk", qh, kh,
                       preferred_element_type=jnp.float32)       # (bt*H, cs, lp)
        if use_mask:
            # Hoisted additive mask (0 / -1e30) built once on the host; f32 add.
            s = s + mask_ref[pl.ds(q0, cs), :]
        s = s - jnp.max(s, axis=-1, keepdims=True)
        p = jnp.exp(s)
        p = p * pl.reciprocal(jnp.sum(p, axis=-1, keepdims=True), approx=True)
        oc = jnp.einsum("bqk,bkd->bqd", p.astype(w_dtype), vh,
                        preferred_element_type=jnp.float32)      # (bt*H, cs, hd)
        oc = oc.astype(w_dtype)                                  # cast before relayout
        oc = jnp.transpose(oc.reshape(bt, n_head, cs, hd),
                           (0, 2, 1, 3)).reshape(bt * cs, e)
        attn = jnp.dot(oc, wo_ref[0], preferred_element_type=jnp.float32) + bo_ref[0]
        acc_ref[:, pl.ds(q0, cs), :] = (
            acc_ref[:, pl.ds(q0, cs), :] + attn.reshape(bt, cs, e))

    # ------- MLP branch, chunked over rows: x += c_proj(QuickGELU(c_fc(LN2(x)))).
    @pl.loop(0, n_sc)
    def _(c):
        r0 = pl.multiple_of(c * cs, 8)
        xc = acc_ref[:, pl.ds(r0, cs), :]
        h2 = _layer_norm(xc.reshape(bt * cs, e),
                         ln2_w_ref[0], ln2_b_ref[0]).astype(w_dtype)
        f = jnp.dot(h2, wfc_ref[0], preferred_element_type=jnp.float32) + bfc_ref[0]
        f = f * jax.nn.sigmoid(1.702 * f)                        # QuickGELU (f32)
        m = jnp.dot(f.astype(w_dtype), wproj_ref[0],
                    preferred_element_type=jnp.float32) + bproj_ref[0]
        acc_ref[:, pl.ds(r0, cs), :] = xc + m.reshape(bt, cs, e)

    @pl.when(layer == n_layers - 1)
    def _():
        o_ref[...] = acc_ref[...].astype(o_ref.dtype)


# ----------------------------------------------------------------------------------
# Host-side helpers
# ----------------------------------------------------------------------------------
def _pick_seq_chunk(lp, target):
    """Largest multiple of 8 that divides lp and is <= max(8, target)."""
    m = lp // 8
    best = 1
    for d in range(1, m + 1):
        if m % d == 0 and 8 * d <= max(8, target):
            best = d
    return 8 * best


def _tpu_info():
    try:
        return pltpu.get_tpu_info()
    except Exception:
        return None


def _auto_vmem_limit():
    """~85% of physical VMEM when discoverable, else a safe 64 MB default."""
    info = _tpu_info()
    cap = 0
    if info is not None:
        for attr in ("vmem_capacity_bytes", "vmem_bytes", "vmem_size_bytes"):
            try:
                v = int(getattr(info, attr, 0) or 0)
            except Exception:
                v = 0
            if v > 0:
                cap = v
                break
    if cap <= 0:
        return 64 * 1024 * 1024          # fits v5e/v6e/v7x
    return int(cap * 0.85)               # ~54 MiB on v7x, ~109 MiB on v5e/v6e


def _num_tensorcores():
    """Best-effort TensorCores-per-chip (2 on v7x); conservative fallback of 1."""
    info = _tpu_info()
    if info is not None:
        for attr in ("num_cores", "num_tensorcores", "tensorcores_per_chip",
                     "cores_per_chip"):
            try:
                v = int(getattr(info, attr, 0) or 0)
            except Exception:
                v = 0
            if v > 0:
                return min(2, v)
    return 1


def prepare_params(params, n_head):
    """One-time host transform: fold the softmax scale into wqkv/bqkv's q columns."""
    e = params["wqkv"].shape[1]
    hd = e // n_head
    scale = hd ** -0.5
    w_dtype = params["wqkv"].dtype
    wq = (params["wqkv"][:, :, :e].astype(jnp.float32) * scale).astype(w_dtype)
    wqkv = jnp.concatenate([wq, params["wqkv"][:, :, e:]], axis=-1)
    bqkv = jnp.concatenate([params["bqkv"][:, :, :e] * scale,
                            params["bqkv"][:, :, e:]], axis=-1)
    out = dict(params)
    out["wqkv"] = wqkv
    out["bqkv"] = bqkv
    return out


def transformer_forward(x_lne, params, n_head, *, causal=False, batch_block=8,
                        seq_align=8, seq_chunk_target=128, vmem_limit_bytes=None,
                        min_batch_blocks=None):
    """x_lne: (L, N, E) like the PyTorch Transformer. Returns (L, N, E).

    `params` must be the *prepared* stacked per-layer weights (see prepare_params),
    with weight matrices in (in, out) layout.
    """
    L, N, E = x_lne.shape
    n_layers = params["wqkv"].shape[0]
    assert E % n_head == 0, "width must be divisible by the number of heads"

    act_dtype = jnp.bfloat16                       # bf16 activation I/O
    x = jnp.transpose(x_lne, (1, 0, 2)).astype(act_dtype)   # (N, L, E)

    # Batch-block choice: as large as possible, but keep >= num TensorCores blocks so
    # the "parallel" batch axis spans both cores on v7x megacore parts.
    if min_batch_blocks is None:
        min_batch_blocks = _num_tensorcores()
    bt = max(1, min(batch_block, N))
    if N >= 2 and min_batch_blocks > 1:
        bt = max(1, min(bt, pl.cdiv(N, min_batch_blocks)))

    lp = ((L + seq_align - 1) // seq_align) * seq_align
    nb = pl.cdiv(N, bt)
    np_ = nb * bt
    if (np_, lp) != (N, L):
        x = jnp.pad(x, ((0, np_ - N), (0, lp - L), (0, 0)))

    cs = _pick_seq_chunk(lp, seq_chunk_target)     # sequence-tile size for chunking
    n_sc = lp // cs

    # Hoisted additive mask (padding + optional causal), built once.
    use_mask = bool(causal) or (lp != L)
    col = jax.lax.broadcasted_iota(jnp.int32, (lp, lp), 1)
    valid = col < L
    if causal:
        row = jax.lax.broadcasted_iota(jnp.int32, (lp, lp), 0)
        valid = valid & (col <= row)
    mask = jnp.where(valid, 0.0, -1e30).astype(jnp.float32)

    if vmem_limit_bytes is None:
        vmem_limit_bytes = _auto_vmem_limit()

    kernel = functools.partial(residual_stack_kernel, n_head=n_head,
                               cs=cs, n_sc=n_sc, use_mask=use_mask)

    w_dtype = params["wqkv"].dtype
    scratch = [
        pltpu.VMEM((bt, lp, E), jnp.float32),   # resident activations across layers
        pltpu.VMEM((bt, lp, E), w_dtype),       # q (bf16, head-split per query tile)
        pltpu.VMEM((bt, lp, E), w_dtype),       # k
        pltpu.VMEM((bt, lp, E), w_dtype),       # v
    ]

    # Advisory cost estimate for XLA's scheduler.
    rows = np_ * lp
    flops_layer = 2 * rows * E * (3 * E + E + 4 * E + 4 * E) + 4 * np_ * lp * lp * E
    transc_layer = np_ * n_head * lp * lp + rows * 4 * E
    w_bytes = sum(int(params[k].size) * params[k].dtype.itemsize for k in _PARAM_ORDER)
    cost = pl.CostEstimate(
        flops=int(n_layers * flops_layer),
        transcendentals=int(n_layers * transc_layer),
        bytes_accessed=int(2 * rows * E * 2 + nb * w_bytes))

    def _call(single_buffer_acts):
        def act_spec(shape, imap):
            # x / mask / out only change on the outer batch axis -> single buffer.
            if single_buffer_acts:
                return pl.BlockSpec(shape, imap, pipeline_mode=pl.Buffered(1))
            return pl.BlockSpec(shape, imap)

        in_specs = [act_spec((bt, lp, E), lambda b, l: (b, 0, 0)),
                    act_spec((lp, lp), lambda b, l: (0, 0))]
        # Weights keep default double-buffering so layer l+1 streams in during layer l.
        in_specs += [pl.BlockSpec((1,) + params[k].shape[1:], lambda b, l: (l, 0, 0))
                     for k in _PARAM_ORDER]
        out_spec = act_spec((bt, lp, E), lambda b, l: (b, 0, 0))

        return pl.pallas_call(
            kernel,
            out_shape=jax.ShapeDtypeStruct((np_, lp, E), act_dtype),
            grid_spec=pltpu.PrefetchScalarGridSpec(
                num_scalar_prefetch=0,
                grid=(nb, n_layers),
                in_specs=in_specs,
                out_specs=out_spec,
                scratch_shapes=scratch),
            compiler_params=pltpu.CompilerParams(
                dimension_semantics=("parallel", "arbitrary"),
                vmem_limit_bytes=int(vmem_limit_bytes)),
            cost_estimate=cost,
        )(x, mask, *[params[k] for k in _PARAM_ORDER])

    try:
        out = jax.block_until_ready(_call(True))
    except Exception:
        # Fallback for JAX versions without pipeline_mode / Buffered(1) support.
        out = _call(False)

    out = out[:N, :L, :]
    return jnp.transpose(out, (1, 0, 2)).astype(x_lne.dtype)


def init_params(key, width, layers, weight_dtype=jnp.bfloat16):
    """Stacked per-layer weights, matrices in (in, out) layout (CLIP-style init)."""
    e = width
    attn_std = e ** -0.5
    proj_std = (e ** -0.5) * ((2 * layers) ** -0.5)
    fc_std = (2 * e) ** -0.5
    ks = jax.random.split(key, 12)

    def w(k, shape, std):
        return (jax.random.normal(k, shape, jnp.float32) * std).astype(weight_dtype)

    def b(k, shape):
        return jax.random.normal(k, shape, jnp.float32) * 0.02

    return dict(
        ln1_w=1.0 + jax.random.normal(ks[0], (layers, 1, e), jnp.float32) * 0.02,
        ln1_b=b(ks[1], (layers, 1, e)),
        wqkv=w(ks[2], (layers, e, 3 * e), attn_std),
        bqkv=b(ks[3], (layers, 1, 3 * e)),
        wo=w(ks[4], (layers, e, e), proj_std),
        bo=b(ks[5], (layers, 1, e)),
        ln2_w=1.0 + jax.random.normal(ks[6], (layers, 1, e), jnp.float32) * 0.02,
        ln2_b=b(ks[7], (layers, 1, e)),
        wfc=w(ks[8], (layers, e, 4 * e), fc_std),
        bfc=b(ks[9], (layers, 1, 4 * e)),
        wproj=w(ks[10], (layers, 4 * e, e), proj_std),
        bproj=b(ks[11], (layers, 1, e)),
    )


def reference_forward(x_lne, params, n_head, causal=False):
    """Pure-JAX f32 reference matching the PyTorch ResidualAttentionBlock stack."""
    x = jnp.transpose(x_lne, (1, 0, 2)).astype(jnp.float32)   # (N, L, E)
    N, L, E = x.shape
    n_layers = params["wqkv"].shape[0]
    hd = E // n_head
    f32 = lambda a: a.astype(jnp.float32)

    mask = None
    if causal:
        mask = jnp.where(jnp.triu(jnp.ones((L, L), bool), k=1),
                         jnp.float32(-jnp.inf), jnp.float32(0.0))

    for i in range(n_layers):
        h = _layer_norm(x, f32(params["ln1_w"][i]), f32(params["ln1_b"][i]))
        qkv = h @ f32(params["wqkv"][i]) + f32(params["bqkv"][i])
        q, k, v = qkv[..., :E], qkv[..., E:2 * E], qkv[..., 2 * E:]
        heads = lambda t: t.reshape(N, L, n_head, hd).transpose(0, 2, 1, 3)
        q, k, v = heads(q), heads(k), heads(v)
        s = jnp.einsum("nhqd,nhkd->nhqk", q, k) / (hd ** 0.5)
        if mask is not None:
            s = s + mask
        p = jax.nn.softmax(s, axis=-1)
        o = jnp.einsum("nhqk,nhkd->nhqd", p, v).transpose(0, 2, 1, 3).reshape(N, L, E)
        x = x + (o @ f32(params["wo"][i]) + f32(params["bo"][i]))
        h2 = _layer_norm(x, f32(params["ln2_w"][i]), f32(params["ln2_b"][i]))
        f = h2 @ f32(params["wfc"][i]) + f32(params["bfc"][i])
        f = f * jax.nn.sigmoid(1.702 * f)
        x = x + (f @ f32(params["wproj"][i]) + f32(params["bproj"][i]))
    return jnp.transpose(x, (1, 0, 2))


if __name__ == "__main__":
    key = jax.random.PRNGKey(0)
    width, layers, heads = 32, 2, 4

    # --- Vision-tower-like: no attention mask, aligned shapes ---
    k1, k2, key = jax.random.split(key, 3)
    params_v = init_params(k1, width, layers, weight_dtype=jnp.bfloat16)
    prep_v = prepare_params(params_v, heads)
    x_v = jax.random.normal(k2, (8, 2, width), jnp.float32)        # (L, N, E)
    out_v = transformer_forward(x_v, prep_v, heads, causal=False, batch_block=2)
    jax.block_until_ready(out_v)
    ref_v = reference_forward(x_v, params_v, heads, causal=False)
    assert out_v.shape == (8, 2, width)
    assert jnp.all(jnp.isfinite(out_v))
    assert jnp.allclose(out_v, ref_v, rtol=5e-2, atol=5e-2), (
        "vision mismatch, max abs err = %f" % float(jnp.max(jnp.abs(out_v - ref_v))))

    # --- Text-tower-like: causal mask, unaligned L and N (exercises padding + masking) ---
    k3, k4 = jax.random.split(key)
    params_t = init_params(k3, width, layers, weight_dtype=jnp.bfloat16)
    prep_t = prepare_params(params_t, heads)
    x_t = jax.random.normal(k4, (7, 3, width), jnp.float32)        # (L, N, E)
    out_t = transformer_forward(x_t, prep_t, heads, causal=True, batch_block=2)
    jax.block_until_ready(out_t)
    ref_t = reference_forward(x_t, params_t, heads, causal=True)
    assert out_t.shape == (7, 3, width)
    assert jnp.all(jnp.isfinite(out_t))
    assert jnp.allclose(out_t, ref_t, rtol=5e-2, atol=5e-2), (
        "text mismatch, max abs err = %f" % float(jnp.max(jnp.abs(out_t - ref_t))))

    print("KERNEL_OK")
</pallas_src>

<mosaic_0001>
module attributes {stable_mosaic.version = 11 : i64} {
  func.func @residual_stack_kernel(%arg0: i32, %arg1: i32, %arg2: memref<2x8x32xbf16, #tpu.memory_space<vmem>>, %arg3: memref<8x8xf32, #tpu.memory_space<vmem>>, %arg4: memref<1x1x32xf32, #tpu.memory_space<vmem>>, %arg5: memref<1x1x32xf32, #tpu.memory_space<vmem>>, %arg6: memref<1x32x96xbf16, #tpu.memory_space<vmem>>, %arg7: memref<1x1x96xf32, #tpu.memory_space<vmem>>, %arg8: memref<1x32x32xbf16, #tpu.memory_space<vmem>>, %arg9: memref<1x1x32xf32, #tpu.memory_space<vmem>>, %arg10: memref<1x1x32xf32, #tpu.memory_space<vmem>>, %arg11: memref<1x1x32xf32, #tpu.memory_space<vmem>>, %arg12: memref<1x32x128xbf16, #tpu.memory_space<vmem>>, %arg13: memref<1x1x128xf32, #tpu.memory_space<vmem>>, %arg14: memref<1x128x32xbf16, #tpu.memory_space<vmem>>, %arg15: memref<1x1x32xf32, #tpu.memory_space<vmem>>, %arg16: memref<2x8x32xbf16, #tpu.memory_space<vmem>>, %arg17: memref<2x8x32xf32, #tpu.memory_space<vmem>>, %arg18: memref<2x8x32xbf16, #tpu.memory_space<vmem>>, %arg19: memref<2x8x32xbf16, #tpu.memory_space<vmem>>, %arg20: memref<2x8x32xbf16, #tpu.memory_space<vmem>>) attributes {dimension_semantics = [#tpu.dimension_semantics<parallel>, #tpu.dimension_semantics<arbitrary>], iteration_bounds = array<i64: 1, 2>, scalar_prefetch = 0 : i64, scratch_operands = 4 : i64, tpu.core_type = #tpu.core_type<tc>, window_params = [{pipeline_mode = #tpu.pipeline_mode<synchronous>, transform_indices = @transform_0, window_bounds = array<i64: 2, 8, 32>}, {pipeline_mode = #tpu.pipeline_mode<synchronous>, transform_indices = @transform_1, window_bounds = array<i64: 8, 8>}, {transform_indices = @transform_2, window_bounds = array<i64: 1, 1, 32>}, {transform_indices = @transform_3, window_bounds = array<i64: 1, 1, 32>}, {transform_indices = @transform_4, window_bounds = array<i64: 1, 32, 96>}, {transform_indices = @transform_5, window_bounds = array<i64: 1, 1, 96>}, {transform_indices = @transform_6, window_bounds = array<i64: 1, 32, 32>}, {transform_indices = @transform_7, window_bounds = array<i64: 1, 1, 32>}, {transform_indices = @transform_8, window_bounds = array<i64: 1, 1, 32>}, {transform_indices = @transform_9, window_bounds = array<i64: 1, 1, 32>}, {transform_indices = @transform_10, window_bounds = array<i64: 1, 32, 128>}, {transform_indices = @transform_11, window_bounds = array<i64: 1, 1, 128>}, {transform_indices = @transform_12, window_bounds = array<i64: 1, 128, 32>}, {transform_indices = @transform_13, window_bounds = array<i64: 1, 1, 32>}, {pipeline_mode = #tpu.pipeline_mode<synchronous>, transform_indices = @transform_14, window_bounds = array<i64: 2, 8, 32>}]} {
    %c0_i32 = arith.constant 0 : i32
    %0 = arith.cmpi eq, %arg1, %c0_i32 : i32
    %1 = arith.extui %0 : i1 to i32
    %c0_i32_0 = arith.constant 0 : i32
    %2 = arith.cmpi ne, %1, %c0_i32_0 : i32
    scf.if %2 {
      %c0_94 = arith.constant 0 : index
      %c0_95 = arith.constant 0 : index
      %c0_96 = arith.constant 0 : index
      %170 = vector.load %arg2[%c0_94, %c0_95, %c0_96] : memref<2x8x32xbf16, #tpu.memory_space<vmem>>, vector<2x8x32xbf16>
      %171 = arith.extf %170 : vector<2x8x32xbf16> to vector<2x8x32xf32>
      %c0_97 = arith.constant 0 : index
      %c0_98 = arith.constant 0 : index
      %c0_99 = arith.constant 0 : index
      %172 = vector.load %arg17[%c0_97, %c0_98, %c0_99] : memref<2x8x32xf32, #tpu.memory_space<vmem>>, vector<2x8x32xf32>
      tpu.vector_store %arg17[%c0_97, %c0_98, %c0_99], %171 {strides = array<i32>} : memref<2x8x32xf32, #tpu.memory_space<vmem>>, vector<2x8x32xf32>,
    } else {
    }
    %c0_i32_1 = arith.constant 0 : i32
    %c1_i32 = arith.constant 1 : i32
    %3 = arith.muli %c0_i32_1, %c1_i32 : i32
    %c0_i32_2 = arith.constant 0 : i32
    %4 = arith.addi %c0_i32_2, %3 : i32
    %c8_i32 = arith.constant 8 : i32
    %5 = arith.muli %4, %c8_i32 : i32
    %6 = tpu.assume_multiple %5, 8 : i32
    %c0 = arith.constant 0 : index
    %7 = arith.index_cast %6 : i32 to index
    %c0_3 = arith.constant 0 : index
    %8 = vector.load %arg17[%c0, %7, %c0_3] : memref<2x8x32xf32, #tpu.memory_space<vmem>>, vector<2x8x32xf32>
    %9 = vector.shape_cast %8 : vector<2x8x32xf32> to vector<16x32xf32>
    %c0_4 = arith.constant 0 : index
    %c0_5 = arith.constant 0 : index
    %c0_6 = arith.constant 0 : index
    %10 = vector.load %arg4[%c0_4, %c0_5, %c0_6] : memref<1x1x32xf32, #tpu.memory_space<vmem>>, vector<1x1x32xf32>
    %11 = vector.shape_cast %10 : vector<1x1x32xf32> to vector<1x32xf32>
    %c0_7 = arith.constant 0 : index
    %c0_8 = arith.constant 0 : index
    %c0_9 = arith.constant 0 : index
    %12 = vector.load %arg5[%c0_7, %c0_8, %c0_9] : memref<1x1x32xf32, #tpu.memory_space<vmem>>, vector<1x1x32xf32>
    %13 = vector.shape_cast %12 : vector<1x1x32xf32> to vector<1x32xf32>
    %cst = arith.constant dense<0.000000e+00> : vector<16xf32>
    %14 = vector.multi_reduction <add>, %9, %cst [1] : vector<16x32xf32> to vector<16xf32>
    %15 = vector.shape_cast %14 : vector<16xf32> to vector<16x1xf32>
    %cst_10 = arith.constant 3.200000e+01 : f32
    %16 = vector.broadcast %cst_10 : f32 to vector<16x1xf32>
    %17 = arith.divf %15, %16 : vector<16x1xf32>
    %18 = vector.broadcast %17 : vector<16x1xf32> to vector<16x32xf32>
    %19 = arith.subf %9, %18 : vector<16x32xf32>
    %20 = arith.mulf %19, %19 : vector<16x32xf32>
    %cst_11 = arith.constant dense<0.000000e+00> : vector<16xf32>
    %21 = vector.multi_reduction <add>, %20, %cst_11 [1] : vector<16x32xf32> to vector<16xf32>
    %22 = vector.shape_cast %21 : vector<16xf32> to vector<16x1xf32>
    %cst_12 = arith.constant 3.200000e+01 : f32
    %23 = vector.broadcast %cst_12 : f32 to vector<16x1xf32>
    %24 = arith.divf %22, %23 : vector<16x1xf32>
    %25 = vector.broadcast %17 : vector<16x1xf32> to vector<16x32xf32>
    %26 = arith.subf %9, %25 : vector<16x32xf32>
    %cst_13 = arith.constant 9.99999974E-6 : f32
    %27 = vector.broadcast %cst_13 : f32 to vector<16x1xf32>
    %28 = arith.addf %24, %27 : vector<16x1xf32>
    %29 = math.rsqrt %28 : vector<16x1xf32>
    %30 = vector.broadcast %29 : vector<16x1xf32> to vector<16x32xf32>
    %31 = arith.mulf %26, %30 : vector<16x32xf32>
    %32 = vector.broadcast %11 : vector<1x32xf32> to vector<16x32xf32>
    %33 = arith.mulf %31, %32 : vector<16x32xf32>
    %34 = vector.broadcast %13 : vector<1x32xf32> to vector<16x32xf32>
    %35 = arith.addf %33, %34 : vector<16x32xf32>
    %36 = arith.truncf %35 : vector<16x32xf32> to vector<16x32xbf16>
    %c0_14 = arith.constant 0 : index
    %c0_15 = arith.constant 0 : index
    %c0_16 = arith.constant 0 : index
    %37 = vector.load %arg6[%c0_14, %c0_15, %c0_16] : memref<1x32x96xbf16, #tpu.memory_space<vmem>>, vector<1x32x96xbf16>
    %38 = vector.shape_cast %37 : vector<1x32x96xbf16> to vector<32x96xbf16>
    %cst_17 = arith.constant dense<0.000000e+00> : vector<16x96xf32>
    %39 = tpu.matmul %36, %38, %cst_17 {dimension_numbers = #tpu.dot_dimension_numbers<[1], [0], [0], [1], [0, 0, 1, 1], [], []>} : vector<16x32xbf16>, vector<32x96xbf16>, vector<16x96xf32> -> vector<16x96xf32>
    %c0_18 = arith.constant 0 : index
    %c0_19 = arith.constant 0 : index
    %c0_20 = arith.constant 0 : index
    %40 = vector.load %arg7[%c0_18, %c0_19, %c0_20] : memref<1x1x96xf32, #tpu.memory_space<vmem>>, vector<1x1x96xf32>
    %41 = vector.shape_cast %40 : vector<1x1x96xf32> to vector<1x96xf32>
    %42 = vector.broadcast %41 : vector<1x96xf32> to vector<16x96xf32>
    %43 = arith.addf %39, %42 : vector<16x96xf32>
    %44 = vector.extract_strided_slice %43 {offsets = [0, 0], sizes = [16, 32], strides = [1, 1]} : vector<16x96xf32> to vector<16x32xf32>
    %45 = arith.truncf %44 : vector<16x32xf32> to vector<16x32xbf16>
    %46 = vector.shape_cast %45 : vector<16x32xbf16> to vector<2x8x32xbf16>
    %c0_21 = arith.constant 0 : index
    %47 = arith.index_cast %6 : i32 to index
    %c0_22 = arith.constant 0 : index
    %48 = vector.load %arg18[%c0_21, %47, %c0_22] : memref<2x8x32xbf16, #tpu.memory_space<vmem>>, vector<2x8x32xbf16>
    tpu.vector_store %arg18[%c0_21, %47, %c0_22], %46 {strides = array<i32>} : memref<2x8x32xbf16, #tpu.memory_space<vmem>>, vector<2x8x32xbf16>,
    %49 = vector.extract_strided_slice %43 {offsets = [0, 32], sizes = [16, 32], strides = [1, 1]} : vector<16x96xf32> to vector<16x32xf32>
    %50 = arith.truncf %49 : vector<16x32xf32> to vector<16x32xbf16>
    %51 = vector.shape_cast %50 : vector<16x32xbf16> to vector<2x8x32xbf16>
    %c0_23 = arith.constant 0 : index
    %52 = arith.index_cast %6 : i32 to index
    %c0_24 = arith.constant 0 : index
    %53 = vector.load %arg19[%c0_23, %52, %c0_24] : memref<2x8x32xbf16, #tpu.memory_space<vmem>>, vector<2x8x32xbf16>
    tpu.vector_store %arg19[%c0_23, %52, %c0_24], %51 {strides = array<i32>} : memref<2x8x32xbf16, #tpu.memory_space<vmem>>, vector<2x8x32xbf16>,
    %54 = vector.extract_strided_slice %43 {offsets = [0, 64], sizes = [16, 32], strides = [1, 1]} : vector<16x96xf32> to vector<16x32xf32>
    %55 = arith.truncf %54 : vector<16x32xf32> to vector<16x32xbf16>
    %56 = vector.shape_cast %55 : vector<16x32xbf16> to vector<2x8x32xbf16>
    %c0_25 = arith.constant 0 : index
    %57 = arith.index_cast %6 : i32 to index
    %c0_26 = arith.constant 0 : index
    %58 = vector.load %arg20[%c0_25, %57, %c0_26] : memref<2x8x32xbf16, #tpu.memory_space<vmem>>, vector<2x8x32xbf16>
    tpu.vector_store %arg20[%c0_25, %57, %c0_26], %56 {strides = array<i32>} : memref<2x8x32xbf16, #tpu.memory_space<vmem>>, vector<2x8x32xbf16>,
    %c1_i32_27 = arith.constant 1 : i32
    %c0_28 = arith.constant 0 : index
    %c0_29 = arith.constant 0 : index
    %c0_30 = arith.constant 0 : index
    %59 = vector.load %arg19[%c0_28, %c0_29, %c0_30] : memref<2x8x32xbf16, #tpu.memory_space<vmem>>, vector<2x8x32xbf16>
    %60 = vector.shape_cast %59 : vector<2x8x32xbf16> to vector<2x8x4x8xbf16>
    %61 = tpu.transpose %60, [0, 2, 1, 3] : vector<2x8x4x8xbf16> -> vector<2x4x8x8xbf16>
    %62 = vector.shape_cast %61 : vector<2x4x8x8xbf16> to vector<8x8x8xbf16>
    %c0_31 = arith.constant 0 : index
    %c0_32 = arith.constant 0 : index
    %c0_33 = arith.constant 0 : index
    %63 = vector.load %arg20[%c0_31, %c0_32, %c0_33] : memref<2x8x32xbf16, #tpu.memory_space<vmem>>, vector<2x8x32xbf16>
    %64 = vector.shape_cast %63 : vector<2x8x32xbf16> to vector<2x8x4x8xbf16>
    %65 = tpu.transpose %64, [0, 2, 1, 3] : vector<2x8x4x8xbf16> -> vector<2x4x8x8xbf16>
    %66 = vector.shape_cast %65 : vector<2x4x8x8xbf16> to vector<8x8x8xbf16>
    %c0_i32_34 = arith.constant 0 : i32
    %c1_i32_35 = arith.constant 1 : i32
    %67 = arith.muli %c0_i32_34, %c1_i32_35 : i32
    %c0_i32_36 = arith.constant 0 : i32
    %68 = arith.addi %c0_i32_36, %67 : i32
    %c8_i32_37 = arith.constant 8 : i32
    %69 = arith.muli %68, %c8_i32_37 : i32
    %70 = tpu.assume_multiple %69, 8 : i32
    %c0_38 = arith.constant 0 : index
    %71 = arith.index_cast %70 : i32 to index
    %c0_39 = arith.constant 0 : index
    %72 = vector.load %arg18[%c0_38, %71, %c0_39] : memref<2x8x32xbf16, #tpu.memory_space<vmem>>, vector<2x8x32xbf16>
    %73 = vector.shape_cast %72 : vector<2x8x32xbf16> to vector<2x8x4x8xbf16>
    %74 = tpu.transpose %73, [0, 2, 1, 3] : vector<2x8x4x8xbf16> -> vector<2x4x8x8xbf16>
    %75 = vector.shape_cast %74 : vector<2x4x8x8xbf16> to vector<8x8x8xbf16>
    "tpu.trace_start"() <{level = 10 : i32, message = "bqd,bkd->bqk"}> : () -> ()
    %cst_40 = arith.constant dense<0.000000e+00> : vector<8x8x8xf32>
    %76 = tpu.matmul %75, %62, %cst_40 {dimension_numbers = #tpu.dot_dimension_numbers<[2], [2], [1], [1], [0, 0, 0, 1, 1, 1], [0], [0]>} : vector<8x8x8xbf16>, vector<8x8x8xbf16>, vector<8x8x8xf32> -> vector<8x8x8xf32>
    "tpu.trace_stop"() : () -> ()
    %cst_41 = arith.constant dense<0xFF800000> : vector<8x8xf32>
    %77 = vector.multi_reduction <maximumf>, %76, %cst_41 [2] : vector<8x8x8xf32> to vector<8x8xf32>
    %78 = vector.shape_cast %77 : vector<8x8xf32> to vector<8x8x1xf32>
    %79 = vector.broadcast %78 : vector<8x8x1xf32> to vector<8x8x8xf32>
    %80 = arith.subf %76, %79 : vector<8x8x8xf32>
    %81 = math.exp %80 : vector<8x8x8xf32>
    %cst_42 = arith.constant dense<0.000000e+00> : vector<8x8xf32>
    %82 = vector.multi_reduction <add>, %81, %cst_42 [2] : vector<8x8x8xf32> to vector<8x8xf32>
    %83 = vector.shape_cast %82 : vector<8x8xf32> to vector<8x8x1xf32>
    %84 = tpu.reciprocal %83 {approx = true} : vector<8x8x1xf32> -> vector<8x8x1xf32>
    %85 = vector.broadcast %84 : vector<8x8x1xf32> to vector<8x8x8xf32>
    %86 = arith.mulf %81, %85 : vector<8x8x8xf32>
    %87 = arith.truncf %86 : vector<8x8x8xf32> to vector<8x8x8xbf16>
    "tpu.trace_start"() <{level = 10 : i32, message = "bqk,bkd->bqd"}> : () -> ()
    %cst_43 = arith.constant dense<0.000000e+00> : vector<8x8x8xf32>
    %88 = tpu.matmul %87, %66, %cst_43 {dimension_numbers = #tpu.dot_dimension_numbers<[2], [1], [1], [2], [0, 0, 0, 1, 1, 2], [0], [0]>} : vector<8x8x8xbf16>, vector<8x8x8xbf16>, vector<8x8x8xf32> -> vector<8x8x8xf32>
    "tpu.trace_stop"() : () -> ()
    %89 = arith.truncf %88 : vector<8x8x8xf32> to vector<8x8x8xbf16>
    %90 = vector.shape_cast %89 : vector<8x8x8xbf16> to vector<2x4x8x8xbf16>
    %91 = tpu.transpose %90, [0, 2, 1, 3] : vector<2x4x8x8xbf16> -> vector<2x8x4x8xbf16>
    %92 = vector.shape_cast %91 : vector<2x8x4x8xbf16> to vector<16x32xbf16>
    %c0_44 = arith.constant 0 : index
    %c0_45 = arith.constant 0 : index
    %c0_46 = arith.constant 0 : index
    %93 = vector.load %arg8[%c0_44, %c0_45, %c0_46] : memref<1x32x32xbf16, #tpu.memory_space<vmem>>, vector<1x32x32xbf16>
    %94 = vector.shape_cast %93 : vector<1x32x32xbf16> to vector<32x32xbf16>
    %cst_47 = arith.constant dense<0.000000e+00> : vector<16x32xf32>
    %95 = tpu.matmul %92, %94, %cst_47 {dimension_numbers = #tpu.dot_dimension_numbers<[1], [0], [0], [1], [0, 0, 1, 1], [], []>} : vector<16x32xbf16>, vector<32x32xbf16>, vector<16x32xf32> -> vector<16x32xf32>
    %c0_48 = arith.constant 0 : index
    %c0_49 = arith.constant 0 : index
    %c0_50 = arith.constant 0 : index
    %96 = vector.load %arg9[%c0_48, %c0_49, %c0_50] : memref<1x1x32xf32, #tpu.memory_space<vmem>>, vector<1x1x32xf32>
    %97 = vector.shape_cast %96 : vector<1x1x32xf32> to vector<1x32xf32>
    %98 = vector.broadcast %97 : vector<1x32xf32> to vector<16x32xf32>
    %99 = arith.addf %95, %98 : vector<16x32xf32>
    %c0_51 = arith.constant 0 : index
    %100 = arith.index_cast %70 : i32 to index
    %c0_52 = arith.constant 0 : index
    %101 = vector.load %arg17[%c0_51, %100, %c0_52] : memref<2x8x32xf32, #tpu.memory_space<vmem>>, vector<2x8x32xf32>
    %102 = vector.shape_cast %99 : vector<16x32xf32> to vector<2x8x32xf32>
    %103 = arith.addf %101, %102 : vector<2x8x32xf32>
    %c0_53 = arith.constant 0 : index
    %104 = arith.index_cast %70 : i32 to index
    %c0_54 = arith.constant 0 : index
    %105 = vector.load %arg17[%c0_53, %104, %c0_54] : memref<2x8x32xf32, #tpu.memory_space<vmem>>, vector<2x8x32xf32>
    tpu.vector_store %arg17[%c0_53, %104, %c0_54], %103 {strides = array<i32>} : memref<2x8x32xf32, #tpu.memory_space<vmem>>, vector<2x8x32xf32>,
    %c1_i32_55 = arith.constant 1 : i32
    %c0_i32_56 = arith.constant 0 : i32
    %c1_i32_57 = arith.constant 1 : i32
    %106 = arith.muli %c0_i32_56, %c1_i32_57 : i32
    %c0_i32_58 = arith.constant 0 : i32
    %107 = arith.addi %c0_i32_58, %106 : i32
    %c8_i32_59 = arith.constant 8 : i32
    %108 = arith.muli %107, %c8_i32_59 : i32
    %109 = tpu.assume_multiple %108, 8 : i32
    %c0_60 = arith.constant 0 : index
    %110 = arith.index_cast %109 : i32 to index
    %c0_61 = arith.constant 0 : index
    %111 = vector.load %arg17[%c0_60, %110, %c0_61] : memref<2x8x32xf32, #tpu.memory_space<vmem>>, vector<2x8x32xf32>
    %112 = vector.shape_cast %111 : vector<2x8x32xf32> to vector<16x32xf32>
    %c0_62 = arith.constant 0 : index
    %c0_63 = arith.constant 0 : index
    %c0_64 = arith.constant 0 : index
    %113 = vector.load %arg10[%c0_62, %c0_63, %c0_64] : memref<1x1x32xf32, #tpu.memory_space<vmem>>, vector<1x1x32xf32>
    %114 = vector.shape_cast %113 : vector<1x1x32xf32> to vector<1x32xf32>
    %c0_65 = arith.constant 0 : index
    %c0_66 = arith.constant 0 : index
    %c0_67 = arith.constant 0 : index
    %115 = vector.load %arg11[%c0_65, %c0_66, %c0_67] : memref<1x1x32xf32, #tpu.memory_space<vmem>>, vector<1x1x32xf32>
    %116 = vector.shape_cast %115 : vector<1x1x32xf32> to vector<1x32xf32>
    %cst_68 = arith.constant dense<0.000000e+00> : vector<16xf32>
    %117 = vector.multi_reduction <add>, %112, %cst_68 [1] : vector<16x32xf32> to vector<16xf32>
    %118 = vector.shape_cast %117 : vector<16xf32> to vector<16x1xf32>
    %cst_69 = arith.constant 3.200000e+01 : f32
    %119 = vector.broadcast %cst_69 : f32 to vector<16x1xf32>
    %120 = arith.divf %118, %119 : vector<16x1xf32>
    %121 = vector.broadcast %120 : vector<16x1xf32> to vector<16x32xf32>
    %122 = arith.subf %112, %121 : vector<16x32xf32>
    %123 = arith.mulf %122, %122 : vector<16x32xf32>
    %cst_70 = arith.constant dense<0.000000e+00> : vector<16xf32>
    %124 = vector.multi_reduction <add>, %123, %cst_70 [1] : vector<16x32xf32> to vector<16xf32>
    %125 = vector.shape_cast %124 : vector<16xf32> to vector<16x1xf32>
    %cst_71 = arith.constant 3.200000e+01 : f32
    %126 = vector.broadcast %cst_71 : f32 to vector<16x1xf32>
    %127 = arith.divf %125, %126 : vector<16x1xf32>
    %128 = vector.broadcast %120 : vector<16x1xf32> to vector<16x32xf32>
    %129 = arith.subf %112, %128 : vector<16x32xf32>
    %cst_72 = arith.constant 9.99999974E-6 : f32
    %130 = vector.broadcast %cst_72 : f32 to vector<16x1xf32>
    %131 = arith.addf %127, %130 : vector<16x1xf32>
    %132 = math.rsqrt %131 : vector<16x1xf32>
    %133 = vector.broadcast %132 : vector<16x1xf32> to vector<16x32xf32>
    %134 = arith.mulf %129, %133 : vector<16x32xf32>
    %135 = vector.broadcast %114 : vector<1x32xf32> to vector<16x32xf32>
    %136 = arith.mulf %134, %135 : vector<16x32xf32>
    %137 = vector.broadcast %116 : vector<1x32xf32> to vector<16x32xf32>
    %138 = arith.addf %136, %137 : vector<16x32xf32>
    %139 = arith.truncf %138 : vector<16x32xf32> to vector<16x32xbf16>
    %c0_73 = arith.constant 0 : index
    %c0_74 = arith.constant 0 : index
    %c0_75 = arith.constant 0 : index
    %140 = vector.load %arg12[%c0_73, %c0_74, %c0_75] : memref<1x32x128xbf16, #tpu.memory_space<vmem>>, vector<1x32x128xbf16>
    %141 = vector.shape_cast %140 : vector<1x32x128xbf16> to vector<32x128xbf16>
    %cst_76 = arith.constant dense<0.000000e+00> : vector<16x128xf32>
    %142 = tpu.matmul %139, %141, %cst_76 {dimension_numbers = #tpu.dot_dimension_numbers<[1], [0], [0], [1], [0, 0, 1, 1], [], []>} : vector<16x32xbf16>, vector<32x128xbf16>, vector<16x128xf32> -> vector<16x128xf32>
    %c0_77 = arith.constant 0 : index
    %c0_78 = arith.constant 0 : index
    %c0_79 = arith.constant 0 : index
    %143 = vector.load %arg13[%c0_77, %c0_78, %c0_79] : memref<1x1x128xf32, #tpu.memory_space<vmem>>, vector<1x1x128xf32>
    %144 = vector.shape_cast %143 : vector<1x1x128xf32> to vector<1x128xf32>
    %145 = vector.broadcast %144 : vector<1x128xf32> to vector<16x128xf32>
    %146 = arith.addf %142, %145 : vector<16x128xf32>
    %cst_80 = arith.constant 1.702000e+00 : f32
    %147 = vector.broadcast %cst_80 : f32 to vector<16x128xf32>
    %148 = arith.mulf %147, %146 : vector<16x128xf32>
    %149 = arith.negf %148 : vector<16x128xf32>
    %150 = math.exp %149 : vector<16x128xf32>
    %cst_81 = arith.constant 1.000000e+00 : f32
    %151 = vector.broadcast %cst_81 : f32 to vector<16x128xf32>
    %152 = arith.addf %151, %150 : vector<16x128xf32>
    %153 = arith.divf %151, %152 : vector<16x128xf32>
    %154 = arith.mulf %146, %153 : vector<16x128xf32>
    %155 = arith.truncf %154 : vector<16x128xf32> to vector<16x128xbf16>
    %c0_82 = arith.constant 0 : index
    %c0_83 = arith.constant 0 : index
    %c0_84 = arith.constant 0 : index
    %156 = vector.load %arg14[%c0_82, %c0_83, %c0_84] : memref<1x128x32xbf16, #tpu.memory_space<vmem>>, vector<1x128x32xbf16>
    %157 = vector.shape_cast %156 : vector<1x128x32xbf16> to vector<128x32xbf16>
    %cst_85 = arith.constant dense<0.000000e+00> : vector<16x32xf32>
    %158 = tpu.matmul %155, %157, %cst_85 {dimension_numbers = #tpu.dot_dimension_numbers<[1], [0], [0], [1], [0, 0, 1, 1], [], []>} : vector<16x128xbf16>, vector<128x32xbf16>, vector<16x32xf32> -> vector<16x32xf32>
    %c0_86 = arith.constant 0 : index
    %c0_87 = arith.constant 0 : index
    %c0_88 = arith.constant 0 : index
    %159 = vector.load %arg15[%c0_86, %c0_87, %c0_88] : memref<1x1x32xf32, #tpu.memory_space<vmem>>, vector<1x1x32xf32>
    %160 = vector.shape_cast %159 : vector<1x1x32xf32> to vector<1x32xf32>
    %161 = vector.broadcast %160 : vector<1x32xf32> to vector<16x32xf32>
    %162 = arith.addf %158, %161 : vector<16x32xf32>
    %163 = vector.shape_cast %162 : vector<16x32xf32> to vector<2x8x32xf32>
    %164 = arith.addf %111, %163 : vector<2x8x32xf32>
    %c0_89 = arith.constant 0 : index
    %165 = arith.index_cast %109 : i32 to index
    %c0_90 = arith.constant 0 : index
    %166 = vector.load %arg17[%c0_89, %165, %c0_90] : memref<2x8x32xf32, #tpu.memory_space<vmem>>, vector<2x8x32xf32>
    tpu.vector_store %arg17[%c0_89, %165, %c0_90], %164 {strides = array<i32>} : memref<2x8x32xf32, #tpu.memory_space<vmem>>, vector<2x8x32xf32>,
    %c1_i32_91 = arith.constant 1 : i32
    %c1_i32_92 = arith.constant 1 : i32
    %167 = arith.cmpi eq, %arg1, %c1_i32_92 : i32
    %168 = arith.extui %167 : i1 to i32
    %c0_i32_93 = arith.constant 0 : i32
    %169 = arith.cmpi ne, %168, %c0_i32_93 : i32
    scf.if %169 {
      %c0_94 = arith.constant 0 : index
      %c0_95 = arith.constant 0 : index
      %c0_96 = arith.constant 0 : index
      %170 = vector.load %arg17[%c0_94, %c0_95, %c0_96] : memref<2x8x32xf32, #tpu.memory_space<vmem>>, vector<2x8x32xf32>
      %171 = arith.truncf %170 : vector<2x8x32xf32> to vector<2x8x32xbf16>
      %c0_97 = arith.constant 0 : index
      %c0_98 = arith.constant 0 : index
      %c0_99 = arith.constant 0 : index
      %172 = vector.load %arg16[%c0_97, %c0_98, %c0_99] : memref<2x8x32xbf16, #tpu.memory_space<vmem>>, vector<2x8x32xbf16>
      tpu.vector_store %arg16[%c0_97, %c0_98, %c0_99], %171 {strides = array<i32>} : memref<2x8x32xbf16, #tpu.memory_space<vmem>>, vector<2x8x32xbf16>,
    } else {
    }
    return
  }
  func.func @transform_0(%arg0: i32, %arg1: i32) -> (i32, i32, i32) {
    %c0_i32 = arith.constant 0 : i32
    %c0_i32_0 = arith.constant 0 : i32
    %c0_i32_1 = arith.constant 0 : i32
    return %arg0, %c0_i32, %c0_i32_0 : i32, i32, i32
  }
  func.func @transform_1(%arg0: i32, %arg1: i32) -> (i32, i32) {
    %c0_i32 = arith.constant 0 : i32
    %c0_i32_0 = arith.constant 0 : i32
    %c0_i32_1 = arith.constant 0 : i32
    return %c0_i32, %c0_i32_0 : i32, i32
  }
  func.func @transform_2(%arg0: i32, %arg1: i32) -> (i32, i32, i32) {
    %c0_i32 = arith.constant 0 : i32
    %c0_i32_0 = arith.constant 0 : i32
    %c0_i32_1 = arith.constant 0 : i32
    return %arg1, %c0_i32, %c0_i32_0 : i32, i32, i32
  }
  func.func @transform_3(%arg0: i32, %arg1: i32) -> (i32, i32, i32) {
    %c0_i32 = arith.constant 0 : i32
    %c0_i32_0 = arith.constant 0 : i32
    %c0_i32_1 = arith.constant 0 : i32
    return %arg1, %c0_i32, %c0_i32_0 : i32, i32, i32
  }
  func.func @transform_4(%arg0: i32, %arg1: i32) -> (i32, i32, i32) {
    %c0_i32 = arith.constant 0 : i32
    %c0_i32_0 = arith.constant 0 : i32
    %c0_i32_1 = arith.constant 0 : i32
    return %arg1, %c0_i32, %c0_i32_0 : i32, i32, i32
  }
  func.func @transform_5(%arg0: i32, %arg1: i32) -> (i32, i32, i32) {
    %c0_i32 = arith.constant 0 : i32
    %c0_i32_0 = arith.constant 0 : i32
    %c0_i32_1 = arith.constant 0 : i32
    return %arg1, %c0_i32, %c0_i32_0 : i32, i32, i32
  }
  func.func @transform_6(%arg0: i32, %arg1: i32) -> (i32, i32, i32) {
    %c0_i32 = arith.constant 0 : i32
    %c0_i32_0 = arith.constant 0 : i32
    %c0_i32_1 = arith.constant 0 : i32
    return %arg1, %c0_i32, %c0_i32_0 : i32, i32, i32
  }
  func.func @transform_7(%arg0: i32, %arg1: i32) -> (i32, i32, i32) {
    %c0_i32 = arith.constant 0 : i32
    %c0_i32_0 = arith.constant 0 : i32
    %c0_i32_1 = arith.constant 0 : i32
    return %arg1, %c0_i32, %c0_i32_0 : i32, i32, i32
  }
  func.func @transform_8(%arg0: i32, %arg1: i32) -> (i32, i32, i32) {
    %c0_i32 = arith.constant 0 : i32
    %c0_i32_0 = arith.constant 0 : i32
    %c0_i32_1 = arith.constant 0 : i32
    return %arg1, %c0_i32, %c0_i32_0 : i32, i32, i32
  }
  func.func @transform_9(%arg0: i32, %arg1: i32) -> (i32, i32, i32) {
    %c0_i32 = arith.constant 0 : i32
    %c0_i32_0 = arith.constant 0 : i32
    %c0_i32_1 = arith.constant 0 : i32
    return %arg1, %c0_i32, %c0_i32_0 : i32, i32, i32
  }
  func.func @transform_10(%arg0: i32, %arg1: i32) -> (i32, i32, i32) {
    %c0_i32 = arith.constant 0 : i32
    %c0_i32_0 = arith.constant 0 : i32
    %c0_i32_1 = arith.constant 0 : i32
    return %arg1, %c0_i32, %c0_i32_0 : i32, i32, i32
  }
  func.func @transform_11(%arg0: i32, %arg1: i32) -> (i32, i32, i32) {
    %c0_i32 = arith.constant 0 : i32
    %c0_i32_0 = arith.constant 0 : i32
    %c0_i32_1 = arith.constant 0 : i32
    return %arg1, %c0_i32, %c0_i32_0 : i32, i32, i32
  }
  func.func @transform_12(%arg0: i32, %arg1: i32) -> (i32, i32, i32) {
    %c0_i32 = arith.constant 0 : i32
    %c0_i32_0 = arith.constant 0 : i32
    %c0_i32_1 = arith.constant 0 : i32
    return %arg1, %c0_i32, %c0_i32_0 : i32, i32, i32
  }
  func.func @transform_13(%arg0: i32, %arg1: i32) -> (i32, i32, i32) {
    %c0_i32 = arith.constant 0 : i32
    %c0_i32_0 = arith.constant 0 : i32
    %c0_i32_1 = arith.constant 0 : i32
    return %arg1, %c0_i32, %c0_i32_0 : i32, i32, i32
  }
  func.func @transform_14(%arg0: i32, %arg1: i32) -> (i32, i32, i32) {
    %c0_i32 = arith.constant 0 : i32
    %c0_i32_0 = arith.constant 0 : i32
    %c0_i32_1 = arith.constant 0 : i32
    return %arg0, %c0_i32, %c0_i32_0 : i32, i32, i32
  }
}

module attributes {stable_mosaic.version = 11 : i64} {
  func.func @residual_stack_kernel(%arg0: i32, %arg1: i32, %arg2: memref<2x8x32xbf16, #tpu.memory_space<vmem>>, %arg3: memref<8x8xf32, #tpu.memory_space<vmem>>, %arg4: memref<1x1x32xf32, #tpu.memory_space<vmem>>, %arg5: memref<1x1x32xf32, #tpu.memory_space<vmem>>, %arg6: memref<1x32x96xbf16, #tpu.memory_space<vmem>>, %arg7: memref<1x1x96xf32, #tpu.memory_space<vmem>>, %arg8: memref<1x32x32xbf16, #tpu.memory_space<vmem>>, %arg9: memref<1x1x32xf32, #tpu.memory_space<vmem>>, %arg10: memref<1x1x32xf32, #tpu.memory_space<vmem>>, %arg11: memref<1x1x32xf32, #tpu.memory_space<vmem>>, %arg12: memref<1x32x128xbf16, #tpu.memory_space<vmem>>, %arg13: memref<1x1x128xf32, #tpu.memory_space<vmem>>, %arg14: memref<1x128x32xbf16, #tpu.memory_space<vmem>>, %arg15: memref<1x1x32xf32, #tpu.memory_space<vmem>>, %arg16: memref<2x8x32xbf16, #tpu.memory_space<vmem>>, %arg17: memref<2x8x32xf32, #tpu.memory_space<vmem>>, %arg18: memref<2x8x32xbf16, #tpu.memory_space<vmem>>, %arg19: memref<2x8x32xbf16, #tpu.memory_space<vmem>>, %arg20: memref<2x8x32xbf16, #tpu.memory_space<vmem>>) attributes {dimension_semantics = [#tpu.dimension_semantics<parallel>, #tpu.dimension_semantics<arbitrary>], iteration_bounds = array<i64: 1, 2>, scalar_prefetch = 0 : i64, scratch_operands = 4 : i64, tpu.core_type = #tpu.core_type<tc>, window_params = [{transform_indices = @transform_0, window_bounds = array<i64: 2, 8, 32>}, {pipeline_mode = #tpu.pipeline_mode<synchronous>, transform_indices = @transform_1, window_bounds = array<i64: 8, 8>}, {transform_indices = @transform_2, window_bounds = array<i64: 1, 1, 32>}, {transform_indices = @transform_3, window_bounds = array<i64: 1, 1, 32>}, {transform_indices = @transform_4, window_bounds = array<i64: 1, 32, 96>}, {transform_indices = @transform_5, window_bounds = array<i64: 1, 1, 96>}, {transform_indices = @transform_6, window_bounds = array<i64: 1, 32, 32>}, {transform_indices = @transform_7, window_bounds = array<i64: 1, 1, 32>}, {transform_indices = @transform_8, window_bounds = array<i64: 1, 1, 32>}, {transform_indices = @transform_9, window_bounds = array<i64: 1, 1, 32>}, {transform_indices = @transform_10, window_bounds = array<i64: 1, 32, 128>}, {transform_indices = @transform_11, window_bounds = array<i64: 1, 1, 128>}, {transform_indices = @transform_12, window_bounds = array<i64: 1, 128, 32>}, {transform_indices = @transform_13, window_bounds = array<i64: 1, 1, 32>}, {transform_indices = @transform_14, window_bounds = array<i64: 2, 8, 32>}]} {
    %c0_i32 = arith.constant 0 : i32
    %0 = arith.cmpi eq, %arg1, %c0_i32 : i32
    %1 = arith.extui %0 : i1 to i32
    %c0_i32_0 = arith.constant 0 : i32
    %2 = arith.cmpi ne, %1, %c0_i32_0 : i32
    scf.if %2 {
      %c0_94 = arith.constant 0 : index
      %c0_95 = arith.constant 0 : index
      %c0_96 = arith.constant 0 : index
      %170 = vector.load %arg2[%c0_94, %c0_95, %c0_96] : memref<2x8x32xbf16, #tpu.memory_space<vmem>>, vector<2x8x32xbf16>
      %171 = arith.extf %170 : vector<2x8x32xbf16> to vector<2x8x32xf32>
      %c0_97 = arith.constant 0 : index
      %c0_98 = arith.constant 0 : index
      %c0_99 = arith.constant 0 : index
      %172 = vector.load %arg17[%c0_97, %c0_98, %c0_99] : memref<2x8x32xf32, #tpu.memory_space<vmem>>, vector<2x8x32xf32>
      tpu.vector_store %arg17[%c0_97, %c0_98, %c0_99], %171 {strides = array<i32>} : memref<2x8x32xf32, #tpu.memory_space<vmem>>, vector<2x8x32xf32>,
    } else {
    }
    %c0_i32_1 = arith.constant 0 : i32
    %c1_i32 = arith.constant 1 : i32
    %3 = arith.muli %c0_i32_1, %c1_i32 : i32
    %c0_i32_2 = arith.constant 0 : i32
    %4 = arith.addi %c0_i32_2, %3 : i32
    %c8_i32 = arith.constant 8 : i32
    %5 = arith.muli %4, %c8_i32 : i32
    %6 = tpu.assume_multiple %5, 8 : i32
    %c0 = arith.constant 0 : index
    %7 = arith.index_cast %6 : i32 to index
    %c0_3 = arith.constant 0 : index
    %8 = vector.load %arg17[%c0, %7, %c0_3] : memref<2x8x32xf32, #tpu.memory_space<vmem>>, vector<2x8x32xf32>
    %9 = vector.shape_cast %8 : vector<2x8x32xf32> to vector<16x32xf32>
    %c0_4 = arith.constant 0 : index
    %c0_5 = arith.constant 0 : index
    %c0_6 = arith.constant 0 : index
    %10 = vector.load %arg4[%c0_4, %c0_5, %c0_6] : memref<1x1x32xf32, #tpu.memory_space<vmem>>, vector<1x1x32xf32>
    %11 = vector.shape_cast %10 : vector<1x1x32xf32> to vector<1x32xf32>
    %c0_7 = arith.constant 0 : index
    %c0_8 = arith.constant 0 : index
    %c0_9 = arith.constant 0 : index
    %12 = vector.load %arg5[%c0_7, %c0_8, %c0_9] : memref<1x1x32xf32, #tpu.memory_space<vmem>>, vector<1x1x32xf32>
    %13 = vector.shape_cast %12 : vector<1x1x32xf32> to vector<1x32xf32>
    %cst = arith.constant dense<0.000000e+00> : vector<16xf32>
    %14 = vector.multi_reduction <add>, %9, %cst [1] : vector<16x32xf32> to vector<16xf32>
    %15 = vector.shape_cast %14 : vector<16xf32> to vector<16x1xf32>
    %cst_10 = arith.constant 3.200000e+01 : f32
    %16 = vector.broadcast %cst_10 : f32 to vector<16x1xf32>
    %17 = arith.divf %15, %16 : vector<16x1xf32>
    %18 = vector.broadcast %17 : vector<16x1xf32> to vector<16x32xf32>
    %19 = arith.subf %9, %18 : vector<16x32xf32>
    %20 = arith.mulf %19, %19 : vector<16x32xf32>
    %cst_11 = arith.constant dense<0.000000e+00> : vector<16xf32>
    %21 = vector.multi_reduction <add>, %20, %cst_11 [1] : vector<16x32xf32> to vector<16xf32>
    %22 = vector.shape_cast %21 : vector<16xf32> to vector<16x1xf32>
    %cst_12 = arith.constant 3.200000e+01 : f32
    %23 = vector.broadcast %cst_12 : f32 to vector<16x1xf32>
    %24 = arith.divf %22, %23 : vector<16x1xf32>
    %25 = vector.broadcast %17 : vector<16x1xf32> to vector<16x32xf32>
    %26 = arith.subf %9, %25 : vector<16x32xf32>
    %cst_13 = arith.constant 9.99999974E-6 : f32
    %27 = vector.broadcast %cst_13 : f32 to vector<16x1xf32>
    %28 = arith.addf %24, %27 : vector<16x1xf32>
    %29 = math.rsqrt %28 : vector<16x1xf32>
    %30 = vector.broadcast %29 : vector<16x1xf32> to vector<16x32xf32>
    %31 = arith.mulf %26, %30 : vector<16x32xf32>
    %32 = vector.broadcast %11 : vector<1x32xf32> to vector<16x32xf32>
    %33 = arith.mulf %31, %32 : vector<16x32xf32>
    %34 = vector.broadcast %13 : vector<1x32xf32> to vector<16x32xf32>
    %35 = arith.addf %33, %34 : vector<16x32xf32>
    %36 = arith.truncf %35 : vector<16x32xf32> to vector<16x32xbf16>
    %c0_14 = arith.constant 0 : index
    %c0_15 = arith.constant 0 : index
    %c0_16 = arith.constant 0 : index
    %37 = vector.load %arg6[%c0_14, %c0_15, %c0_16] : memref<1x32x96xbf16, #tpu.memory_space<vmem>>, vector<1x32x96xbf16>
    %38 = vector.shape_cast %37 : vector<1x32x96xbf16> to vector<32x96xbf16>
    %cst_17 = arith.constant dense<0.000000e+00> : vector<16x96xf32>
    %39 = tpu.matmul %36, %38, %cst_17 {dimension_numbers = #tpu.dot_dimension_numbers<[1], [0], [0], [1], [0, 0, 1, 1], [], []>} : vector<16x32xbf16>, vector<32x96xbf16>, vector<16x96xf32> -> vector<16x96xf32>
    %c0_18 = arith.constant 0 : index
    %c0_19 = arith.constant 0 : index
    %c0_20 = arith.constant 0 : index
    %40 = vector.load %arg7[%c0_18, %c0_19, %c0_20] : memref<1x1x96xf32, #tpu.memory_space<vmem>>, vector<1x1x96xf32>
    %41 = vector.shape_cast %40 : vector<1x1x96xf32> to vector<1x96xf32>
    %42 = vector.broadcast %41 : vector<1x96xf32> to vector<16x96xf32>
    %43 = arith.addf %39, %42 : vector<16x96xf32>
    %44 = vector.extract_strided_slice %43 {offsets = [0, 0], sizes = [16, 32], strides = [1, 1]} : vector<16x96xf32> to vector<16x32xf32>
    %45 = arith.truncf %44 : vector<16x32xf32> to vector<16x32xbf16>
    %46 = vector.shape_cast %45 : vector<16x32xbf16> to vector<2x8x32xbf16>
    %c0_21 = arith.constant 0 : index
    %47 = arith.index_cast %6 : i32 to index
    %c0_22 = arith.constant 0 : index
    %48 = vector.load %arg18[%c0_21, %47, %c0_22] : memref<2x8x32xbf16, #tpu.memory_space<vmem>>, vector<2x8x32xbf16>
    tpu.vector_store %arg18[%c0_21, %47, %c0_22], %46 {strides = array<i32>} : memref<2x8x32xbf16, #tpu.memory_space<vmem>>, vector<2x8x32xbf16>,
    %49 = vector.extract_strided_slice %43 {offsets = [0, 32], sizes = [16, 32], strides = [1, 1]} : vector<16x96xf32> to vector<16x32xf32>
    %50 = arith.truncf %49 : vector<16x32xf32> to vector<16x32xbf16>
    %51 = vector.shape_cast %50 : vector<16x32xbf16> to vector<2x8x32xbf16>
    %c0_23 = arith.constant 0 : index
    %52 = arith.index_cast %6 : i32 to index
    %c0_24 = arith.constant 0 : index
    %53 = vector.load %arg19[%c0_23, %52, %c0_24] : memref<2x8x32xbf16, #tpu.memory_space<vmem>>, vector<2x8x32xbf16>
    tpu.vector_store %arg19[%c0_23, %52, %c0_24], %51 {strides = array<i32>} : memref<2x8x32xbf16, #tpu.memory_space<vmem>>, vector<2x8x32xbf16>,
    %54 = vector.extract_strided_slice %43 {offsets = [0, 64], sizes = [16, 32], strides = [1, 1]} : vector<16x96xf32> to vector<16x32xf32>
    %55 = arith.truncf %54 : vector<16x32xf32> to vector<16x32xbf16>
    %56 = vector.shape_cast %55 : vector<16x32xbf16> to vector<2x8x32xbf16>
    %c0_25 = arith.constant 0 : index
    %57 = arith.index_cast %6 : i32 to index
    %c0_26 = arith.constant 0 : index
    %58 = vector.load %arg20[%c0_25, %57, %c0_26] : memref<2x8x32xbf16, #tpu.memory_space<vmem>>, vector<2x8x32xbf16>
    tpu.vector_store %arg20[%c0_25, %57, %c0_26], %56 {strides = array<i32>} : memref<2x8x32xbf16, #tpu.memory_space<vmem>>, vector<2x8x32xbf16>,
    %c1_i32_27 = arith.constant 1 : i32
    %c0_28 = arith.constant 0 : index
    %c0_29 = arith.constant 0 : index
    %c0_30 = arith.constant 0 : index
    %59 = vector.load %arg19[%c0_28, %c0_29, %c0_30] : memref<2x8x32xbf16, #tpu.memory_space<vmem>>, vector<2x8x32xbf16>
    %60 = vector.shape_cast %59 : vector<2x8x32xbf16> to vector<2x8x4x8xbf16>
    %61 = tpu.transpose %60, [0, 2, 1, 3] : vector<2x8x4x8xbf16> -> vector<2x4x8x8xbf16>
    %62 = vector.shape_cast %61 : vector<2x4x8x8xbf16> to vector<8x8x8xbf16>
    %c0_31 = arith.constant 0 : index
    %c0_32 = arith.constant 0 : index
    %c0_33 = arith.constant 0 : index
    %63 = vector.load %arg20[%c0_31, %c0_32, %c0_33] : memref<2x8x32xbf16, #tpu.memory_space<vmem>>, vector<2x8x32xbf16>
    %64 = vector.shape_cast %63 : vector<2x8x32xbf16> to vector<2x8x4x8xbf16>
    %65 = tpu.transpose %64, [0, 2, 1, 3] : vector<2x8x4x8xbf16> -> vector<2x4x8x8xbf16>
    %66 = vector.shape_cast %65 : vector<2x4x8x8xbf16> to vector<8x8x8xbf16>
    %c0_i32_34 = arith.constant 0 : i32
    %c1_i32_35 = arith.constant 1 : i32
    %67 = arith.muli %c0_i32_34, %c1_i32_35 : i32
    %c0_i32_36 = arith.constant 0 : i32
    %68 = arith.addi %c0_i32_36, %67 : i32
    %c8_i32_37 = arith.constant 8 : i32
    %69 = arith.muli %68, %c8_i32_37 : i32
    %70 = tpu.assume_multiple %69, 8 : i32
    %c0_38 = arith.constant 0 : index
    %71 = arith.index_cast %70 : i32 to index
    %c0_39 = arith.constant 0 : index
    %72 = vector.load %arg18[%c0_38, %71, %c0_39] : memref<2x8x32xbf16, #tpu.memory_space<vmem>>, vector<2x8x32xbf16>
    %73 = vector.shape_cast %72 : vector<2x8x32xbf16> to vector<2x8x4x8xbf16>
    %74 = tpu.transpose %73, [0, 2, 1, 3] : vector<2x8x4x8xbf16> -> vector<2x4x8x8xbf16>
    %75 = vector.shape_cast %74 : vector<2x4x8x8xbf16> to vector<8x8x8xbf16>
    "tpu.trace_start"() <{level = 10 : i32, message = "bqd,bkd->bqk"}> : () -> ()
    %cst_40 = arith.constant dense<0.000000e+00> : vector<8x8x8xf32>
    %76 = tpu.matmul %75, %62, %cst_40 {dimension_numbers = #tpu.dot_dimension_numbers<[2], [2], [1], [1], [0, 0, 0, 1, 1, 1], [0], [0]>} : vector<8x8x8xbf16>, vector<8x8x8xbf16>, vector<8x8x8xf32> -> vector<8x8x8xf32>
    "tpu.trace_stop"() : () -> ()
    %cst_41 = arith.constant dense<0xFF800000> : vector<8x8xf32>
    %77 = vector.multi_reduction <maximumf>, %76, %cst_41 [2] : vector<8x8x8xf32> to vector<8x8xf32>
    %78 = vector.shape_cast %77 : vector<8x8xf32> to vector<8x8x1xf32>
    %79 = vector.broadcast %78 : vector<8x8x1xf32> to vector<8x8x8xf32>
    %80 = arith.subf %76, %79 : vector<8x8x8xf32>
    %81 = math.exp %80 : vector<8x8x8xf32>
    %cst_42 = arith.constant dense<0.000000e+00> : vector<8x8xf32>
    %82 = vector.multi_reduction <add>, %81, %cst_42 [2] : vector<8x8x8xf32> to vector<8x8xf32>
    %83 = vector.shape_cast %82 : vector<8x8xf32> to vector<8x8x1xf32>
    %84 = tpu.reciprocal %83 {approx = true} : vector<8x8x1xf32> -> vector<8x8x1xf32>
    %85 = vector.broadcast %84 : vector<8x8x1xf32> to vector<8x8x8xf32>
    %86 = arith.mulf %81, %85 : vector<8x8x8xf32>
    %87 = arith.truncf %86 : vector<8x8x8xf32> to vector<8x8x8xbf16>
    "tpu.trace_start"() <{level = 10 : i32, message = "bqk,bkd->bqd"}> : () -> ()
    %cst_43 = arith.constant dense<0.000000e+00> : vector<8x8x8xf32>
    %88 = tpu.matmul %87, %66, %cst_43 {dimension_numbers = #tpu.dot_dimension_numbers<[2], [1], [1], [2], [0, 0, 0, 1, 1, 2], [0], [0]>} : vector<8x8x8xbf16>, vector<8x8x8xbf16>, vector<8x8x8xf32> -> vector<8x8x8xf32>
    "tpu.trace_stop"() : () -> ()
    %89 = arith.truncf %88 : vector<8x8x8xf32> to vector<8x8x8xbf16>
    %90 = vector.shape_cast %89 : vector<8x8x8xbf16> to vector<2x4x8x8xbf16>
    %91 = tpu.transpose %90, [0, 2, 1, 3] : vector<2x4x8x8xbf16> -> vector<2x8x4x8xbf16>
    %92 = vector.shape_cast %91 : vector<2x8x4x8xbf16> to vector<16x32xbf16>
    %c0_44 = arith.constant 0 : index
    %c0_45 = arith.constant 0 : index
    %c0_46 = arith.constant 0 : index
    %93 = vector.load %arg8[%c0_44, %c0_45, %c0_46] : memref<1x32x32xbf16, #tpu.memory_space<vmem>>, vector<1x32x32xbf16>
    %94 = vector.shape_cast %93 : vector<1x32x32xbf16> to vector<32x32xbf16>
    %cst_47 = arith.constant dense<0.000000e+00> : vector<16x32xf32>
    %95 = tpu.matmul %92, %94, %cst_47 {dimension_numbers = #tpu.dot_dimension_numbers<[1], [0], [0], [1], [0, 0, 1, 1], [], []>} : vector<16x32xbf16>, vector<32x32xbf16>, vector<16x32xf32> -> vector<16x32xf32>
    %c0_48 = arith.constant 0 : index
    %c0_49 = arith.constant 0 : index
    %c0_50 = arith.constant 0 : index
    %96 = vector.load %arg9[%c0_48, %c0_49, %c0_50] : memref<1x1x32xf32, #tpu.memory_space<vmem>>, vector<1x1x32xf32>
    %97 = vector.shape_cast %96 : vector<1x1x32xf32> to vector<1x32xf32>
    %98 = vector.broadcast %97 : vector<1x32xf32> to vector<16x32xf32>
    %99 = arith.addf %95, %98 : vector<16x32xf32>
    %c0_51 = arith.constant 0 : index
    %100 = arith.index_cast %70 : i32 to index
    %c0_52 = arith.constant 0 : index
    %101 = vector.load %arg17[%c0_51, %100, %c0_52] : memref<2x8x32xf32, #tpu.memory_space<vmem>>, vector<2x8x32xf32>
    %102 = vector.shape_cast %99 : vector<16x32xf32> to vector<2x8x32xf32>
    %103 = arith.addf %101, %102 : vector<2x8x32xf32>
    %c0_53 = arith.constant 0 : index
    %104 = arith.index_cast %70 : i32 to index
    %c0_54 = arith.constant 0 : index
    %105 = vector.load %arg17[%c0_53, %104, %c0_54] : memref<2x8x32xf32, #tpu.memory_space<vmem>>, vector<2x8x32xf32>
    tpu.vector_store %arg17[%c0_53, %104, %c0_54], %103 {strides = array<i32>} : memref<2x8x32xf32, #tpu.memory_space<vmem>>, vector<2x8x32xf32>,
    %c1_i32_55 = arith.constant 1 : i32
    %c0_i32_56 = arith.constant 0 : i32
    %c1_i32_57 = arith.constant 1 : i32
    %106 = arith.muli %c0_i32_56, %c1_i32_57 : i32
    %c0_i32_58 = arith.constant 0 : i32
    %107 = arith.addi %c0_i32_58, %106 : i32
    %c8_i32_59 = arith.constant 8 : i32
    %108 = arith.muli %107, %c8_i32_59 : i32
    %109 = tpu.assume_multiple %108, 8 : i32
    %c0_60 = arith.constant 0 : index
    %110 = arith.index_cast %109 : i32 to index
    %c0_61 = arith.constant 0 : index
    %111 = vector.load %arg17[%c0_60, %110, %c0_61] : memref<2x8x32xf32, #tpu.memory_space<vmem>>, vector<2x8x32xf32>
    %112 = vector.shape_cast %111 : vector<2x8x32xf32> to vector<16x32xf32>
    %c0_62 = arith.constant 0 : index
    %c0_63 = arith.constant 0 : index
    %c0_64 = arith.constant 0 : index
    %113 = vector.load %arg10[%c0_62, %c0_63, %c0_64] : memref<1x1x32xf32, #tpu.memory_space<vmem>>, vector<1x1x32xf32>
    %114 = vector.shape_cast %113 : vector<1x1x32xf32> to vector<1x32xf32>
    %c0_65 = arith.constant 0 : index
    %c0_66 = arith.constant 0 : index
    %c0_67 = arith.constant 0 : index
    %115 = vector.load %arg11[%c0_65, %c0_66, %c0_67] : memref<1x1x32xf32, #tpu.memory_space<vmem>>, vector<1x1x32xf32>
    %116 = vector.shape_cast %115 : vector<1x1x32xf32> to vector<1x32xf32>
    %cst_68 = arith.constant dense<0.000000e+00> : vector<16xf32>
    %117 = vector.multi_reduction <add>, %112, %cst_68 [1] : vector<16x32xf32> to vector<16xf32>
    %118 = vector.shape_cast %117 : vector<16xf32> to vector<16x1xf32>
    %cst_69 = arith.constant 3.200000e+01 : f32
    %119 = vector.broadcast %cst_69 : f32 to vector<16x1xf32>
    %120 = arith.divf %118, %119 : vector<16x1xf32>
    %121 = vector.broadcast %120 : vector<16x1xf32> to vector<16x32xf32>
    %122 = arith.subf %112, %121 : vector<16x32xf32>
    %123 = arith.mulf %122, %122 : vector<16x32xf32>
    %cst_70 = arith.constant dense<0.000000e+00> : vector<16xf32>
    %124 = vector.multi_reduction <add>, %123, %cst_70 [1] : vector<16x32xf32> to vector<16xf32>
    %125 = vector.shape_cast %124 : vector<16xf32> to vector<16x1xf32>
    %cst_71 = arith.constant 3.200000e+01 : f32
    %126 = vector.broadcast %cst_71 : f32 to vector<16x1xf32>
    %127 = arith.divf %125, %126 : vector<16x1xf32>
    %128 = vector.broadcast %120 : vector<16x1xf32> to vector<16x32xf32>
    %129 = arith.subf %112, %128 : vector<16x32xf32>
    %cst_72 = arith.constant 9.99999974E-6 : f32
    %130 = vector.broadcast %cst_72 : f32 to vector<16x1xf32>
    %131 = arith.addf %127, %130 : vector<16x1xf32>
    %132 = math.rsqrt %131 : vector<16x1xf32>
    %133 = vector.broadcast %132 : vector<16x1xf32> to vector<16x32xf32>
    %134 = arith.mulf %129, %133 : vector<16x32xf32>
    %135 = vector.broadcast %114 : vector<1x32xf32> to vector<16x32xf32>
    %136 = arith.mulf %134, %135 : vector<16x32xf32>
    %137 = vector.broadcast %116 : vector<1x32xf32> to vector<16x32xf32>
    %138 = arith.addf %136, %137 : vector<16x32xf32>
    %139 = arith.truncf %138 : vector<16x32xf32> to vector<16x32xbf16>
    %c0_73 = arith.constant 0 : index
    %c0_74 = arith.constant 0 : index
    %c0_75 = arith.constant 0 : index
    %140 = vector.load %arg12[%c0_73, %c0_74, %c0_75] : memref<1x32x128xbf16, #tpu.memory_space<vmem>>, vector<1x32x128xbf16>
    %141 = vector.shape_cast %140 : vector<1x32x128xbf16> to vector<32x128xbf16>
    %cst_76 = arith.constant dense<0.000000e+00> : vector<16x128xf32>
    %142 = tpu.matmul %139, %141, %cst_76 {dimension_numbers = #tpu.dot_dimension_numbers<[1], [0], [0], [1], [0, 0, 1, 1], [], []>} : vector<16x32xbf16>, vector<32x128xbf16>, vector<16x128xf32> -> vector<16x128xf32>
    %c0_77 = arith.constant 0 : index
    %c0_78 = arith.constant 0 : index
    %c0_79 = arith.constant 0 : index
    %143 = vector.load %arg13[%c0_77, %c0_78, %c0_79] : memref<1x1x128xf32, #tpu.memory_space<vmem>>, vector<1x1x128xf32>
    %144 = vector.shape_cast %143 : vector<1x1x128xf32> to vector<1x128xf32>
    %145 = vector.broadcast %144 : vector<1x128xf32> to vector<16x128xf32>
    %146 = arith.addf %142, %145 : vector<16x128xf32>
    %cst_80 = arith.constant 1.702000e+00 : f32
    %147 = vector.broadcast %cst_80 : f32 to vector<16x128xf32>
    %148 = arith.mulf %147, %146 : vector<16x128xf32>
    %149 = arith.negf %148 : vector<16x128xf32>
    %150 = math.exp %149 : vector<16x128xf32>
    %cst_81 = arith.constant 1.000000e+00 : f32
    %151 = vector.broadcast %cst_81 : f32 to vector<16x128xf32>
    %152 = arith.addf %151, %150 : vector<16x128xf32>
    %153 = arith.divf %151, %152 : vector<16x128xf32>
    %154 = arith.mulf %146, %153 : vector<16x128xf32>
    %155 = arith.truncf %154 : vector<16x128xf32> to vector<16x128xbf16>
    %c0_82 = arith.constant 0 : index
    %c0_83 = arith.constant 0 : index
    %c0_84 = arith.constant 0 : index
    %156 = vector.load %arg14[%c0_82, %c0_83, %c0_84] : memref<1x128x32xbf16, #tpu.memory_space<vmem>>, vector<1x128x32xbf16>
    %157 = vector.shape_cast %156 : vector<1x128x32xbf16> to vector<128x32xbf16>
    %cst_85 = arith.constant dense<0.000000e+00> : vector<16x32xf32>
    %158 = tpu.matmul %155, %157, %cst_85 {dimension_numbers = #tpu.dot_dimension_numbers<[1], [0], [0], [1], [0, 0, 1, 1], [], []>} : vector<16x128xbf16>, vector<128x32xbf16>, vector<16x32xf32> -> vector<16x32xf32>
    %c0_86 = arith.constant 0 : index
    %c0_87 = arith.constant 0 : index
    %c0_88 = arith.constant 0 : index
    %159 = vector.load %arg15[%c0_86, %c0_87, %c0_88] : memref<1x1x32xf32, #tpu.memory_space<vmem>>, vector<1x1x32xf32>
    %160 = vector.shape_cast %159 : vector<1x1x32xf32> to vector<1x32xf32>
    %161 = vector.broadcast %160 : vector<1x32xf32> to vector<16x32xf32>
    %162 = arith.addf %158, %161 : vector<16x32xf32>
    %163 = vector.shape_cast %162 : vector<16x32xf32> to vector<2x8x32xf32>
    %164 = arith.addf %111, %163 : vector<2x8x32xf32>
    %c0_89 = arith.constant 0 : index
    %165 = arith.index_cast %109 : i32 to index
    %c0_90 = arith.constant 0 : index
    %166 = vector.load %arg17[%c0_89, %165, %c0_90] : memref<2x8x32xf32, #tpu.memory_space<vmem>>, vector<2x8x32xf32>
    tpu.vector_store %arg17[%c0_89, %165, %c0_90], %164 {strides = array<i32>} : memref<2x8x32xf32, #tpu.memory_space<vmem>>, vector<2x8x32xf32>,
    %c1_i32_91 = arith.constant 1 : i32
    %c1_i32_92 = arith.constant 1 : i32
    %167 = arith.cmpi eq, %arg1, %c1_i32_92 : i32
    %168 = arith.extui %167 : i1 to i32
    %c0_i32_93 = arith.constant 0 : i32
    %169 = arith.cmpi ne, %168, %c0_i32_93 : i32
    scf.if %169 {
      %c0_94 = arith.constant 0 : index
      %c0_95 = arith.constant 0 : index
      %c0_96 = arith.constant 0 : index
      %170 = vector.load %arg17[%c0_94, %c0_95, %c0_96] : memref<2x8x32xf32, #tpu.memory_space<vmem>>, vector<2x8x32xf32>
      %171 = arith.truncf %170 : vector<2x8x32xf32> to vector<2x8x32xbf16>
      %c0_97 = arith.constant 0 : index
      %c0_98 = arith.constant 0 : index
      %c0_99 = arith.constant 0 : index
      %172 = vector.load %arg16[%c0_97, %c0_98, %c0_99] : memref<2x8x32xbf16, #tpu.memory_space<vmem>>, vector<2x8x32xbf16>
      tpu.vector_store %arg16[%c0_97, %c0_98, %c0_99], %171 {strides = array<i32>} : memref<2x8x32xbf16, #tpu.memory_space<vmem>>, vector<2x8x32xbf16>,
    } else {
    }
    return
  }
  func.func @transform_0(%arg0: i32, %arg1: i32) -> (i32, i32, i32) {
    %c0_i32 = arith.constant 0 : i32
    %c0_i32_0 = arith.constant 0 : i32
    %c0_i32_1 = arith.constant 0 : i32
    return %arg0, %c0_i32, %c0_i32_0 : i32, i32, i32
  }
  func.func @transform_1(%arg0: i32, %arg1: i32) -> (i32, i32) {
    %c0_i32 = arith.constant 0 : i32
    %c0_i32_0 = arith.constant 0 : i32
    %c0_i32_1 = arith.constant 0 : i32
    return %c0_i32, %c0_i32_0 : i32, i32
  }
  func.func @transform_2(%arg0: i32, %arg1: i32) -> (i32, i32, i32) {
    %c0_i32 = arith.constant 0 : i32
    %c0_i32_0 = arith.constant 0 : i32
    %c0_i32_1 = arith.constant 0 : i32
    return %arg1, %c0_i32, %c0_i32_0 : i32, i32, i32
  }
  func.func @transform_3(%arg0: i32, %arg1: i32) -> (i32, i32, i32) {
    %c0_i32 = arith.constant 0 : i32
    %c0_i32_0 = arith.constant 0 : i32
    %c0_i32_1 = arith.constant 0 : i32
    return %arg1, %c0_i32, %c0_i32_0 : i32, i32, i32
  }
  func.func @transform_4(%arg0: i32, %arg1: i32) -> (i32, i32, i32) {
    %c0_i32 = arith.constant 0 : i32
    %c0_i32_0 = arith.constant 0 : i32
    %c0_i32_1 = arith.constant 0 : i32
    return %arg1, %c0_i32, %c0_i32_0 : i32, i32, i32
  }
  func.func @transform_5(%arg0: i32, %arg1: i32) -> (i32, i32, i32) {
    %c0_i32 = arith.constant 0 : i32
    %c0_i32_0 = arith.constant 0 : i32
    %c0_i32_1 = arith.constant 0 : i32
    return %arg1, %c0_i32, %c0_i32_0 : i32, i32, i32
  }
  func.func @transform_6(%arg0: i32, %arg1: i32) -> (i32, i32, i32) {
    %c0_i32 = arith.constant 0 : i32
    %c0_i32_0 = arith.constant 0 : i32
    %c0_i32_1 = arith.constant 0 : i32
    return %arg1, %c0_i32, %c0_i32_0 : i32, i32, i32
  }
  func.func @transform_7(%arg0: i32, %arg1: i32) -> (i32, i32, i32) {
    %c0_i32 = arith.constant 0 : i32
    %c0_i32_0 = arith.constant 0 : i32
    %c0_i32_1 = arith.constant 0 : i32
    return %arg1, %c0_i32, %c0_i32_0 : i32, i32, i32
  }
  func.func @transform_8(%arg0: i32, %arg1: i32) -> (i32, i32, i32) {
    %c0_i32 = arith.constant 0 : i32
    %c0_i32_0 = arith.constant 0 : i32
    %c0_i32_1 = arith.constant 0 : i32
    return %arg1, %c0_i32, %c0_i32_0 : i32, i32, i32
  }
  func.func @transform_9(%arg0: i32, %arg1: i32) -> (i32, i32, i32) {
    %c0_i32 = arith.constant 0 : i32
    %c0_i32_0 = arith.constant 0 : i32
    %c0_i32_1 = arith.constant 0 : i32
    return %arg1, %c0_i32, %c0_i32_0 : i32, i32, i32
  }
  func.func @transform_10(%arg0: i32, %arg1: i32) -> (i32, i32, i32) {
    %c0_i32 = arith.constant 0 : i32
    %c0_i32_0 = arith.constant 0 : i32
    %c0_i32_1 = arith.constant 0 : i32
    return %arg1, %c0_i32, %c0_i32_0 : i32, i32, i32
  }
  func.func @transform_11(%arg0: i32, %arg1: i32) -> (i32, i32, i32) {
    %c0_i32 = arith.constant 0 : i32
    %c0_i32_0 = arith.constant 0 : i32
    %c0_i32_1 = arith.constant 0 : i32
    return %arg1, %c0_i32, %c0_i32_0 : i32, i32, i32
  }
  func.func @transform_12(%arg0: i32, %arg1: i32) -> (i32, i32, i32) {
    %c0_i32 = arith.constant 0 : i32
    %c0_i32_0 = arith.constant 0 : i32
    %c0_i32_1 = arith.constant 0 : i32
    return %arg1, %c0_i32, %c0_i32_0 : i32, i32, i32
  }
  func.func @transform_13(%arg0: i32, %arg1: i32) -> (i32, i32, i32) {
    %c0_i32 = arith.constant 0 : i32
    %c0_i32_0 = arith.constant 0 : i32
    %c0_i32_1 = arith.constant 0 : i32
    return %arg1, %c0_i32, %c0_i32_0 : i32, i32, i32
  }
  func.func @transform_14(%arg0: i32, %arg1: i32) -> (i32, i32, i32) {
    %c0_i32 = arith.constant 0 : i32
    %c0_i32_0 = arith.constant 0 : i32
    %c0_i32_1 = arith.constant 0 : i32
    return %arg0, %c0_i32, %c0_i32_0 : i32, i32, i32
  }
}

</mosaic_0001>

<bundles_post_ra>
// kernel: tpu_custom_call.1
= control target key start
LH: loop header
LB: loop body
LE: loop exit
PB: predicated region body
PF: predicated region fallthrough
CT: control target
= control target key end

     0   :  { %s4498_s0 = inlined_call_operand.vmem [shape: bf16[2,8,32], index: 0, kind: input, shape index: {}]   ;;  %s4499_s1 = inlined_call_operand.vmem [shape: f32[8,8], index: 1, kind: input, shape index: {}]   ;;  %s4500_s2 = inlined_call_operand.vmem [shape: f32[2,1,32], index: 2, kind: input, shape index: {}]   ;;  %s4501_s3 = inlined_call_operand.vmem [shape: f32[2,1,32], index: 3, kind: input, shape index: {}]   ;;  %s4502_s4 = inlined_call_operand.vmem [shape: bf16[2,32,96], index: 4, kind: input, shape index: {}]   ;;  %s4503_s5 = inlined_call_operand.vmem [shape: f32[2,1,96], index: 5, kind: input, shape index: {}]   ;;  %s4504_s6 = inlined_call_operand.vmem [shape: bf16[2,32,32], index: 6, kind: input, shape index: {}]   ;;  %s4505_s7 = inlined_call_operand.vmem [shape: f32[2,1,32], index: 7, kind: input, shape index: {}]   ;;  %s4506_s8 = inlined_call_operand.vmem [shape: f32[2,1,32], index: 8, kind: input, shape index: {}]   ;;  %s4507_s9 = inlined_call_operand.vmem [shape: f32[2,1,32], index: 9, kind: input, shape index: {}]   ;;  %s4508_s10 = inlined_call_operand.vmem [shape: bf16[2,32,128], index: 10, kind: input, shape index: {}]   ;;  %s4509_s11 = inlined_call_operand.vmem [shape: f32[2,1,128], index: 11, kind: input, shape index: {}]   ;;  %s4510_s12 = inlined_call_operand.vmem [shape: bf16[2,128,32], index: 12, kind: input, shape index: {}]   ;;  %s4511_s13 = inlined_call_operand.vmem [shape: f32[2,1,32], index: 13, kind: input, shape index: {}]   ;;  %s4512_s14 = inlined_call_operand.hbm [shape: bf16[2,8,32], index: 14, kind: output, shape index: {}]  }
   0x1   :  { %4516 = sst [smem:[#allocation13_spill]] %s4502_s4 }
   0x2   :  { %4517 = sst [smem:[#allocation14_spill]] %s4504_s6 }
   0x3   :  { %4518 = sst [smem:[#allocation15_spill]] %s4512_s14 }
   0x4   :  { %19 = vsyncpa [#allocation7], 0  ;;  %s3921_s28 = smov 0   ;;  %s3923_s29 = smov 0  }
   0x5   :  { %s3925_s30 = smov 0  }
   0x6 LB: > { %4519 = sst [smem:[#allocation9_spill]] %s3825_s29  ;;  %s34_s1 = sadd.s32 1, %s3825_s29  ;;  %s3829_s30 = sphi %s3925_s30, %s25_s30   ;;  %s3825_s29 = sphi %s3923_s29, %s4536_s29   ;;  %s3821_s28 = sphi %s3921_s28, %s4535_s28  }
   0x7   : > { %4520 = sst [smem:[#allocation10_spill]] %s3829_s30  ;;  %p35_p0 = scmp.ge.s32.totalorder %s34_s1, 2 }
   0x8   : > { %p3400_p1 = scmp.ge.s32.totalorder %s3829_s30, 1  ;;  %p530_p2 = scmp.lt.s32.totalorder %s3829_s30, 3 }
   0x9   : > { %s4538_s1 = smov (%p35_p0, %s34_s1), 0 }
   0xa   : > { %4521 = sst [smem:[#allocation11_spill]] %s4538_s1  ;;  %p531_p3 = pnand %p3400_p1, %p530_p2 }
   0xc   : > { %534 = sbr.rel (%p531_p3) target bundleno = 2789 (0xae5), region = 76 }
  0x11   : > { %p621_p4 = scmp.lt.s32.totalorder %s3821_s28, 1  ;;  %s4522_s4 = sld [smem:[#allocation13_spill]] }
  0x12   : > { %s4523_s6 = sld [smem:[#allocation14_spill]]  ;;  %p3409_p5 = scmp.ne.s32.totalorder %s3821_s28, 0 }
  0x13   : > { %s3944_s16 = scalar_select %p621_p4, %s3821_s28, 1 }
  0x15   : > { %s3472_s23 = sshll.u32 %s3944_s16, 4  ;;  %s645_s30 = scalar_lea.vmem %s4506_s8, %s3944_s16 }
  0x16   : > { %s648_s26 = scalar_lea.vmem %s4507_s9, %s3944_s16  ;;  %s664_s24 = scalar_lea.vmem %s4511_s13, %s3944_s16 }
  0x17   : > { %s3962_s18 = scalar_lea.vmem %s4522_s4, %s3472_s23  ;;  %s3984_s4 = scalar_lea.vmem %s4508_s10, %s3472_s23 }
  0x18   : > { %s3967_s29 = scalar_lea.vmem %s4523_s6, %s3472_s23  ;;  %s656_s6 = scalar_lea.vmem %s4509_s11, %s3944_s16 }
  0x19   : > { %4524 = sst [smem:[#allocation12_spill]] %s3967_s29  ;;  %s3475_s29 = sshll.u32 %s3944_s16, 6 }
  0x1a   : > { %s3994_s20 = scalar_lea.vmem %s4510_s12, %s3475_s29  ;;  %670 = sbr.rel (%p3409_p5) target bundleno = 35 (0x23), region = 80 }
  0x1f   : > { %v3479_v0 = vld [vmem:[%s4498_s0] sm:$0xff]   ;;  %vm675_vm0 = vcmask 261120  }
  0x20   : > { %v3480_v1 = vunpack.c.l.bf16 %v3479_v0  ;;  %v3481_v2 = vunpack.c.h.bf16 %v3479_v0 }
  0x22   : > { %676 = vst.msk [vmem:[#allocation2] sm:$0xff] %vm675_vm0, %v3480_v1  ;;  %677 = vst.msk [vmem:[#allocation2 + $0x8] sm:$0xff] %vm675_vm0, %v3481_v2 }
  0x23 PF: > { %vm682_vm1 = vcmask 261120   ;;  %v3717_v17 = vld [vmem:[%s3962_s18 + $0x8] sm:$0xff]   ;;  %v3831_v18 = vmov 0.0   ;;  %vm3832_vm2 = vmmov 0   ;;  %v3718_v19 = vld [vmem:[%s3962_s18] sm:$0xff]   ;;  %s4525_s27 = scalar_lea.vmem %s4500_s2, %s3944_s16  ;;  %s4526_s1 = scalar_lea.vmem %s4501_s3, %s3944_s16  ;;  %vm802_vm3 = vcmask 257024  }
  0x24   : > { %3532 = vmatprep.subr.bf16.mxu0 %v3831_v18  ;;  %3536 = vmatprep.mubr.msk.bf16.mxu0 %vm3832_vm2, %v3831_v18  ;;  %v3410_v28 = vld [vmem:[%s4525_s27] ss:$0 sm:$0xff]  ;;  %s4527_s22 = scalar_lea.vmem %s4503_s5, %s3944_s16  ;;  %s3833_s21 = smov 96   ;;  %v3838_v52 = vmov 1983009808   ;;  %v865_v54 = vlaneseq  ;;  %vm1721_vm4 = vcmask 64512  }
  0x25   : > { %3533 = vmatpush3.bf16.msra.mxu0 %v3717_v17  ;;  %3552 = vmatprep.subr.bf16.mxu1 %v3831_v18  ;;  %v3411_v32 = vld [vmem:[%s4526_s1] ss:$0 sm:$0xff]  ;;  %s3834_s25 = smov 104   ;;  %s3835_s23 = smov 120   ;;  %v863_v53 = vunpack.c.l.s4 %v3838_v52  ;;  %v3839_v57 = vmov 1934713408  }
  0x26   : > { %3534 = vmatprep.subr.bf16.mxu0 %v3831_v18  ;;  %3554 = vmatprep.mubr.msk.bf16.mxu1 %vm3832_vm2, %v3831_v18  ;;  %v3412_v37 = vld [vmem:[%s4527_s22] ss:$0 sm:$0xff]  ;;  %s3836_s29 = smov 112   ;;  %s3837_s18 = smov 64   ;;  %v866_v56 = vshrl.u32 %v865_v54, 7  ;;  %v880_v58 = vunpack.c.l.s4 %v3839_v57  ;;  %vm2189_vm5 = vcmask 1043456  }
  0x27   : > { %v864_v55 = vunpack.c.0.s8 %v863_v53  ;;  %s4528_s27 = sld [smem:[#allocation12_spill]]  ;;  %s3841_s17 = smov 16   ;;  %vm2876_vm6 = vcmask 130048   ;;  %vm2879_vm7 = vcmask 195584  }
  0x28   : > { %v881_v1 = vunpack.c.0.s8 %v880_v58  ;;  %s3842_s15 = smov 8   ;;  %s3843_s1 = smov 24  }
  0x29   : > { %v678_v3 = vld [vmem:[#allocation2] sm:$0xff]  ;;  %v679_v4 = vld [vmem:[#allocation2 + $0x8] sm:$0xff]  ;;  %3535 = vmatpush3.bf16.msra.mxu0 %v3718_v19  ;;  %v4069_v63 = vsub.s32 %v864_v55, %v866_v56  ;;  %s4529_s22 = scalar_lea.vmem %s4505_s7, %s3944_s16  ;;  %p3467_p6 = scmp.ne.s32.totalorder %s3821_s28, 1 }
  0x2a   : > { %v683_v5 = vsel %vm682_vm1, %v678_v3, 0.0  ;;  %v686_v6 = vsel %vm682_vm1, %v679_v4, 0.0  ;;  %3540 = vmatprep.subr.bf16.mxu0 %v3831_v18 }
  0x2b   : > { %684 = vadd.xlane.f32.xlu0 %v683_v5 }
  0x2f   : > { %687 = vadd.xlane.f32.xlu0 %v686_v6 }
  0xb4   : > { %v685_v7 = vpop.xlane.xlu0 %684 }
  0xb5   : > { %v690_v8 = vmul.f32 0.03125, %v685_v7 }
  0xb7   : > { %v692_v9 = vsub.f32 %v678_v3, %v690_v8 }
  0xb8   : > { %v688_v10 = vpop.xlane.xlu0 %687 }
  0xb9   : > { %v691_v11 = vmul.f32 0.03125, %v688_v10  ;;  %v694_v12 = vmul.f32 %v692_v9, %v692_v9 }
  0xbb   : > { %v693_v13 = vsub.f32 %v679_v4, %v691_v11  ;;  %v696_v14 = vsel %vm682_vm1, %v694_v12, 0.0 }
  0xbc   : > { %697 = vadd.xlane.f32.xlu1 %v696_v14 }
  0xbd   : > { %v695_v15 = vmul.f32 %v693_v13, %v693_v13 }
  0xbf   : > { %v699_v16 = vsel %vm682_vm1, %v695_v15, 0.0 }
  0xc0   : > { %700 = vadd.xlane.f32.xlu1 %v699_v16 }
 0x145   : > { %v698_v20 = vpop.xlane.xlu1 %697 }
 0x146   : > { %v702_v21 = vmul.f32 0.03125, %v698_v20 }
 0x148   : > { %v704_v22 = vadd.f32 1e-05, %v702_v21 }
 0x149   : > { %v701_v23 = vpop.xlane.xlu1 %700 }
 0x14a   : > { %3731 = vrsqrt.f32 %v704_v22  ;;  %v703_v24 = vmul.f32 0.03125, %v701_v23 }
 0x14c   : > { %v705_v25 = vadd.f32 1e-05, %v703_v24 }
 0x14e   : > { %3733 = vrsqrt.f32 %v705_v25 }
 0x157   : > { %v3732_v26 = vpop.eup %3731 }
 0x158   : > { %v708_v27 = vmul.f32 %v3732_v26, %v692_v9  ;;  %v4072_v9 = vsub.s32 %v881_v1, %v866_v56 }
 0x15a   : > { %v716_v31 = vmul.f32 %v3410_v28, %v708_v27 }
 0x15b   : > { %v3734_v29 = vpop.eup %3733 }
 0x15c   : > { %v709_v30 = vmul.f32 %v3734_v29, %v693_v13  ;;  %v724_v34 = vadd.f32 %v3411_v32, %v716_v31 }
 0x15e   : > { %v717_v33 = vmul.f32 %v3410_v28, %v709_v30 }
 0x160   : > { %v725_v35 = vadd.f32 %v3411_v32, %v717_v33 }
 0x162   : > { %v726_v36 = vpack.c.bf16 %v725_v35, %v724_v34 }
 0x164   : > { %3537 = vmatmul.mubr.msk.bf16.vlgmr.msra.gmra.mxu0 %vm682_vm1, %v726_v36 }
 0x165   : > { %3542 = vmatprep.mubr.msk.bf16.mxu0 %vm3832_vm2, %v3831_v18 }
 0x224   : > { %v787_v38 = vpop.f32.mrf.mxu0 }
 0x225   : > { %v788_v39 = vadd.f32 %v3412_v37, %v787_v38 }
 0x226   : > { %v3538_v40 = vpop.f32.mrf.mxu0 }
 0x227   : > { %v3476_v41 = vpack.c.bf16 %v788_v39, %v788_v39 }
 0x228   : > { %v790_v42 = vpop.f32.mrf.mxu0 }
 0x229   : > { %803 = vst.msk [vmem:[#allocation3] sm:$0xf] %vm802_vm3, %v3476_v41  ;;  %v791_v43 = vadd.f32 %v3412_v37, %v790_v42  ;;  %805 = vrot.lane.b32.xlu0 %v3476_v41, %s3833_s21 }
 0x22a   : > { %v3539_v44 = vpop.f32.mrf.mxu0 }
 0x22b   : > { %v3477_v45 = vpack.c.bf16 %v791_v43, %v791_v43 }
 0x22d   : > { %804 = vst.msk [vmem:[#allocation3 + $0x4] sm:$0xf] %vm802_vm3, %v3477_v45  ;;  %807 = vrot.lane.b32.xlu1 %v3477_v45, %s3833_s21 }
 0x230   : > { %v4042_v49 = vld [vmem:[#allocation3] sm:$0xf] }
 0x231   : > { %v1440_v29 = vshrl.u32 %v4042_v49, 16 }
 0x234   : > { %v4057_v51 = vld [vmem:[#allocation3 + $0x4] sm:$0xf] }
 0x235   : > { %v1452_v37 = vshrl.u32 %v4057_v51, 16 }
 0x29b   : > { %v806_v46 = vpop.permute.xlu0 %805 }
 0x29c   : > { %811 = vst.msk [vmem:[#allocation4] sm:$0xf] %vm802_vm3, %v806_v46 }
 0x29f   : > { %v808_v47 = vpop.permute.xlu1 %807 }
 0x2a0   : > { %812 = vst.msk [vmem:[#allocation4 + $0x4] sm:$0xf] %vm802_vm3, %v808_v47 }
 0x2a3   : > { %v821_v48 = vld [vmem:[#allocation4] sm:$0xf] }
 0x2a4   : > { %833 = vrot.lane.b32.xlu0 %v821_v48, %s3834_s25  ;;  %825 = vrot.lane.b32.xlu1 %v821_v48, %s3835_s23  ;;  %v840_v62 = vshrl.u32 %v821_v48, 16 }
 0x2a7   : > { %v4047_v50 = vld [vmem:[#allocation4 + $0x4] sm:$0xf] }
 0x2a8   : > { %1429 = vrot.lane.b32.xlu0 %v4042_v49, %s3836_s29  ;;  %829 = vrot.lane.b32.xlu1 %v821_v48, %s3836_s29  ;;  %v852_v13 = vshrl.u32 %v4047_v50, 16 }
 0x2ac   : > { %1425 = vrot.lane.b32.xlu1 %v4042_v49, %s3835_s23  ;;  %827 = vrot.lane.b32.xlu0 %v4047_v50, %s3835_s23 }
 0x2b0   : > { %1433 = vrot.lane.b32.xlu1 %v4042_v49, %s3834_s25  ;;  %835 = vrot.lane.b32.xlu0 %v4047_v50, %s3834_s25 }
 0x2b4   : > { %831 = vrot.lane.b32.xlu1 %v4047_v50, %s3836_s29  ;;  %1431 = vrot.lane.b32.xlu0 %v4057_v51, %s3836_s29 }
 0x2b8   : > { %813 = vrot.lane.b32.xlu0 %v3476_v41, %s3837_s18  ;;  %1427 = vrot.lane.b32.xlu1 %v4057_v51, %s3835_s23 }
 0x2bc   : > { %1435 = vrot.lane.b32.xlu1 %v4057_v51, %s3834_s25 }
 0x2c0   : > { %815 = vrot.lane.b32.xlu1 %v3477_v45, %s3837_s18 }
 0x316   : > { %v834_v59 = vpop.permute.xlu0 %833  ;;  %v826_v60 = vpop.permute.xlu1 %825 }
 0x317   : > { %v841_v61 = vshrl.u32 %v826_v60, 16  ;;  %v839_v0 = vpack.i.b16 %v826_v60, %v821_v48  ;;  %v847_v4 = vshrl.u32 %v834_v59, 16 }
 0x319   : > { %v842_v5 = vpack.i.b16 %v841_v61, %v840_v62  ;;  %v868_v8 = vrot.slane %v839_v0, %v4069_v63 }
 0x31a   : > { %v1430_v2 = vpop.permute.xlu0 %1429  ;;  %v830_v3 = vpop.permute.xlu1 %829 }
 0x31b   : > { %v845_v6 = vpack.i.b16 %v834_v59, %v830_v3  ;;  %v846_v7 = vshrl.u32 %v830_v3, 16  ;;  %v902_v15 = vrot.slane %v842_v5, %v4069_v63  ;;  %v1446_v34 = vshrl.u32 %v1430_v2, 16 }
 0x31d   : > { %v848_v10 = vpack.i.b16 %v847_v4, %v846_v7  ;;  %v876_v11 = vrot.slane %v845_v6, %v4069_v63 }
 0x31e   : > { %v828_v12 = vpop.permute.xlu0 %827  ;;  %v1426_v14 = vpop.permute.xlu1 %1425 }
 0x31f   : > { %v877_v16 = vcombine.low %v868_v8, %v876_v11  ;;  %v878_v17 = vcombine.high %v868_v8, %v876_v11  ;;  %v910_v19 = vrot.slane %v848_v10, %v4069_v63  ;;  %v851_v20 = vpack.i.b16 %v828_v12, %v4047_v50 }
 0x320   : > { %v853_v21 = vshrl.u32 %v828_v12, 16  ;;  %v1439_v22 = vpack.i.b16 %v1426_v14, %v4042_v49  ;;  %v1441_v23 = vshrl.u32 %v1426_v14, 16 }
 0x321   : > { %v885_v24 = vrot.slane %v877_v16, %v4072_v9  ;;  %v892_v25 = vrot.slane %v878_v17, %v4072_v9  ;;  %v911_v26 = vcombine.low %v902_v15, %v910_v19  ;;  %v912_v27 = vcombine.high %v902_v15, %v910_v19 }
 0x322   : > { %v854_v28 = vpack.i.b16 %v853_v21, %v852_v13  ;;  %v836_v30 = vpop.permute.xlu0 %835  ;;  %v1434_v31 = vpop.permute.xlu1 %1433  ;;  %v1442_v35 = vpack.i.b16 %v1441_v23, %v1440_v29  ;;  %v936_v40 = vrot.slane %v851_v20, %v4069_v63  ;;  %v1468_v41 = vrot.slane %v1439_v22, %v4069_v63 }
 0x323   : > { %v919_v32 = vrot.slane %v911_v26, %v4072_v9  ;;  %v926_v33 = vrot.slane %v912_v27, %v4072_v9  ;;  %v1445_v36 = vpack.i.b16 %v1434_v31, %v1430_v2  ;;  %v997_v38 = vcombine.low %v885_v24, %v892_v25 }
 0x324   : > { %v3418_v39 = vcombine.high %v885_v24, %v892_v25  ;;  %v970_v43 = vrot.slane %v854_v28, %v4069_v63  ;;  %v1447_v44 = vshrl.u32 %v1434_v31, 16  ;;  %v859_v49 = vshrl.u32 %v836_v30, 16 }
 0x325   : > { %v1022_v42 = vcombine.low %v919_v32, %v926_v33  ;;  %v1476_v45 = vrot.slane %v1445_v36, %v4069_v63  ;;  %v3419_v48 = vcombine.high %v919_v32, %v926_v33  ;;  %v1502_v53 = vrot.slane %v1442_v35, %v4069_v63 }
 0x326   : > { %v832_v46 = vpop.permute.xlu1 %831  ;;  %v4090_v47 = vpop.permute.xlu0 %1431  ;;  %v1448_v54 = vpack.i.b16 %v1447_v44, %v1446_v34  ;;  %v1004_v57 = vrot.slane %v997_v38, %v4069_v63  ;;  %v1012_v58 = vrot.slane %v3418_v39, %v4069_v63 }
 0x327   : > { %v857_v50 = vpack.i.b16 %v836_v30, %v832_v46  ;;  %v858_v52 = vshrl.u32 %v832_v46, 16  ;;  %v1477_v55 = vcombine.low %v1468_v41, %v1476_v45  ;;  %v1478_v56 = vcombine.high %v1468_v41, %v1476_v45 }
 0x328   : > { %v1029_v61 = vrot.slane %v1022_v42, %v4069_v63  ;;  %v1510_v1 = vrot.slane %v1448_v54, %v4069_v63  ;;  %v1037_v4 = vrot.slane %v3419_v48, %v4069_v63  ;;  %v1013_v30 = vcombine.low %v1004_v57, %v1012_v58 }
 0x329   : > { %v860_v59 = vpack.i.b16 %v859_v49, %v858_v52  ;;  %v944_v60 = vrot.slane %v857_v50, %v4069_v63  ;;  %v1485_v62 = vrot.slane %v1477_v55, %v4072_v9  ;;  %v1492_v0 = vrot.slane %v1478_v56, %v4072_v9 }
 0x32a   : > { %v814_v2 = vpop.permute.xlu0 %813  ;;  %v1428_v3 = vpop.permute.xlu1 %1427  ;;  %v1511_v8 = vcombine.low %v1502_v53, %v1510_v1  ;;  %v1512_v10 = vcombine.high %v1502_v53, %v1510_v1  ;;  %v1038_v32 = vcombine.low %v1029_v61, %v1037_v4  ;;  %v1458_v36 = vshrl.u32 %v4090_v47, 16 }
 0x32b   : > { %v945_v5 = vcombine.low %v936_v40, %v944_v60  ;;  %v946_v6 = vcombine.high %v936_v40, %v944_v60  ;;  %v978_v7 = vrot.slane %v860_v59, %v4069_v63  ;;  %819 = vst.msk [vmem:[#allocation5] sm:$0xf] %vm802_vm3, %v814_v2  ;;  %v1597_v11 = vcombine.low %v1485_v62, %v1492_v0 }
 0x32c   : > { %v3426_v12 = vcombine.high %v1485_v62, %v1492_v0  ;;  %v1519_v17 = vrot.slane %v1511_v8, %v4072_v9  ;;  %v1526_v19 = vrot.slane %v1512_v10, %v4072_v9  ;;  %v1453_v29 = vshrl.u32 %v1428_v3, 16 }
 0x32d   : > { %v953_v13 = vrot.slane %v945_v5, %v4072_v9  ;;  %v960_v14 = vrot.slane %v946_v6, %v4072_v9  ;;  %v979_v15 = vcombine.low %v970_v43, %v978_v7  ;;  %v980_v16 = vcombine.high %v970_v43, %v978_v7 }
 0x32e   : > { %v1604_v20 = vrot.slane %v1597_v11, %v4069_v63  ;;  %v1612_v21 = vrot.slane %v3426_v12, %v4069_v63  ;;  %v1436_v22 = vpop.permute.xlu1 %1435  ;;  %v1622_v27 = vcombine.low %v1519_v17, %v1526_v19  ;;  %v3427_v28 = vcombine.high %v1519_v17, %v1526_v19 }
 0x32f   : > { %v987_v23 = vrot.slane %v979_v15, %v4072_v9  ;;  %v994_v24 = vrot.slane %v980_v16, %v4072_v9  ;;  %v1047_v25 = vcombine.low %v953_v13, %v960_v14  ;;  %v3420_v26 = vcombine.high %v953_v13, %v960_v14 }
 0x330   : > { %v1451_v31 = vpack.i.b16 %v1428_v3, %v4057_v51  ;;  %v1613_v33 = vcombine.low %v1604_v20, %v1612_v21  ;;  %v1629_v34 = vrot.slane %v1622_v27, %v4069_v63  ;;  %v1637_v35 = vrot.slane %v3427_v28, %v4069_v63 }
 0x331   : > { %v1054_v39 = vrot.slane %v1047_v25, %v4069_v63  ;;  %v1062_v40 = vrot.slane %v3420_v26, %v4069_v63  ;;  %v1072_v41 = vcombine.low %v987_v23, %v994_v24  ;;  %v1457_v42 = vpack.i.b16 %v1436_v22, %v4090_v47 }
 0x332   : > { %v816_v38 = vpop.permute.xlu1 %815  ;;  %v1638_v43 = vcombine.low %v1629_v34, %v1637_v35  ;;  %v1454_v44 = vpack.i.b16 %v1453_v29, %v1452_v37  ;;  %v1459_v45 = vshrl.u32 %v1436_v22, 16  ;;  %v1020_v46 = vrot.slane %v1013_v30, %v4072_v9 }
 0x333   : > { %820 = vst.msk [vmem:[#allocation5 + $0x4] sm:$0xf] %vm802_vm3, %v816_v38  ;;  %v3421_v48 = vcombine.high %v987_v23, %v994_v24  ;;  %v1536_v49 = vrot.slane %v1451_v31, %v4069_v63  ;;  %v1544_v50 = vrot.slane %v1457_v42, %v4069_v63  ;;  %v1045_v52 = vrot.slane %v1038_v32, %v4072_v9 }
 0x334   : > { %v4126_v53 = vrot.slane %v1613_v33, %v4072_v9  ;;  %v1460_v47 = vpack.i.b16 %v1459_v45, %v1458_v36  ;;  %v3840_v54 = vmov 0   ;;  %v4130_v51 = vrot.slane %v1638_v43, %v4072_v9 }
 0x335   : > { %v1021_v55 = vcombine.high %v1020_v46, %v3840_v54  ;;  %v1545_v37 = vcombine.low %v1536_v49, %v1544_v50  ;;  %v1546_v56 = vcombine.high %v1536_v49, %v1544_v50  ;;  %v1099_v57 = vpack.i.b16 %v1045_v52, %v1020_v46 }
 0x336   : > { %v1046_v58 = vcombine.high %v1045_v52, %v3840_v54  ;;  %v1079_v59 = vrot.slane %v1072_v41, %v4069_v63  ;;  %v1570_v60 = vrot.slane %v1454_v44, %v4069_v63  ;;  %v1578_v61 = vrot.slane %v1460_v47, %v4069_v63 }
 0x337   : > { %v1101_v62 = vshrl.u32 %v1045_v52, 16  ;;  %v1553_v0 = vrot.slane %v1545_v37, %v4072_v9  ;;  %v1560_v1 = vrot.slane %v1546_v56, %v4072_v9  ;;  %v1726_v2 = vsel %vm1721_vm4, %v1099_v57, 0 }
 0x338   : > { %v1105_v3 = vpack.i.b16 %v1046_v58, %v1021_v55  ;;  %v1087_v4 = vrot.slane %v3421_v48, %v4069_v63  ;;  %v1579_v5 = vcombine.low %v1570_v60, %v1578_v61  ;;  %v1580_v6 = vcombine.high %v1570_v60, %v1578_v61  ;;  %3541 = vmatpush3.bf16.xpose.msra.mxu0 %v1726_v2 }
 0x339   : > { %v1100_v7 = vshrl.u32 %v1020_v46, 16  ;;  %v1647_v8 = vcombine.low %v1553_v0, %v1560_v1  ;;  %v3428_v10 = vcombine.high %v1553_v0, %v1560_v1  ;;  %3546 = vmatprep.subr.bf16.mxu0 %v3831_v18  ;;  %v1646_v12 = vcombine.high %v4130_v51, %v3840_v54 }
 0x33a   : > { %v1818_v11 = vsel %vm1721_vm4, %v1105_v3, 0  ;;  %v1587_v13 = vrot.slane %v1579_v5, %v4072_v9  ;;  %v1594_v14 = vrot.slane %v1580_v6, %v4072_v9  ;;  %v1063_v15 = vcombine.low %v1054_v39, %v1062_v40 }
 0x33b   : > { %3553 = vmatpush3.bf16.xpose.msra.mxu1 %v1818_v11  ;;  %v1654_v16 = vrot.slane %v1647_v8, %v4069_v63  ;;  %v1699_v17 = vpack.i.b16 %v4130_v51, %v4126_v53  ;;  %v1102_v19 = vpack.i.b16 %v1101_v62, %v1100_v7  ;;  %v1621_v20 = vcombine.high %v4126_v53, %v3840_v54 }
 0x33c   : > { %3564 = vmatprep.subr.bf16.mxu1 %v3831_v18  ;;  %v1662_v21 = vrot.slane %v3428_v10, %v4069_v63  ;;  %v1672_v22 = vcombine.low %v1587_v13, %v1594_v14  ;;  %v3429_v23 = vcombine.high %v1587_v13, %v1594_v14  ;;  %v1088_v24 = vcombine.low %v1079_v59, %v1087_v4 }
 0x33d   : > { %v1705_v25 = vpack.i.b16 %v1646_v12, %v1621_v20  ;;  %v1070_v28 = vrot.slane %v1063_v15, %v4072_v9  ;;  %v1107_v30 = vshrl.u32 %v1046_v58, 16  ;;  %v1772_v31 = vsel %vm1721_vm4, %v1102_v19, 0 }
 0x33e   : > { %v1679_v26 = vrot.slane %v1672_v22, %v4069_v63  ;;  %v1687_v27 = vrot.slane %v3429_v23, %v4069_v63  ;;  %v1095_v29 = vrot.slane %v1088_v24, %v4072_v9  ;;  %v1663_v32 = vcombine.low %v1654_v16, %v1662_v21 }
 0x33f   : > { %3543 = vmatmul.mubr.msk.bf16.vlgmr.msra.gmra.mxu0 %vm1721_vm4, %v1699_v17  ;;  %v1106_v35 = vshrl.u32 %v1021_v55, 16  ;;  %v1701_v36 = vshrl.u32 %v4130_v51, 16  ;;  %v1700_v41 = vshrl.u32 %v4126_v53, 16  ;;  %v1071_v44 = vcombine.high %v1070_v28, %v3840_v54 }
 0x340   : > { %v1688_v33 = vcombine.low %v1679_v26, %v1687_v27  ;;  %3547 = vmatpush3.bf16.xpose.msra.mxu0 %v1772_v31  ;;  %v1111_v34 = vpack.i.b16 %v1095_v29, %v1070_v28  ;;  %3548 = vmatprep.mubr.msk.bf16.mxu0 %vm3832_vm2, %v3831_v18  ;;  %v1096_v40 = vcombine.high %v1095_v29, %v3840_v54  ;;  %v1113_v50 = vshrl.u32 %v1095_v29, 16 }
 0x341   : > { %3558 = vmatprep.subr.bf16.mxu0 %v3831_v18  ;;  %v1108_v42 = vpack.i.b16 %v1107_v30, %v1106_v35  ;;  %v1670_v43 = vrot.slane %v1663_v32, %v4072_v9  ;;  %v1702_v45 = vpack.i.b16 %v1701_v36, %v1700_v41  ;;  %v1707_v52 = vshrl.u32 %v1646_v12, 16 }
 0x342   : > { %3555 = vmatmul.mubr.msk.bf16.vlgmr.msra.gmra.mxu1 %vm1721_vm4, %v1705_v25  ;;  %v1910_v38 = vsel %vm1721_vm4, %v1111_v34, 0  ;;  %v1695_v39 = vrot.slane %v1688_v33, %v4072_v9  ;;  %v1117_v48 = vpack.i.b16 %v1096_v40, %v1071_v44  ;;  %v1112_v53 = vshrl.u32 %v1070_v28, 16 }
 0x343   : > { %3566 = vmatprep.mubr.msk.bf16.mxu1 %vm3832_vm2, %v3831_v18  ;;  %3565 = vmatpush3.bf16.xpose.msra.mxu1 %v1910_v38  ;;  %v1864_v49 = vsel %vm1721_vm4, %v1108_v42, 0  ;;  %v1706_v55 = vshrl.u32 %v1621_v20, 16  ;;  %v1671_v57 = vcombine.high %v1670_v43, %v3840_v54  ;;  %v1119_v59 = vshrl.u32 %v1096_v40, 16  ;;  %v1121_v42 = vld [vmem:[#allocation5] sm:$0xf] }
 0x344   : > { %3576 = vmatprep.subr.bf16.mxu1 %v3831_v18  ;;  %v1711_v46 = vpack.i.b16 %v1695_v39, %v1670_v43  ;;  %v2002_v47 = vsel %vm1721_vm4, %v1117_v48, 0  ;;  %v1114_v51 = vpack.i.b16 %v1113_v50, %v1112_v53  ;;  %v1696_v37 = vcombine.high %v1695_v39, %v3840_v54  ;;  %v4221_v53 = vld [vmem:[#allocation5 + $0x4] sm:$0xf] }
 0x345   : > { %v1708_v56 = vpack.i.b16 %v1707_v52, %v1706_v55  ;;  %v1713_v61 = vshrl.u32 %v1695_v39, 16  ;;  %v1118_v62 = vshrl.u32 %v1071_v44, 16  ;;  %v1712_v0 = vshrl.u32 %v1670_v43, 16 }
 0x346   : > { %v1956_v58 = vsel %vm1721_vm4, %v1114_v51, 0  ;;  %v1717_v60 = vpack.i.b16 %v1696_v37, %v1671_v57  ;;  %v1719_v4 = vshrl.u32 %v1696_v37, 16  ;;  %v1718_v5 = vshrl.u32 %v1671_v57, 16 }
 0x347   : > { %3549 = vmatmul.mubr.msk.bf16.vlgmr.msra.gmra.mxu0 %vm1721_vm4, %v1702_v45  ;;  %v1120_v1 = vpack.i.b16 %v1119_v59, %v1118_v62  ;;  %v1714_v2 = vpack.i.b16 %v1713_v61, %v1712_v0 }
 0x348   : > { %3559 = vmatpush3.bf16.xpose.msra.mxu0 %v1864_v49  ;;  %3560 = vmatprep.mubr.msk.bf16.mxu0 %vm3832_vm2, %v3831_v18  ;;  %v1720_v6 = vpack.i.b16 %v1719_v4, %v1718_v5 }
 0x349   : > { %3570 = vmatprep.subr.bf16.mxu0 %v3831_v18  ;;  %v2048_v3 = vsel %vm1721_vm4, %v1120_v1, 0 }
 0x34a   : > { %3567 = vmatmul.mubr.msk.bf16.vlgmr.msra.gmra.mxu1 %vm1721_vm4, %v1711_v46 }
 0x34b   : > { %3577 = vmatpush3.bf16.xpose.msra.mxu1 %v2002_v47  ;;  %3578 = vmatprep.mubr.msk.bf16.mxu1 %vm3832_vm2, %v3831_v18 }
 0x34c   : > { %3588 = vmatprep.subr.bf16.mxu1 %v3831_v18 }
 0x34f   : > { %3561 = vmatmul.mubr.msk.bf16.vlgmr.msra.gmra.mxu0 %vm1721_vm4, %v1708_v56 }
 0x350   : > { %3571 = vmatpush3.bf16.xpose.msra.mxu0 %v1956_v58  ;;  %3572 = vmatprep.mubr.msk.bf16.mxu0 %vm3832_vm2, %v3831_v18 }
 0x351   : > { %3582 = vmatprep.subr.bf16.mxu0 %v3831_v18 }
 0x352   : > { %3579 = vmatmul.mubr.msk.bf16.vlgmr.msra.gmra.mxu1 %vm1721_vm4, %v1717_v60 }
 0x353   : > { %3590 = vmatprep.mubr.msk.bf16.mxu1 %vm3832_vm2, %v3831_v18 }
 0x357   : > { %3573 = vmatmul.mubr.msk.bf16.vlgmr.msra.gmra.mxu0 %vm1721_vm4, %v1714_v2 }
 0x358   : > { %3583 = vmatpush3.bf16.xpose.msra.mxu0 %v2048_v3  ;;  %3584 = vmatprep.mubr.msk.bf16.mxu0 %vm3832_vm2, %v3831_v18 }
 0x359   : > { %3594 = vmatprep.subr.bf16.mxu0 %v3831_v18 }
 0x35f   : > { %3585 = vmatmul.mubr.msk.bf16.vlgmr.msra.gmra.mxu0 %vm1721_vm4, %v1720_v6 }
 0x360   : > { %3596 = vmatprep.mubr.msk.bf16.mxu0 %vm3832_vm2, %v3831_v18 }
 0x3ff   : > { %v1762_v7 = vpop.f32.mrf.mxu0 }
 0x400   : > { %v2090_v8 = vsel %vm1721_vm4, %v1762_v7, -inf }
 0x401   : > { %2091 = vmax.xlane.f32.xlu0 %v2090_v8  ;;  %v3544_v11 = vpop.f32.mrf.mxu0 }
 0x402   : > { %v1854_v10 = vpop.f32.mrf.mxu1 }
 0x403   : > { %v1765_v12 = vpop.f32.mrf.mxu0  ;;  %v2096_v14 = vsel %vm1721_vm4, %v1854_v10, -inf }
 0x404   : > { %v3556_v13 = vpop.f32.mrf.mxu1 }
 0x405   : > { %2097 = vmax.xlane.f32.xlu0 %v2096_v14  ;;  %v3545_v16 = vpop.f32.mrf.mxu0 }
 0x406   : > { %v1857_v15 = vpop.f32.mrf.mxu1 }
 0x407   : > { %v1808_v17 = vpop.f32.mrf.mxu0 }
 0x408   : > { %v3557_v19 = vpop.f32.mrf.mxu1  ;;  %v2093_v20 = vsel %vm1721_vm4, %v1808_v17, -inf }
 0x409   : > { %2094 = vmax.xlane.f32.xlu1 %v2093_v20  ;;  %v3550_v21 = vpop.f32.mrf.mxu0 }
 0x40a   : > { %v1946_v22 = vpop.f32.mrf.mxu1 }
 0x40b   : > { %v1811_v23 = vpop.f32.mrf.mxu0  ;;  %v2102_v24 = vsel %vm1721_vm4, %v1946_v22, -inf }
 0x40c   : > { %v3568_v25 = vpop.f32.mrf.mxu1  ;;  %2103 = vmax.xlane.f32.xlu0 %v2102_v24 }
 0x40d   : > { %v3551_v26 = vpop.f32.mrf.mxu0 }
 0x40e   : > { %v1949_v27 = vpop.f32.mrf.mxu1 }
 0x40f   : > { %v1900_v28 = vpop.f32.mrf.mxu0 }
 0x410   : > { %v3569_v29 = vpop.f32.mrf.mxu1  ;;  %v2099_v30 = vsel %vm1721_vm4, %v1900_v28, -inf }
 0x411   : > { %2100 = vmax.xlane.f32.xlu0 %v2099_v30  ;;  %v3562_v31 = vpop.f32.mrf.mxu0 }
 0x412   : > { %v4206_v32 = vpop.f32.mrf.mxu1 }
 0x413   : > { %v1903_v33 = vpop.f32.mrf.mxu0  ;;  %v2108_v34 = vsel %vm1721_vm4, %v4206_v32, -inf }
 0x414   : > { %v3580_v35 = vpop.f32.mrf.mxu1 }
 0x415   : > { %2109 = vmax.xlane.f32.xlu0 %v2108_v34  ;;  %v3563_v36 = vpop.f32.mrf.mxu0 }
 0x416   : > { %v2041_v38 = vpop.f32.mrf.mxu1 }
 0x417   : > { %v4210_v39 = vpop.f32.mrf.mxu0 }
 0x418   : > { %v3581_v40 = vpop.f32.mrf.mxu1  ;;  %v2105_v50 = vsel %vm1721_vm4, %v4210_v39, -inf }
 0x419   : > { %v3574_v41 = vpop.f32.mrf.mxu0 }
 0x41a   : > { %1129 = vrot.lane.b32.xlu1 %v1121_v42, %s3836_s29 }
 0x41b   : > { %v1995_v43 = vpop.f32.mrf.mxu0 }
 0x41d   : > { %v3575_v44 = vpop.f32.mrf.mxu0 }
 0x41e   : > { %1133 = vrot.lane.b32.xlu1 %v1121_v42, %s3834_s25 }
 0x41f   : > { %v4214_v45 = vpop.f32.mrf.mxu0 }
 0x420   : > { %v2111_v52 = vsel %vm1721_vm4, %v4214_v45, -inf }
 0x421   : > { %v3586_v46 = vpop.f32.mrf.mxu0 }
 0x423   : > { %v2087_v48 = vpop.f32.mrf.mxu0 }
 0x425   : > { %v3587_v49 = vpop.f32.mrf.mxu0 }
 0x42b   : > { %1125 = vrot.lane.b32.xlu0 %v1121_v42, %s3835_s23 }
 0x442   : > { %2106 = vmax.xlane.f32.xlu1 %v2105_v50 }
 0x446   : > { %2112 = vmax.xlane.f32.xlu1 %v2111_v52 }
 0x457   : > { %1127 = vrot.lane.b32.xlu1 %v4221_v53, %s3835_s23 }
 0x48a   : > { %v2092_v47 = vpop.xlane.xlu0 %2091 }
 0x48b   : > { %v2114_v55 = vsub.f32 %v1762_v7, %v2092_v47 }
 0x48d   : > { %v2122_v51 = vmul.f32 1.442695, %v2114_v55 }
 0x48e   : > { %v2098_v37 = vpop.xlane.xlu0 %2097 }
 0x48f   : > { %3735 = vpow2.f32 %v2122_v51  ;;  %v2116_v56 = vsub.f32 %v1854_v10, %v2098_v37 }
 0x491   : > { %v2126_v57 = vmul.f32 1.442695, %v2116_v56 }
 0x492   : > { %v2095_v58 = vpop.xlane.xlu1 %2094 }
 0x493   : > { %3737 = vpow2.f32 %v2126_v57  ;;  %v2115_v59 = vsub.f32 %v1808_v17, %v2095_v58  ;;  %v1140_v17 = vshrl.u32 %v1121_v42, 16 }
 0x495   : > { %v2124_v60 = vmul.f32 1.442695, %v2115_v59  ;;  %v2104_v61 = vpop.xlane.xlu0 %2103 }
 0x496   : > { %v2118_v62 = vsub.f32 %v1946_v22, %v2104_v61  ;;  %v1130_v0 = vpop.permute.xlu1 %1129 }
 0x497   : > { %3739 = vpow2.f32 %v2124_v60  ;;  %v1146_v12 = vshrl.u32 %v1130_v0, 16 }
 0x498   : > { %v2130_v1 = vmul.f32 1.442695, %v2118_v62 }
 0x49a   : > { %3741 = vpow2.f32 %v2130_v1  ;;  %v2101_v2 = vpop.xlane.xlu0 %2100  ;;  %v1134_v5 = vpop.permute.xlu1 %1133 }
 0x49b   : > { %v2117_v3 = vsub.f32 %v1900_v28, %v2101_v2  ;;  %v1147_v10 = vshrl.u32 %v1134_v5, 16  ;;  %v1145_v13 = vpack.i.b16 %v1134_v5, %v1130_v0 }
 0x49c   : > { %v4225_v4 = vpop.eup %3735 }
 0x49d   : > { %v2128_v6 = vmul.f32 1.442695, %v2117_v3  ;;  %v2138_v7 = vsel %vm1721_vm4, %v4225_v4, 0.0  ;;  %v1148_v16 = vpack.i.b16 %v1147_v10, %v1146_v12  ;;  %v1176_v22 = vrot.slane %v1145_v13, %v4069_v63 }
 0x49e   : > { %v4229_v8 = vpop.xlane.xlu0 %2109  ;;  %2139 = vadd.xlane.f32.xlu1 %v2138_v7 }
 0x49f   : > { %3743 = vpow2.f32 %v2128_v6  ;;  %v1210_v27 = vrot.slane %v1148_v16, %v4069_v63  ;;  %v2120_v7 = vsub.f32 %v4206_v32, %v4229_v8 }
 0x4a0   : > { %v4231_v11 = vpop.eup %3737 }
 0x4a1   : > { %v2144_v14 = vsel %vm1721_vm4, %v4231_v11, 0.0  ;;  %v2134_v10 = vmul.f32 1.442695, %v2120_v7 }
 0x4a2   : > { %v1126_v15 = vpop.permute.xlu0 %1125  ;;  %2145 = vadd.xlane.f32.xlu1 %v2144_v14 }
 0x4a3   : > { %v1139_v19 = vpack.i.b16 %v1126_v15, %v1121_v42  ;;  %v1141_v20 = vshrl.u32 %v1126_v15, 16  ;;  %3745 = vpow2.f32 %v2134_v10 }
 0x4a4   : > { %v4235_v21 = vpop.eup %3739 }
 0x4a5   : > { %v1142_v23 = vpack.i.b16 %v1141_v20, %v1140_v17  ;;  %v1168_v24 = vrot.slane %v1139_v19, %v4069_v63  ;;  %v2141_v25 = vsel %vm1721_vm4, %v4235_v21, 0.0 }
 0x4a6   : > { %2142 = vadd.xlane.f32.xlu0 %v2141_v25 }
 0x4a7   : > { %v4241_v26 = vpop.eup %3741  ;;  %v1177_v28 = vcombine.low %v1168_v24, %v1176_v22  ;;  %v1178_v29 = vcombine.high %v1168_v24, %v1176_v22  ;;  %v1202_v30 = vrot.slane %v1142_v23, %v4069_v63 }
 0x4a8   : > { %v2150_v31 = vsel %vm1721_vm4, %v4241_v26, 0.0 }
 0x4a9   : > { %v1185_v33 = vrot.slane %v1177_v28, %v4072_v9  ;;  %v1192_v34 = vrot.slane %v1178_v29, %v4072_v9  ;;  %v1211_v35 = vcombine.low %v1202_v30, %v1210_v27  ;;  %v1212_v36 = vcombine.high %v1202_v30, %v1210_v27 }
 0x4aa   : > { %2151 = vadd.xlane.f32.xlu0 %v2150_v31 }
 0x4ab   : > { %v1219_v38 = vrot.slane %v1211_v35, %v4072_v9  ;;  %v1226_v40 = vrot.slane %v1212_v36, %v4072_v9  ;;  %v1297_v41 = vcombine.low %v1185_v33, %v1192_v34  ;;  %v3422_v42 = vcombine.high %v1185_v33, %v1192_v34 }
 0x4ac   : > { %v4251_v43 = vpop.eup %3743 }
 0x4ad   : > { %v1304_v44 = vrot.slane %v1297_v41, %v4069_v63  ;;  %v1312_v46 = vrot.slane %v3422_v42, %v4069_v63  ;;  %v1322_v48 = vcombine.low %v1219_v38, %v1226_v40  ;;  %v3423_v49 = vcombine.high %v1219_v38, %v1226_v40 }
 0x4ae   : > { %v2147_v50 = vsel %vm1721_vm4, %v4251_v43, 0.0 }
 0x4af   : > { %v1329_v52 = vrot.slane %v1322_v48, %v4069_v63  ;;  %v1337_v47 = vrot.slane %v3423_v49, %v4069_v63  ;;  %2148 = vadd.xlane.f32.xlu0 %v2147_v50  ;;  %v1313_v55 = vcombine.low %v1304_v44, %v1312_v46  ;;  %v1152_v49 = vshrl.u32 %v4221_v53, 16 }
 0x4b0   : > { %v4272_v15 = vpop.eup %3745 }
 0x4b1   : > { %v1320_v51 = vrot.slane %v1313_v55, %v4072_v9  ;;  %v1338_v37 = vcombine.low %v1329_v52, %v1337_v47  ;;  %v2156_v16 = vsel %vm1721_vm4, %v4272_v15, 0.0 }
 0x4b3   : > { %1135 = vrot.lane.b32.xlu1 %v4221_v53, %s3834_s25  ;;  %v1345_v56 = vrot.slane %v1338_v37, %v4072_v9  ;;  %v1321_v57 = vcombine.high %v1320_v51, %v3840_v54  ;;  %v1400_v59 = vshrl.u32 %v1320_v51, 16 }
 0x4b5   : > { %v1399_v58 = vpack.i.b16 %v1345_v56, %v1320_v51  ;;  %v1401_v60 = vshrl.u32 %v1345_v56, 16  ;;  %v1346_v61 = vcombine.high %v1345_v56, %v3840_v54  ;;  %v1406_v62 = vshrl.u32 %v1321_v57, 16 }
 0x4b7   : > { %v2191_v0 = vsel %vm2189_vm5, %v1399_v58, 0  ;;  %v1402_v1 = vpack.i.b16 %v1401_v60, %v1400_v59  ;;  %v1405_v2 = vpack.i.b16 %v1346_v61, %v1321_v57  ;;  %v1407_v3 = vshrl.u32 %v1346_v61, 16 }
 0x4b8   : > { %3589 = vmatpush3.bf16.msra.mxu1 %v2191_v0 }
 0x4b9   : > { %v2237_v5 = vsel %vm2189_vm5, %v1402_v1, 0  ;;  %3600 = vmatprep.subr.bf16.mxu1 %v3831_v18  ;;  %v1408_v6 = vpack.i.b16 %v1407_v3, %v1406_v62  ;;  %v2283_v34 = vsel %vm2189_vm5, %v1405_v2, 0 }
 0x4ba   : > { %3595 = vmatpush3.bf16.msra.mxu0 %v2237_v5 }
 0x4bb   : > { %3606 = vmatprep.subr.bf16.mxu0 %v3831_v18  ;;  %v2329_v41 = vsel %vm2189_vm5, %v1408_v6, 0 }
 0x4cb   : > { %v2107_v12 = vpop.xlane.xlu1 %2106 }
 0x4cc   : > { %v2119_v13 = vsub.f32 %v4210_v39, %v2107_v12 }
 0x4ce   : > { %v2132_v14 = vmul.f32 1.442695, %v2119_v13 }
 0x4cf   : > { %v2113_v32 = vpop.xlane.xlu1 %2112 }
 0x4d0   : > { %3747 = vpow2.f32 %v2132_v14  ;;  %v2121_v39 = vsub.f32 %v4214_v45, %v2113_v32 }
 0x4d2   : > { %v2136_v8 = vmul.f32 1.442695, %v2121_v39 }
 0x4d3   : > { %v1128_v23 = vpop.permute.xlu1 %1127 }
 0x4d4   : > { %3749 = vpow2.f32 %v2136_v8  ;;  %v1153_v46 = vshrl.u32 %v1128_v23, 16  ;;  %v1151_v50 = vpack.i.b16 %v1128_v23, %v4221_v53 }
 0x4d6   : > { %v1154_v47 = vpack.i.b16 %v1153_v46, %v1152_v49 }
 0x4d7   : > { %2157 = vadd.xlane.f32.xlu1 %v2156_v16 }
 0x4d8   : > { %v1270_v58 = vrot.slane %v1154_v47, %v4069_v63 }
 0x4dd   : > { %v4276_v17 = vpop.eup %3747 }
 0x4de   : > { %v2153_v19 = vsel %vm1721_vm4, %v4276_v17, 0.0 }
 0x4df   : > { %2154 = vadd.xlane.f32.xlu0 %v2153_v19 }
 0x4e1   : > { %v4283_v20 = vpop.eup %3749 }
 0x4e2   : > { %v2159_v22 = vsel %vm1721_vm4, %v4283_v20, 0.0 }
 0x4f5   : > { %1131 = vrot.lane.b32.xlu0 %v4221_v53, %s3836_s29 }
 0x514   : > { %2160 = vadd.xlane.f32.xlu0 %v2159_v22 }
 0x527   : > { %v2140_v24 = vpop.xlane.xlu1 %2139 }
 0x528   : > { %3751 = vrcp.f32 %v2140_v24 }
 0x52b   : > { %v2146_v25 = vpop.xlane.xlu1 %2145 }
 0x52c   : > { %3753 = vrcp.f32 %v2146_v25 }
 0x52f   : > { %v2143_v27 = vpop.xlane.xlu0 %2142  ;;  %v1136_v48 = vpop.permute.xlu1 %1135 }
 0x530   : > { %3755 = vrcp.f32 %v2143_v27  ;;  %v1159_v55 = vshrl.u32 %v1136_v48, 16 }
 0x533   : > { %v2152_v28 = vpop.xlane.xlu0 %2151 }
 0x535   : > { %v3752_v29 = vpop.eup %3751 }
 0x536   : > { %v2170_v30 = vmul.f32 %v3752_v29, %v4225_v4 }
 0x538   : > { %v2149_v45 = vpop.xlane.xlu0 %2148  ;;  %v2178_v31 = vpack.c.bf16 %v2170_v30, %v2170_v30 }
 0x539   : > { %v3754_v33 = vpop.eup %3753  ;;  %3757 = vrcp.f32 %v2149_v45 }
 0x53a   : > { %3591 = vmatmul.mubr.msk.bf16.vlgmr.msra.gmra.mxu1 %vm1721_vm4, %v2178_v31  ;;  %v2172_v35 = vmul.f32 %v3754_v33, %v4231_v11  ;;  %3759 = vrcp.f32 %v2152_v28 }
 0x53b   : > { %3601 = vmatpush3.bf16.msra.mxu1 %v2283_v34  ;;  %3602 = vmatprep.mubr.msk.bf16.mxu1 %vm3832_vm2, %v3831_v18 }
 0x53c   : > { %3612 = vmatprep.subr.bf16.mxu1 %v3831_v18  ;;  %v2180_v40 = vpack.c.bf16 %v2172_v35, %v2172_v35 }
 0x53d   : > { %v3756_v36 = vpop.eup %3755 }
 0x53e   : > { %v2171_v38 = vmul.f32 %v3756_v36, %v4235_v21 }
 0x540   : > { %v2179_v4 = vpack.c.bf16 %v2171_v38, %v2171_v38 }
 0x542   : > { %3597 = vmatmul.mubr.msk.bf16.vlgmr.msra.gmra.mxu0 %vm1721_vm4, %v2179_v4  ;;  %3603 = vmatmul.mubr.msk.bf16.vlgmr.msra.gmra.mxu1 %vm1721_vm4, %v2180_v40 }
 0x543   : > { %3607 = vmatpush3.bf16.msra.mxu0 %v2329_v41  ;;  %3608 = vmatprep.mubr.msk.bf16.mxu0 %vm3832_vm2, %v3831_v18 }
 0x544   : > { %3618 = vmatprep.subr.bf16.mxu0 %v3831_v18  ;;  %3614 = vmatprep.mubr.msk.bf16.mxu1 %vm3832_vm2, %v3831_v18 }
 0x546   : > { %v3758_v11 = vpop.eup %3757 }
 0x547   : > { %v2173_v21 = vmul.f32 %v3758_v11, %v4251_v43  ;;  %v1236_v43 = vrot.slane %v1151_v50, %v4069_v63  ;;  %v3760_v39 = vpop.eup %3759 }
 0x548   : > { %v2174_v27 = vmul.f32 %v3760_v39, %v4241_v26 }
 0x549   : > { %v2181_v42 = vpack.c.bf16 %v2173_v21, %v2173_v21 }
 0x54a   : > { %v2182_v41 = vpack.c.bf16 %v2174_v27, %v2174_v27 }
 0x54b   : > { %3609 = vmatmul.mubr.msk.bf16.vlgmr.msra.gmra.mxu0 %vm1721_vm4, %v2181_v42 }
 0x54c   : > { %3620 = vmatprep.mubr.msk.bf16.mxu0 %vm3832_vm2, %v3831_v18 }
 0x560   : > { %v2158_v62 = vpop.xlane.xlu1 %2157 }
 0x568   : > { %v2155_v44 = vpop.xlane.xlu0 %2154 }
 0x569   : > { %3761 = vrcp.f32 %v2155_v44 }
 0x56a   : > { %3763 = vrcp.f32 %v2158_v62 }
 0x56c   : > { %v1132_v52 = vpop.permute.xlu0 %1131 }
 0x56d   : > { %v1157_v51 = vpack.i.b16 %v1136_v48, %v1132_v52  ;;  %v1158_v37 = vshrl.u32 %v1132_v52, 16 }
 0x56f   : > { %v1160_v56 = vpack.i.b16 %v1159_v55, %v1158_v37  ;;  %v1244_v57 = vrot.slane %v1157_v51, %v4069_v63 }
 0x571   : > { %v1245_v59 = vcombine.low %v1236_v43, %v1244_v57  ;;  %v1246_v60 = vcombine.high %v1236_v43, %v1244_v57  ;;  %v1278_v61 = vrot.slane %v1160_v56, %v4069_v63 }
 0x573   : > { %v1253_v53 = vrot.slane %v1245_v59, %v4072_v9  ;;  %v1260_v0 = vrot.slane %v1246_v60, %v4072_v9  ;;  %v1279_v1 = vcombine.low %v1270_v58, %v1278_v61  ;;  %v1280_v2 = vcombine.high %v1270_v58, %v1278_v61 }
 0x575   : > { %v1287_v3 = vrot.slane %v1279_v1, %v4072_v9  ;;  %v1294_v5 = vrot.slane %v1280_v2, %v4072_v9  ;;  %v1347_v6 = vcombine.low %v1253_v53, %v1260_v0  ;;  %v3424_v7 = vcombine.high %v1253_v53, %v1260_v0 }
 0x576   : > { %v3762_v23 = vpop.eup %3761 }
 0x577   : > { %v1354_v10 = vrot.slane %v1347_v6, %v4069_v63  ;;  %v1362_v12 = vrot.slane %v3424_v7, %v4069_v63  ;;  %v1372_v13 = vcombine.low %v1287_v3, %v1294_v5  ;;  %v3425_v14 = vcombine.high %v1287_v3, %v1294_v5  ;;  %v3764_v4 = vpop.eup %3763 }
 0x578   : > { %v2175_v31 = vmul.f32 %v3762_v23, %v4276_v17  ;;  %v2176_v42 = vmul.f32 %v3764_v4, %v4272_v15 }
 0x579   : > { %v1379_v16 = vrot.slane %v1372_v13, %v4069_v63  ;;  %v1387_v19 = vrot.slane %v3425_v14, %v4069_v63  ;;  %v1363_v32 = vcombine.low %v1354_v10, %v1362_v12 }
 0x57a   : > { %v2183_v17 = vpack.c.bf16 %v2175_v31, %v2175_v31  ;;  %v2184_v44 = vpack.c.bf16 %v2176_v42, %v2176_v42 }
 0x57b   : > { %v1370_v8 = vrot.slane %v1363_v32, %v4072_v9  ;;  %v1388_v22 = vcombine.low %v1379_v16, %v1387_v19  ;;  %v3719_v32 = vld [vmem:[%s4528_s27 + $0x8] sm:$0xff]  }
 0x57d   : > { %v1395_v24 = vrot.slane %v1388_v22, %v4072_v9  ;;  %v1371_v25 = vcombine.high %v1370_v8, %v3840_v54  ;;  %v1412_v29 = vshrl.u32 %v1370_v8, 16 }
 0x57f   : > { %v1411_v28 = vpack.i.b16 %v1395_v24, %v1370_v8  ;;  %v1413_v30 = vshrl.u32 %v1395_v24, 16  ;;  %v1396_v45 = vcombine.high %v1395_v24, %v3840_v54  ;;  %v1418_v33 = vshrl.u32 %v1371_v25, 16 }
 0x581   : > { %v2375_v34 = vsel %vm2189_vm5, %v1411_v28, 0  ;;  %v1414_v35 = vpack.i.b16 %v1413_v30, %v1412_v29  ;;  %v1417_v36 = vpack.i.b16 %v1396_v45, %v1371_v25  ;;  %v1419_v38 = vshrl.u32 %v1396_v45, 16 }
 0x582   : > { %3613 = vmatpush3.bf16.msra.mxu1 %v2375_v34 }
 0x583   : > { %v2421_v40 = vsel %vm2189_vm5, %v1414_v35, 0  ;;  %3624 = vmatprep.subr.bf16.mxu1 %v3831_v18  ;;  %v1420_v26 = vpack.i.b16 %v1419_v38, %v1418_v33  ;;  %v2467_v11 = vsel %vm2189_vm5, %v1417_v36, 0 }
 0x584   : > { %3619 = vmatpush3.bf16.msra.mxu0 %v2421_v40 }
 0x585   : > { %3615 = vmatmul.mubr.msk.bf16.vlgmr.msra.gmra.mxu1 %vm1721_vm4, %v2182_v41  ;;  %3630 = vmatprep.subr.bf16.mxu0 %v3831_v18  ;;  %v2513_v21 = vsel %vm2189_vm5, %v1420_v26, 0 }
 0x586   : > { %3625 = vmatpush3.bf16.msra.mxu1 %v2467_v11  ;;  %3626 = vmatprep.mubr.msk.bf16.mxu1 %vm3832_vm2, %v3831_v18 }
 0x587   : > { %3621 = vmatmul.mubr.msk.bf16.vlgmr.msra.gmra.mxu0 %vm1721_vm4, %v2183_v17  ;;  %3636 = vmatprep.subr.bf16.mxu1 %v3831_v18 }
 0x588   : > { %3631 = vmatpush3.bf16.msra.mxu0 %v2513_v21  ;;  %3632 = vmatprep.mubr.msk.bf16.mxu0 %vm3832_vm2, %v3831_v18 }
 0x589   : > { %3644 = vmatprep.subr.bf16.mxu0 %v3831_v18 }
 0x58d   : > { %3627 = vmatmul.mubr.msk.bf16.vlgmr.msra.gmra.mxu1 %vm1721_vm4, %v2184_v44 }
 0x58e   : > { %3640 = vmatprep.mubr.msk.bf16.mxu1 %vm3832_vm2, %v3831_v18  ;;  %3637 = vmatpush3.bf16.msra.mxu1 %v3719_v32 }
 0x58f   : > { %3638 = vmatprep.subr.bf16.mxu1 %v3831_v18 }
 0x59d   : > { %v2161_v46 = vpop.xlane.xlu0 %2160 }
 0x59e   : > { %3765 = vrcp.f32 %v2161_v46 }
 0x5ab   : > { %v3766_v48 = vpop.eup %3765 }
 0x5ac   : > { %v2177_v49 = vmul.f32 %v3766_v48, %v4283_v20 }
 0x5ae   : > { %v2185_v15 = vpack.c.bf16 %v2177_v49, %v2177_v49 }
 0x5b0   : > { %3633 = vmatmul.mubr.msk.bf16.vlgmr.msra.gmra.mxu0 %vm1721_vm4, %v2185_v15 }
 0x5b1   : > { %3648 = vmatprep.mubr.msk.bf16.mxu0 %vm3832_vm2, %v3831_v18 }
 0x5fa   : > { %v2227_v50 = vpop.f32.mrf.mxu1 }
 0x5fb   : > { %v2555_v51 = vpack.c.bf16 %v2227_v50, %v2227_v50 }
 0x5fc   : > { %v3592_v52 = vpop.f32.mrf.mxu1 }
 0x5fd   : > { %v2562_v59 = vrot.slane %v2555_v51, %v4069_v63 }
 0x5fe   : > { %v2230_v47 = vpop.f32.mrf.mxu1 }
 0x600   : > { %v3593_v55 = vpop.f32.mrf.mxu1 }
 0x602   : > { %v2273_v37 = vpop.f32.mrf.mxu0  ;;  %v2319_v43 = vpop.f32.mrf.mxu1 }
 0x603   : > { %v2563_v56 = vpack.c.bf16 %v2319_v43, %v2319_v43  ;;  %v2589_v2 = vpack.c.bf16 %v2273_v37, %v2273_v37 }
 0x604   : > { %v3598_v57 = vpop.f32.mrf.mxu0  ;;  %v3604_v58 = vpop.f32.mrf.mxu1 }
 0x605   : > { %v2570_v20 = vrot.slane %v2563_v56, %v4069_v63  ;;  %v2596_v10 = vrot.slane %v2589_v2, %v4069_v63 }
 0x606   : > { %v2276_v60 = vpop.f32.mrf.mxu0  ;;  %v2322_v61 = vpop.f32.mrf.mxu1 }
 0x607   : > { %v2571_v62 = vcombine.low %v2562_v59, %v2570_v20  ;;  %v2572_v53 = vcombine.high %v2562_v59, %v2570_v20 }
 0x608   : > { %v3599_v0 = vpop.f32.mrf.mxu0  ;;  %v3605_v1 = vpop.f32.mrf.mxu1 }
 0x609   : > { %v2579_v6 = vrot.slane %v2571_v62, %v4072_v9  ;;  %v2586_v13 = vrot.slane %v2572_v53, %v4072_v9 }
 0x60b   : > { %v2365_v3 = vpop.f32.mrf.mxu0  ;;  %v2587_v39 = vcombine.high %v2579_v6, %v3840_v54  ;;  %v2588_v24 = vcombine.high %v2586_v13, %v3840_v54  ;;  %v2695_v25 = vshrl.u32 %v2579_v6, 16  ;;  %v2711_v31 = vshrl.u32 %v2586_v13, 16 }
 0x60c   : > { %v2597_v5 = vpack.c.bf16 %v2365_v3, %v2365_v3 }
 0x60d   : > { %v3610_v7 = vpop.f32.mrf.mxu0  ;;  %v2703_v45 = vshrl.u32 %v2587_v39, 16  ;;  %v2719_v40 = vshrl.u32 %v2588_v24, 16 }
 0x60e   : > { %v2604_v12 = vrot.slane %v2597_v5, %v4069_v63 }
 0x60f   : > { %v2368_v14 = vpop.f32.mrf.mxu0 }
 0x610   : > { %v2605_v16 = vcombine.low %v2596_v10, %v2604_v12  ;;  %v2606_v19 = vcombine.high %v2596_v10, %v2604_v12 }
 0x611   : > { %v3611_v8 = vpop.f32.mrf.mxu0 }
 0x612   : > { %v2613_v22 = vrot.slane %v2605_v16, %v4072_v9  ;;  %v2620_v23 = vrot.slane %v2606_v19, %v4072_v9 }
 0x614   : > { %v2621_v27 = vcombine.high %v2613_v22, %v3840_v54  ;;  %v2622_v28 = vcombine.high %v2620_v23, %v3840_v54  ;;  %v2693_v29 = vpack.i.b16 %v2613_v22, %v2579_v6  ;;  %v2696_v30 = vshrl.u32 %v2613_v22, 16 }
 0x615   : > { %v2709_v33 = vpack.i.b16 %v2620_v23, %v2586_v13  ;;  %v2712_v34 = vshrl.u32 %v2620_v23, 16 }
 0x616   : > { %v2697_v35 = vpack.i.b16 %v2696_v30, %v2695_v25  ;;  %v2701_v36 = vpack.i.b16 %v2621_v27, %v2587_v39  ;;  %v2704_v38 = vshrl.u32 %v2621_v27, 16  ;;  %v2717_v4 = vpack.i.b16 %v2622_v28, %v2588_v24 }
 0x617   : > { %v2713_v41 = vpack.i.b16 %v2712_v34, %v2711_v31  ;;  %v2720_v26 = vshrl.u32 %v2622_v28, 16  ;;  %v2755_v11 = vcombine.low %v2693_v29, %v2709_v33 }
 0x618   : > { %v2705_v17 = vpack.i.b16 %v2704_v38, %v2703_v45  ;;  %v2763_v21 = vcombine.low %v2701_v36, %v2717_v4 }
 0x619   : > { %v2721_v42 = vpack.i.b16 %v2720_v26, %v2719_v40  ;;  %v2805_v44 = vcombine.low %v2697_v35, %v2713_v41  ;;  %v2762_v46 = vrot.slane %v2755_v11, %v4069_v63 }
 0x61a   : > { %v2770_v48 = vrot.slane %v2763_v21, %v4069_v63 }
 0x61b   : > { %v2813_v49 = vcombine.low %v2705_v17, %v2721_v42  ;;  %v4368_v50 = vrot.slane %v2805_v44, %v4069_v63 }
 0x61c   : > { %v4365_v15 = vcombine.low %v2762_v46, %v2770_v48 }
 0x61d   : > { %v4371_v52 = vrot.slane %v2813_v49, %v4069_v63 }
 0x61f   : > { %v2837_v47 = vcombine.low %v4368_v50, %v4371_v52 }
 0x645   : > { %v2411_v55 = vpop.f32.mrf.mxu1 }
 0x646   : > { %v2623_v0 = vpack.c.bf16 %v2411_v55, %v2411_v55 }
 0x647   : > { %v3616_v51 = vpop.f32.mrf.mxu1  ;;  %v2457_v37 = vpop.f32.mrf.mxu0 }
 0x648   : > { %v2630_v2 = vrot.slane %v2623_v0, %v4069_v63  ;;  %v2657_v5 = vpack.c.bf16 %v2457_v37, %v2457_v37  ;;  %v3720_v37 = vld [vmem:[%s4528_s27] sm:$0xff]  }
 0x649   : > { %v2414_v43 = vpop.f32.mrf.mxu1  ;;  %v3622_v56 = vpop.f32.mrf.mxu0  ;;  %3639 = vmatpush3.bf16.msra.mxu1 %v3720_v37 }
 0x64a   : > { %v2664_v14 = vrot.slane %v2657_v5, %v4069_v63  ;;  %3652 = vmatprep.subr.bf16.mxu1 %v3831_v18 }
 0x64b   : > { %v3617_v57 = vpop.f32.mrf.mxu1  ;;  %v2460_v58 = vpop.f32.mrf.mxu0 }
 0x64c   : > { %v2794_v57 = vrot.slane %v4365_v15, %v4072_v9 }
 0x64d   : > { %v3623_v59 = vpop.f32.mrf.mxu0  ;;  %v2503_v20 = vpop.f32.mrf.mxu1 }
 0x64e   : > { %v2631_v53 = vpack.c.bf16 %v2503_v20, %v2503_v20 }
 0x64f   : > { %v3628_v60 = vpop.f32.mrf.mxu1 }
 0x650   : > { %v2638_v1 = vrot.slane %v2631_v53, %v4069_v63 }
 0x651   : > { %v2506_v61 = vpop.f32.mrf.mxu1 }
 0x652   : > { %v2639_v3 = vcombine.low %v2630_v2, %v2638_v1  ;;  %v2640_v6 = vcombine.high %v2630_v2, %v2638_v1  ;;  %v2844_v61 = vrot.slane %v2837_v47, %v4072_v9 }
 0x653   : > { %v3629_v62 = vpop.f32.mrf.mxu1 }
 0x654   : > { %v2647_v12 = vrot.slane %v2639_v3, %v4072_v9  ;;  %v2654_v19 = vrot.slane %v2640_v6, %v4072_v9 }
 0x656   : > { %v2655_v22 = vcombine.high %v2647_v12, %v3840_v54  ;;  %v2656_v27 = vcombine.high %v2654_v19, %v3840_v54  ;;  %v2727_v28 = vshrl.u32 %v2647_v12, 16  ;;  %v2743_v34 = vshrl.u32 %v2654_v19, 16 }
 0x658   : > { %v2735_v33 = vshrl.u32 %v2655_v22, 16  ;;  %v2751_v26 = vshrl.u32 %v2656_v27, 16 }
 0x670   : > { %v2549_v7 = vpop.f32.mrf.mxu0 }
 0x671   : > { %v2665_v10 = vpack.c.bf16 %v2549_v7, %v2549_v7 }
 0x672   : > { %v3634_v13 = vpop.f32.mrf.mxu0 }
 0x673   : > { %v2672_v16 = vrot.slane %v2665_v10, %v4069_v63  ;;  %v3446_v13 = vld [vmem:[%s4529_s22] ss:$0 sm:$0xff] }
 0x674   : > { %v2552_v32 = vpop.f32.mrf.mxu0 }
 0x675   : > { %v2673_v39 = vcombine.low %v2664_v14, %v2672_v16  ;;  %v2674_v8 = vcombine.high %v2664_v14, %v2672_v16  ;;  %v2948_v16 = vld [vmem:[#allocation2] sm:$0xff] }
 0x676   : > { %v3635_v23 = vpop.f32.mrf.mxu0 }
 0x677   : > { %v2681_v24 = vrot.slane %v2673_v39, %v4072_v9  ;;  %v2688_v25 = vrot.slane %v2674_v8, %v4072_v9 }
 0x679   : > { %v2689_v29 = vcombine.high %v2681_v24, %v3840_v54  ;;  %v2690_v30 = vcombine.high %v2688_v25, %v3840_v54  ;;  %v2725_v45 = vpack.i.b16 %v2681_v24, %v2647_v12  ;;  %v2728_v31 = vshrl.u32 %v2681_v24, 16 }
 0x67a   : > { %v2741_v35 = vpack.i.b16 %v2688_v25, %v2654_v19  ;;  %v2744_v36 = vshrl.u32 %v2688_v25, 16 }
 0x67b   : > { %v2729_v38 = vpack.i.b16 %v2728_v31, %v2727_v28  ;;  %v2733_v4 = vpack.i.b16 %v2689_v29, %v2655_v22  ;;  %v2736_v40 = vshrl.u32 %v2689_v29, 16  ;;  %v2749_v41 = vpack.i.b16 %v2690_v30, %v2656_v27  ;;  %v2949_v22 = vld [vmem:[#allocation2 + $0x8] sm:$0xff] }
 0x67c   : > { %v2745_v11 = vpack.i.b16 %v2744_v36, %v2743_v34  ;;  %v2752_v17 = vshrl.u32 %v2690_v30, 16  ;;  %v2771_v21 = vcombine.low %v2725_v45, %v2741_v35 }
 0x67d   : > { %v2737_v42 = vpack.i.b16 %v2736_v40, %v2735_v33  ;;  %v2779_v44 = vcombine.low %v2733_v4, %v2749_v41 }
 0x67e   : > { %v2753_v46 = vpack.i.b16 %v2752_v17, %v2751_v26  ;;  %v2821_v48 = vcombine.low %v2729_v38, %v2745_v11  ;;  %v2778_v54 = vrot.slane %v2771_v21, %v4069_v63  ;;  %v3721_v26 = vld [vmem:[%s3984_s4 + $0x8] sm:$0xff]   ;;  %v3722_v11 = vld [vmem:[%s3984_s4] sm:$0xff]  }
 0x67f   : > { %v2786_v49 = vrot.slane %v2779_v44, %v4069_v63  ;;  %3645 = vmatpush3.bf16.msra.mxu0 %v3721_v26 }
 0x680   : > { %v2829_v55 = vcombine.low %v2737_v42, %v2753_v46  ;;  %v2828_v43 = vrot.slane %v2821_v48, %v4069_v63  ;;  %3646 = vmatprep.subr.bf16.mxu0 %v3831_v18 }
 0x681   : > { %v2795_v51 = vcombine.low %v2778_v54, %v2786_v49 }
 0x682   : > { %v2836_v56 = vrot.slane %v2829_v55, %v4069_v63  ;;  %v3450_v55 = vld [vmem:[%s645_s30] ss:$0 sm:$0xff] }
 0x683   : > { %v2802_v58 = vrot.slane %v2795_v51, %v4072_v9  ;;  %3647 = vmatpush3.bf16.msra.mxu0 %v3722_v11 }
 0x684   : > { %v2845_v59 = vcombine.low %v2828_v43, %v2836_v56  ;;  %v3451_v56 = vld [vmem:[%s648_s26] ss:$0 sm:$0xff] }
 0x685   : > { %v2804_v20 = vcombine.high %v2794_v57, %v2802_v58  ;;  %v2803_v60 = vcombine.low %v2794_v57, %v2802_v58 }
 0x686   : > { %v2852_v62 = vrot.slane %v2845_v59, %v4072_v9 }
 0x687   : > { %v2858_v0 = vshrl.u32 %v2803_v60, 16  ;;  %v2864_v1 = vshrl.u32 %v2804_v20, 16 }
 0x688   : > { %v2854_v53 = vcombine.high %v2844_v61, %v2852_v62  ;;  %v2853_v63 = vcombine.low %v2844_v61, %v2852_v62  ;;  %v3724_v61 = vld [vmem:[%s3994_s20 + $0x30] sm:$0xff]   ;;  %v3725_v62 = vld [vmem:[%s3994_s20 + $0x28] sm:$0xff]  }
 0x68a   : > { %v2863_v15 = vpack.i.b16 %v2854_v53, %v2804_v20  ;;  %v2859_v2 = vshrl.u32 %v2853_v63, 16  ;;  %v2865_v3 = vshrl.u32 %v2854_v53, 16  ;;  %v2857_v5 = vpack.i.b16 %v2853_v63, %v2803_v60  ;;  %v3723_v60 = vld [vmem:[%s3994_s20 + $0x38] sm:$0xff]   ;;  %v3726_v53 = vld [vmem:[%s3994_s20 + $0x20] sm:$0xff]  }
 0x68b   : > { %v3727_v63 = vld [vmem:[%s3994_s20 + $0x18] sm:$0xff]  }
 0x68c   : > { %2869 = vrot.lane.b32.xlu1 %v2863_v15, %s3841_s17  ;;  %v2860_v6 = vpack.i.b16 %v2859_v2, %v2858_v0  ;;  %v2866_v7 = vpack.i.b16 %v2865_v3, %v2864_v1  ;;  %v3728_v0 = vld [vmem:[%s3994_s20 + $0x10] sm:$0xff]   ;;  %v3729_v1 = vld [vmem:[%s3994_s20 + $0x8] sm:$0xff]   ;;  %v3730_v15 = vld [vmem:[%s3994_s20] sm:$0xff]  }
 0x68d   : > { %v3452_v2 = vld [vmem:[%s656_s6] ss:$0 sm:$0xff] }
 0x68e   : > { %2867 = vrot.lane.b32.xlu0 %v2860_v6, %s3842_s15 }
 0x690   : > { %2871 = vrot.lane.b32.xlu1 %v2866_v7, %s3843_s1 }
 0x6fe   : > { %v2870_v50 = vpop.permute.xlu1 %2869 }
 0x700   : > { %v2868_v9 = vpop.permute.xlu0 %2867 }
 0x701   : > { %v2875_v52 = vsel %vm1721_vm4, %v2857_v5, %v2868_v9 }
 0x702   : > { %v2872_v47 = vpop.permute.xlu1 %2871  ;;  %v2878_v10 = vsel %vm2876_vm6, %v2875_v52, %v2870_v50 }
 0x703   : > { %v2881_v12 = vsel %vm2879_vm7, %v2878_v10, %v2872_v47 }
 0x704   : > { %3641 = vmatmul.mubr.msk.bf16.vlgmr.msra.gmra.mxu1 %vm682_vm1, %v2881_v12 }
 0x705   : > { %3668 = vmatprep.mubr.msk.bf16.mxu1 %vm3832_vm2, %v3831_v18  ;;  %3653 = vmatpush3.bf16.msra.mxu1 %v3723_v60 }
 0x706   : > { %3654 = vmatprep.subr.bf16.mxu1 %v3831_v18 }
 0x709   : > { %3655 = vmatpush3.bf16.msra.mxu1 %v3724_v61 }
 0x70a   : > { %3656 = vmatprep.subr.bf16.mxu1 %v3831_v18 }
 0x70d   : > { %3657 = vmatpush3.bf16.msra.mxu1 %v3725_v62 }
 0x70e   : > { %3658 = vmatprep.subr.bf16.mxu1 %v3831_v18 }
 0x711   : > { %3659 = vmatpush3.bf16.msra.mxu1 %v3726_v53 }
 0x712   : > { %3660 = vmatprep.subr.bf16.mxu1 %v3831_v18 }
 0x715   : > { %3661 = vmatpush3.bf16.msra.mxu1 %v3727_v63 }
 0x716   : > { %3662 = vmatprep.subr.bf16.mxu1 %v3831_v18 }
 0x719   : > { %3663 = vmatpush3.bf16.msra.mxu1 %v3728_v0 }
 0x71a   : > { %3664 = vmatprep.subr.bf16.mxu1 %v3831_v18 }
 0x71d   : > { %3665 = vmatpush3.bf16.msra.mxu1 %v3729_v1 }
 0x71e   : > { %3666 = vmatprep.subr.bf16.mxu1 %v3831_v18 }
 0x721   : > { %3667 = vmatpush3.bf16.msra.mxu1 %v3730_v15 }
 0x7c4   : > { %v2941_v14 = vpop.f32.mrf.mxu1 }
 0x7c5   : > { %v2942_v19 = vadd.f32 %v3446_v13, %v2941_v14 }
 0x7c6   : > { %v3642_v32 = vpop.f32.mrf.mxu1 }
 0x7c7   : > { %v2950_v39 = vadd.f32 %v2948_v16, %v2942_v19 }
 0x7c8   : > { %v2944_v8 = vpop.f32.mrf.mxu1 }
 0x7c9   : > { %2952 = vst.msk [vmem:[#allocation2] sm:$0xff] %vm682_vm1, %v2950_v39  ;;  %v2945_v23 = vadd.f32 %v3446_v13, %v2944_v8 }
 0x7ca   : > { %v3643_v24 = vpop.f32.mrf.mxu1 }
 0x7cb   : > { %v2951_v25 = vadd.f32 %v2949_v22, %v2945_v23  ;;  %v3458_v23 = vld [vmem:[%s664_s24] ss:$0 sm:$0xff] }
 0x7cd   : > { %2953 = vst.msk [vmem:[#allocation2 + $0x8] sm:$0xff] %vm682_vm1, %v2951_v25 }
 0x7d0   : > { %v4412_v27 = vld [vmem:[#allocation2] sm:$0xff] }
 0x7d1   : > { %v2958_v28 = vsel %vm682_vm1, %v4412_v27, 0.0 }
 0x7d2   : > { %2959 = vadd.xlane.f32.xlu1 %v2958_v28 }
 0x7d4   : > { %v4416_v29 = vld [vmem:[#allocation2 + $0x8] sm:$0xff] }
 0x7d5   : > { %v2961_v30 = vsel %vm682_vm1, %v4416_v29, 0.0 }
 0x7d6   : > { %2962 = vadd.xlane.f32.xlu0 %v2961_v30 }
 0x85b   : > { %v2960_v45 = vpop.xlane.xlu1 %2959 }
 0x85c   : > { %v2964_v31 = vmul.f32 0.03125, %v2960_v45 }
 0x85e   : > { %v2966_v33 = vsub.f32 %v4412_v27, %v2964_v31 }
 0x85f   : > { %v2963_v34 = vpop.xlane.xlu0 %2962 }
 0x860   : > { %v2965_v35 = vmul.f32 0.03125, %v2963_v34  ;;  %v2968_v36 = vmul.f32 %v2966_v33, %v2966_v33 }
 0x862   : > { %v2967_v38 = vsub.f32 %v4416_v29, %v2965_v35  ;;  %v2970_v4 = vsel %vm682_vm1, %v2968_v36, 0.0 }
 0x863   : > { %2971 = vadd.xlane.f32.xlu0 %v2970_v4 }
 0x864   : > { %v2969_v40 = vmul.f32 %v2967_v38, %v2967_v38 }
 0x866   : > { %v2973_v41 = vsel %vm682_vm1, %v2969_v40, 0.0 }
 0x867   : > { %2974 = vadd.xlane.f32.xlu0 %v2973_v41 }
 0x8ec   : > { %v2972_v17 = vpop.xlane.xlu0 %2971 }
 0x8ed   : > { %v2976_v21 = vmul.f32 0.03125, %v2972_v17 }
 0x8ef   : > { %v2978_v42 = vadd.f32 1e-05, %v2976_v21 }
 0x8f0   : > { %v2975_v44 = vpop.xlane.xlu0 %2974 }
 0x8f1   : > { %3767 = vrsqrt.f32 %v2978_v42  ;;  %v2977_v46 = vmul.f32 0.03125, %v2975_v44 }
 0x8f3   : > { %v2979_v48 = vadd.f32 1e-05, %v2977_v46 }
 0x8f5   : > { %3769 = vrsqrt.f32 %v2979_v48 }
 0x8fe   : > { %v3768_v54 = vpop.eup %3767 }
 0x8ff   : > { %v2982_v49 = vmul.f32 %v3768_v54, %v2966_v33 }
 0x901   : > { %v2990_v43 = vmul.f32 %v3450_v55, %v2982_v49 }
 0x902   : > { %v3770_v51 = vpop.eup %3769 }
 0x903   : > { %v2983_v37 = vmul.f32 %v3770_v51, %v2967_v38  ;;  %v2998_v58 = vadd.f32 %v3451_v56, %v2990_v43 }
 0x905   : > { %v2991_v57 = vmul.f32 %v3450_v55, %v2983_v37 }
 0x907   : > { %v2999_v59 = vadd.f32 %v3451_v56, %v2991_v57 }
 0x909   : > { %v3000_v20 = vpack.c.bf16 %v2999_v59, %v2998_v58 }
 0x90b   : > { %3649 = vmatmul.mubr.msk.bf16.vlgmr.msra.gmra.mxu0 %vm682_vm1, %v3000_v20 }
 0x9cb   : > { %v3061_v3 = vpop.f32.mrf.mxu0 }
 0x9cc   : > { %v3062_v5 = vadd.f32 %v3452_v2, %v3061_v3 }
 0x9cd   : > { %v3650_v6 = vpop.f32.mrf.mxu0 }
 0x9ce   : > { %v3456_v7 = vmul.f32 -1.702, %v3062_v5 }
 0x9cf   : > { %v3064_v50 = vpop.f32.mrf.mxu0 }
 0x9d0   : > { %v3072_v9 = vmul.f32 1.442695, %v3456_v7  ;;  %v3065_v52 = vadd.f32 %v3452_v2, %v3064_v50 }
 0x9d1   : > { %v3651_v47 = vpop.f32.mrf.mxu0 }
 0x9d2   : > { %3771 = vpow2.f32 %v3072_v9  ;;  %v3457_v10 = vmul.f32 -1.702, %v3065_v52 }
 0x9d4   : > { %v3074_v12 = vmul.f32 1.442695, %v3457_v10 }
 0x9d6   : > { %3773 = vpow2.f32 %v3074_v12 }
 0x9df   : > { %v3772_v18 = vpop.eup %3771 }
 0x9e0   : > { %v3076_v13 = vadd.f32 1.0, %v3772_v18 }
 0x9e2   : > { %3775 = vrcp.f32 %v3076_v13 }
 0x9e3   : > { %v3774_v14 = vpop.eup %3773 }
 0x9e4   : > { %v3077_v16 = vadd.f32 1.0, %v3774_v14 }
 0x9e6   : > { %3777 = vrcp.f32 %v3077_v16 }
 0x9ef   : > { %v3776_v19 = vpop.eup %3775 }
 0x9f0   : > { %v3082_v39 = vmul.f32 %v3776_v19, %v3062_v5 }
 0x9f3   : > { %v3778_v32 = vpop.eup %3777 }
 0x9f4   : > { %v3083_v8 = vmul.f32 %v3778_v32, %v3065_v52 }
 0x9f6   : > { %v3084_v22 = vpack.c.bf16 %v3083_v8, %v3082_v39 }
 0x9f8   : > { %3669 = vmatmul.mubr.bf16.vlgmr.msra.gmra.mxu1 %v3084_v22 }
 0xab8   : > { %v3190_v24 = vpop.f32.mrf.mxu1 }
 0xab9   : > { %v3191_v25 = vadd.f32 %v3458_v23, %v3190_v24 }
 0xaba   : > { %v3670_v28 = vpop.f32.mrf.mxu1 }
 0xabb   : > { %v3197_v30 = vadd.f32 %v3191_v25, %v4412_v27 }
 0xabc   : > { %v3193_v45 = vpop.f32.mrf.mxu1 }
 0xabd   : > { %3199 = vst.msk [vmem:[#allocation2] sm:$0xff] %vm682_vm1, %v3197_v30  ;;  %v3194_v31 = vadd.f32 %v3458_v23, %v3193_v45  ;;  %3204 = sbr.rel (%p3467_p6) target bundleno = 2764 (0xacc), region = 84 }
 0xabe   : > { %v3671_v33 = vpop.f32.mrf.mxu1 }
 0xabf   : > { %v3198_v34 = vadd.f32 %v3194_v31, %v4416_v29 }
 0xac1   : > { %3200 = vst.msk [vmem:[#allocation2 + $0x8] sm:$0xff] %vm682_vm1, %v3198_v34 }
 0xac4   : > { %v3205_v35 = vld [vmem:[#allocation2] sm:$0xff] }
 0xac5   : > { %v3207_v38 = vpack.c.bf16 %v3205_v35, %v3205_v35 }
 0xac7   : > { %3209 = vst.msk [vmem:[#allocation6] sm:$0xf] %vm802_vm3, %v3207_v38 }
 0xac8   : > { %v3206_v36 = vld [vmem:[#allocation2 + $0x8] sm:$0xff] }
 0xac9   : > { %v3208_v4 = vpack.c.bf16 %v3206_v36, %v3206_v36 }
 0xacb   : > { %3210 = vst.msk [vmem:[#allocation6 + $0x4] sm:$0xf] %vm802_vm3, %v3208_v4 }
 0xacc PF: > { %s4530_s16 = sld [smem:[#allocation10_spill]]  ;;  %s3844_s27 = smov [#allocation6]  }
 0xacd   : > { %s3220_s17 = sshll.u32 %s3844_s27, 4  ;;  %s3221_s17 = int_to_ptr.vmem [resolvable:$true] %s3220_s17 }
 0xace   : > { %s3779_s28 = scalar_lea.vmem %s3221_s17, 128  ;;  %p3786_p11 = scmp.lt.s32.totalorder %s3221_s17, %s3221_s17 }
 0xacf   : > { %p3780_p8 = scmp.ne.s32.totalorder %s3221_s17, %s3779_s28  ;;  %p3787_p12 = scmp.lt.s32.totalorder %s3779_s28, %s3779_s28 }
 0xad1   : > { %p3788_p13 = por %p3787_p12, %p3786_p11 }
 0xad2   : > { %s4531_s24 = sadd.s32 4294967295, %s4530_s16  }
 0xad3   : > { %p4472_p7 = scmp.eq.s32.totalorder %s4531_s24, 1 }
 0xad5   : > { %p3781_p9 = pnand %p3780_p8, %p4472_p7 }
 0xad7   : > { %p3782_p10 = pneg %p3781_p9 }
 0xad9   : > { %p3789_p0 = pnand %p3788_p13, %p3782_p10 }
 0xadb   : > { %3792 = shalt.err (!%p3789_p0)
}
 0xadc   : > { %s3845_s15 = smov 4   ;;  %s4533_s19 = sld [smem:[#allocation15_spill]] }
 0xae2   : > { %3673 = dma.vmem_to_hbm [thread:$0]  (%p4472_p7), %s3221_s17, 128, %s4533_s19, [#allocation7], %s3837_s18, %s3837_s18, %s3845_s15  }
 0xae3   : > { %3816 = dma.done.wait (%p4472_p7), [#allocation7], 128  }
 0xae4   : > { %3818 = vsyncadd (%p4472_p7), [#allocation7], 4294967168 }
 0xae5 PF: > { %s4534_s22 = sld [smem:[#allocation10_spill]] }
 0xae6   : > { %s4535_s28 = sld [smem:[#allocation9_spill]] }
 0xae7   : > { %s4536_s29 = sld [smem:[#allocation11_spill]] }
 0xaeb   : > { %s25_s30 = sadd.s32 1, %s4534_s22  }
 0xaec   : > { %p22_p1 = scmp.ge.s32.totalorder %s25_s30, 4  }
 0xaee   :  { %24 = sbr.rel (!%p22_p1) target bundleno = 6 (0x6), region = 148 }
 0xaf3   :  { %3236 = vsyncpa [#allocation7], 1 }
 0xaf4   :  { %3238 = vsyncpa [#allocation7 + $0x1], 1 }

// kernel: tpu_custom_call.1
= control target key start
LH: loop header
LB: loop body
LE: loop exit
PB: predicated region body
PF: predicated region fallthrough
CT: control target
= control target key end

     0   :  { %s4498_s0 = inlined_call_operand.vmem [shape: bf16[2,8,32], index: 0, kind: input, shape index: {}]   ;;  %s4499_s1 = inlined_call_operand.vmem [shape: f32[8,8], index: 1, kind: input, shape index: {}]   ;;  %s4500_s2 = inlined_call_operand.vmem [shape: f32[2,1,32], index: 2, kind: input, shape index: {}]   ;;  %s4501_s3 = inlined_call_operand.vmem [shape: f32[2,1,32], index: 3, kind: input, shape index: {}]   ;;  %s4502_s4 = inlined_call_operand.vmem [shape: bf16[2,32,96], index: 4, kind: input, shape index: {}]   ;;  %s4503_s5 = inlined_call_operand.vmem [shape: f32[2,1,96], index: 5, kind: input, shape index: {}]   ;;  %s4504_s6 = inlined_call_operand.vmem [shape: bf16[2,32,32], index: 6, kind: input, shape index: {}]   ;;  %s4505_s7 = inlined_call_operand.vmem [shape: f32[2,1,32], index: 7, kind: input, shape index: {}]   ;;  %s4506_s8 = inlined_call_operand.vmem [shape: f32[2,1,32], index: 8, kind: input, shape index: {}]   ;;  %s4507_s9 = inlined_call_operand.vmem [shape: f32[2,1,32], index: 9, kind: input, shape index: {}]   ;;  %s4508_s10 = inlined_call_operand.vmem [shape: bf16[2,32,128], index: 10, kind: input, shape index: {}]   ;;  %s4509_s11 = inlined_call_operand.vmem [shape: f32[2,1,128], index: 11, kind: input, shape index: {}]   ;;  %s4510_s12 = inlined_call_operand.vmem [shape: bf16[2,128,32], index: 12, kind: input, shape index: {}]   ;;  %s4511_s13 = inlined_call_operand.vmem [shape: f32[2,1,32], index: 13, kind: input, shape index: {}]   ;;  %s4512_s14 = inlined_call_operand.hbm [shape: bf16[2,8,32], index: 14, kind: output, shape index: {}]  }
   0x1   :  { %4516 = sst [smem:[#allocation13_spill]] %s4502_s4 }
   0x2   :  { %4517 = sst [smem:[#allocation14_spill]] %s4504_s6 }
   0x3   :  { %4518 = sst [smem:[#allocation15_spill]] %s4512_s14 }
   0x4   :  { %19 = vsyncpa [#allocation7], 0  ;;  %s3921_s28 = smov 0   ;;  %s3923_s29 = smov 0  }
   0x5   :  { %s3925_s30 = smov 0  }
   0x6 LB: > { %4519 = sst [smem:[#allocation9_spill]] %s3825_s29  ;;  %s34_s1 = sadd.s32 1, %s3825_s29  ;;  %s3829_s30 = sphi %s3925_s30, %s25_s30   ;;  %s3825_s29 = sphi %s3923_s29, %s4536_s29   ;;  %s3821_s28 = sphi %s3921_s28, %s4535_s28  }
   0x7   : > { %4520 = sst [smem:[#allocation10_spill]] %s3829_s30  ;;  %p35_p0 = scmp.ge.s32.totalorder %s34_s1, 2 }
   0x8   : > { %p3400_p1 = scmp.ge.s32.totalorder %s3829_s30, 1  ;;  %p530_p2 = scmp.lt.s32.totalorder %s3829_s30, 3 }
   0x9   : > { %s4538_s1 = smov (%p35_p0, %s34_s1), 0 }
   0xa   : > { %4521 = sst [smem:[#allocation11_spill]] %s4538_s1  ;;  %p531_p3 = pnand %p3400_p1, %p530_p2 }
   0xc   : > { %534 = sbr.rel (%p531_p3) target bundleno = 2789 (0xae5), region = 76 }
  0x11   : > { %p621_p4 = scmp.lt.s32.totalorder %s3821_s28, 1  ;;  %s4522_s4 = sld [smem:[#allocation13_spill]] }
  0x12   : > { %s4523_s6 = sld [smem:[#allocation14_spill]]  ;;  %p3409_p5 = scmp.ne.s32.totalorder %s3821_s28, 0 }
  0x13   : > { %s3944_s16 = scalar_select %p621_p4, %s3821_s28, 1 }
  0x15   : > { %s3472_s23 = sshll.u32 %s3944_s16, 4  ;;  %s645_s30 = scalar_lea.vmem %s4506_s8, %s3944_s16 }
  0x16   : > { %s648_s26 = scalar_lea.vmem %s4507_s9, %s3944_s16  ;;  %s664_s24 = scalar_lea.vmem %s4511_s13, %s3944_s16 }
  0x17   : > { %s3962_s18 = scalar_lea.vmem %s4522_s4, %s3472_s23  ;;  %s3984_s4 = scalar_lea.vmem %s4508_s10, %s3472_s23 }
  0x18   : > { %s3967_s29 = scalar_lea.vmem %s4523_s6, %s3472_s23  ;;  %s656_s6 = scalar_lea.vmem %s4509_s11, %s3944_s16 }
  0x19   : > { %4524 = sst [smem:[#allocation12_spill]] %s3967_s29  ;;  %s3475_s29 = sshll.u32 %s3944_s16, 6 }
  0x1a   : > { %s3994_s20 = scalar_lea.vmem %s4510_s12, %s3475_s29  ;;  %670 = sbr.rel (%p3409_p5) target bundleno = 35 (0x23), region = 80 }
  0x1f   : > { %v3479_v0 = vld [vmem:[%s4498_s0] sm:$0xff]   ;;  %vm675_vm0 = vcmask 261120  }
  0x20   : > { %v3480_v1 = vunpack.c.l.bf16 %v3479_v0  ;;  %v3481_v2 = vunpack.c.h.bf16 %v3479_v0 }
  0x22   : > { %676 = vst.msk [vmem:[#allocation2] sm:$0xff] %vm675_vm0, %v3480_v1  ;;  %677 = vst.msk [vmem:[#allocation2 + $0x8] sm:$0xff] %vm675_vm0, %v3481_v2 }
  0x23 PF: > { %vm682_vm1 = vcmask 261120   ;;  %v3717_v17 = vld [vmem:[%s3962_s18 + $0x8] sm:$0xff]   ;;  %v3831_v18 = vmov 0.0   ;;  %vm3832_vm2 = vmmov 0   ;;  %v3718_v19 = vld [vmem:[%s3962_s18] sm:$0xff]   ;;  %s4525_s27 = scalar_lea.vmem %s4500_s2, %s3944_s16  ;;  %s4526_s1 = scalar_lea.vmem %s4501_s3, %s3944_s16  ;;  %vm802_vm3 = vcmask 257024  }
  0x24   : > { %3532 = vmatprep.subr.bf16.mxu0 %v3831_v18  ;;  %3536 = vmatprep.mubr.msk.bf16.mxu0 %vm3832_vm2, %v3831_v18  ;;  %v3410_v28 = vld [vmem:[%s4525_s27] ss:$0 sm:$0xff]  ;;  %s4527_s22 = scalar_lea.vmem %s4503_s5, %s3944_s16  ;;  %s3833_s21 = smov 96   ;;  %v3838_v52 = vmov 1983009808   ;;  %v865_v54 = vlaneseq  ;;  %vm1721_vm4 = vcmask 64512  }
  0x25   : > { %3533 = vmatpush3.bf16.msra.mxu0 %v3717_v17  ;;  %3552 = vmatprep.subr.bf16.mxu1 %v3831_v18  ;;  %v3411_v32 = vld [vmem:[%s4526_s1] ss:$0 sm:$0xff]  ;;  %s3834_s25 = smov 104   ;;  %s3835_s23 = smov 120   ;;  %v863_v53 = vunpack.c.l.s4 %v3838_v52  ;;  %v3839_v57 = vmov 1934713408  }
  0x26   : > { %3534 = vmatprep.subr.bf16.mxu0 %v3831_v18  ;;  %3554 = vmatprep.mubr.msk.bf16.mxu1 %vm3832_vm2, %v3831_v18  ;;  %v3412_v37 = vld [vmem:[%s4527_s22] ss:$0 sm:$0xff]  ;;  %s3836_s29 = smov 112   ;;  %s3837_s18 = smov 64   ;;  %v866_v56 = vshrl.u32 %v865_v54, 7  ;;  %v880_v58 = vunpack.c.l.s4 %v3839_v57  ;;  %vm2189_vm5 = vcmask 1043456  }
  0x27   : > { %v864_v55 = vunpack.c.0.s8 %v863_v53  ;;  %s4528_s27 = sld [smem:[#allocation12_spill]]  ;;  %s3841_s17 = smov 16   ;;  %vm2876_vm6 = vcmask 130048   ;;  %vm2879_vm7 = vcmask 195584  }
  0x28   : > { %v881_v1 = vunpack.c.0.s8 %v880_v58  ;;  %s3842_s15 = smov 8   ;;  %s3843_s1 = smov 24  }
  0x29   : > { %v678_v3 = vld [vmem:[#allocation2] sm:$0xff]  ;;  %v679_v4 = vld [vmem:[#allocation2 + $0x8] sm:$0xff]  ;;  %3535 = vmatpush3.bf16.msra.mxu0 %v3718_v19  ;;  %v4069_v63 = vsub.s32 %v864_v55, %v866_v56  ;;  %s4529_s22 = scalar_lea.vmem %s4505_s7, %s3944_s16  ;;  %p3467_p6 = scmp.ne.s32.totalorder %s3821_s28, 1 }
  0x2a   : > { %v683_v5 = vsel %vm682_vm1, %v678_v3, 0.0  ;;  %v686_v6 = vsel %vm682_vm1, %v679_v4, 0.0  ;;  %3540 = vmatprep.subr.bf16.mxu0 %v3831_v18 }
  0x2b   : > { %684 = vadd.xlane.f32.xlu0 %v683_v5 }
  0x2f   : > { %687 = vadd.xlane.f32.xlu0 %v686_v6 }
  0xb4   : > { %v685_v7 = vpop.xlane.xlu0 %684 }
  0xb5   : > { %v690_v8 = vmul.f32 0.03125, %v685_v7 }
  0xb7   : > { %v692_v9 = vsub.f32 %v678_v3, %v690_v8 }
  0xb8   : > { %v688_v10 = vpop.xlane.xlu0 %687 }
  0xb9   : > { %v691_v11 = vmul.f32 0.03125, %v688_v10  ;;  %v694_v12 = vmul.f32 %v692_v9, %v692_v9 }
  0xbb   : > { %v693_v13 = vsub.f32 %v679_v4, %v691_v11  ;;  %v696_v14 = vsel %vm682_vm1, %v694_v12, 0.0 }
  0xbc   : > { %697 = vadd.xlane.f32.xlu1 %v696_v14 }
  0xbd   : > { %v695_v15 = vmul.f32 %v693_v13, %v693_v13 }
  0xbf   : > { %v699_v16 = vsel %vm682_vm1, %v695_v15, 0.0 }
  0xc0   : > { %700 = vadd.xlane.f32.xlu1 %v699_v16 }
 0x145   : > { %v698_v20 = vpop.xlane.xlu1 %697 }
 0x146   : > { %v702_v21 = vmul.f32 0.03125, %v698_v20 }
 0x148   : > { %v704_v22 = vadd.f32 1e-05, %v702_v21 }
 0x149   : > { %v701_v23 = vpop.xlane.xlu1 %700 }
 0x14a   : > { %3731 = vrsqrt.f32 %v704_v22  ;;  %v703_v24 = vmul.f32 0.03125, %v701_v23 }
 0x14c   : > { %v705_v25 = vadd.f32 1e-05, %v703_v24 }
 0x14e   : > { %3733 = vrsqrt.f32 %v705_v25 }
 0x157   : > { %v3732_v26 = vpop.eup %3731 }
 0x158   : > { %v708_v27 = vmul.f32 %v3732_v26, %v692_v9  ;;  %v4072_v9 = vsub.s32 %v881_v1, %v866_v56 }
 0x15a   : > { %v716_v31 = vmul.f32 %v3410_v28, %v708_v27 }
 0x15b   : > { %v3734_v29 = vpop.eup %3733 }
 0x15c   : > { %v709_v30 = vmul.f32 %v3734_v29, %v693_v13  ;;  %v724_v34 = vadd.f32 %v3411_v32, %v716_v31 }
 0x15e   : > { %v717_v33 = vmul.f32 %v3410_v28, %v709_v30 }
 0x160   : > { %v725_v35 = vadd.f32 %v3411_v32, %v717_v33 }
 0x162   : > { %v726_v36 = vpack.c.bf16 %v725_v35, %v724_v34 }
 0x164   : > { %3537 = vmatmul.mubr.msk.bf16.vlgmr.msra.gmra.mxu0 %vm682_vm1, %v726_v36 }
 0x165   : > { %3542 = vmatprep.mubr.msk.bf16.mxu0 %vm3832_vm2, %v3831_v18 }
 0x224   : > { %v787_v38 = vpop.f32.mrf.mxu0 }
 0x225   : > { %v788_v39 = vadd.f32 %v3412_v37, %v787_v38 }
 0x226   : > { %v3538_v40 = vpop.f32.mrf.mxu0 }
 0x227   : > { %v3476_v41 = vpack.c.bf16 %v788_v39, %v788_v39 }
 0x228   : > { %v790_v42 = vpop.f32.mrf.mxu0 }
 0x229   : > { %803 = vst.msk [vmem:[#allocation3] sm:$0xf] %vm802_vm3, %v3476_v41  ;;  %v791_v43 = vadd.f32 %v3412_v37, %v790_v42  ;;  %805 = vrot.lane.b32.xlu0 %v3476_v41, %s3833_s21 }
 0x22a   : > { %v3539_v44 = vpop.f32.mrf.mxu0 }
 0x22b   : > { %v3477_v45 = vpack.c.bf16 %v791_v43, %v791_v43 }
 0x22d   : > { %804 = vst.msk [vmem:[#allocation3 + $0x4] sm:$0xf] %vm802_vm3, %v3477_v45  ;;  %807 = vrot.lane.b32.xlu1 %v3477_v45, %s3833_s21 }
 0x230   : > { %v4042_v49 = vld [vmem:[#allocation3] sm:$0xf] }
 0x231   : > { %v1440_v29 = vshrl.u32 %v4042_v49, 16 }
 0x234   : > { %v4057_v51 = vld [vmem:[#allocation3 + $0x4] sm:$0xf] }
 0x235   : > { %v1452_v37 = vshrl.u32 %v4057_v51, 16 }
 0x29b   : > { %v806_v46 = vpop.permute.xlu0 %805 }
 0x29c   : > { %811 = vst.msk [vmem:[#allocation4] sm:$0xf] %vm802_vm3, %v806_v46 }
 0x29f   : > { %v808_v47 = vpop.permute.xlu1 %807 }
 0x2a0   : > { %812 = vst.msk [vmem:[#allocation4 + $0x4] sm:$0xf] %vm802_vm3, %v808_v47 }
 0x2a3   : > { %v821_v48 = vld [vmem:[#allocation4] sm:$0xf] }
 0x2a4   : > { %833 = vrot.lane.b32.xlu0 %v821_v48, %s3834_s25  ;;  %825 = vrot.lane.b32.xlu1 %v821_v48, %s3835_s23  ;;  %v840_v62 = vshrl.u32 %v821_v48, 16 }
 0x2a7   : > { %v4047_v50 = vld [vmem:[#allocation4 + $0x4] sm:$0xf] }
 0x2a8   : > { %1429 = vrot.lane.b32.xlu0 %v4042_v49, %s3836_s29  ;;  %829 = vrot.lane.b32.xlu1 %v821_v48, %s3836_s29  ;;  %v852_v13 = vshrl.u32 %v4047_v50, 16 }
 0x2ac   : > { %1425 = vrot.lane.b32.xlu1 %v4042_v49, %s3835_s23  ;;  %827 = vrot.lane.b32.xlu0 %v4047_v50, %s3835_s23 }
 0x2b0   : > { %1433 = vrot.lane.b32.xlu1 %v4042_v49, %s3834_s25  ;;  %835 = vrot.lane.b32.xlu0 %v4047_v50, %s3834_s25 }
 0x2b4   : > { %831 = vrot.lane.b32.xlu1 %v4047_v50, %s3836_s29  ;;  %1431 = vrot.lane.b32.xlu0 %v4057_v51, %s3836_s29 }
 0x2b8   : > { %813 = vrot.lane.b32.xlu0 %v3476_v41, %s3837_s18  ;;  %1427 = vrot.lane.b32.xlu1 %v4057_v51, %s3835_s23 }
 0x2bc   : > { %1435 = vrot.lane.b32.xlu1 %v4057_v51, %s3834_s25 }
 0x2c0   : > { %815 = vrot.lane.b32.xlu1 %v3477_v45, %s3837_s18 }
 0x316   : > { %v834_v59 = vpop.permute.xlu0 %833  ;;  %v826_v60 = vpop.permute.xlu1 %825 }
 0x317   : > { %v841_v61 = vshrl.u32 %v826_v60, 16  ;;  %v839_v0 = vpack.i.b16 %v826_v60, %v821_v48  ;;  %v847_v4 = vshrl.u32 %v834_v59, 16 }
 0x319   : > { %v842_v5 = vpack.i.b16 %v841_v61, %v840_v62  ;;  %v868_v8 = vrot.slane %v839_v0, %v4069_v63 }
 0x31a   : > { %v1430_v2 = vpop.permute.xlu0 %1429  ;;  %v830_v3 = vpop.permute.xlu1 %829 }
 0x31b   : > { %v845_v6 = vpack.i.b16 %v834_v59, %v830_v3  ;;  %v846_v7 = vshrl.u32 %v830_v3, 16  ;;  %v902_v15 = vrot.slane %v842_v5, %v4069_v63  ;;  %v1446_v34 = vshrl.u32 %v1430_v2, 16 }
 0x31d   : > { %v848_v10 = vpack.i.b16 %v847_v4, %v846_v7  ;;  %v876_v11 = vrot.slane %v845_v6, %v4069_v63 }
 0x31e   : > { %v828_v12 = vpop.permute.xlu0 %827  ;;  %v1426_v14 = vpop.permute.xlu1 %1425 }
 0x31f   : > { %v877_v16 = vcombine.low %v868_v8, %v876_v11  ;;  %v878_v17 = vcombine.high %v868_v8, %v876_v11  ;;  %v910_v19 = vrot.slane %v848_v10, %v4069_v63  ;;  %v851_v20 = vpack.i.b16 %v828_v12, %v4047_v50 }
 0x320   : > { %v853_v21 = vshrl.u32 %v828_v12, 16  ;;  %v1439_v22 = vpack.i.b16 %v1426_v14, %v4042_v49  ;;  %v1441_v23 = vshrl.u32 %v1426_v14, 16 }
 0x321   : > { %v885_v24 = vrot.slane %v877_v16, %v4072_v9  ;;  %v892_v25 = vrot.slane %v878_v17, %v4072_v9  ;;  %v911_v26 = vcombine.low %v902_v15, %v910_v19  ;;  %v912_v27 = vcombine.high %v902_v15, %v910_v19 }
 0x322   : > { %v854_v28 = vpack.i.b16 %v853_v21, %v852_v13  ;;  %v836_v30 = vpop.permute.xlu0 %835  ;;  %v1434_v31 = vpop.permute.xlu1 %1433  ;;  %v1442_v35 = vpack.i.b16 %v1441_v23, %v1440_v29  ;;  %v936_v40 = vrot.slane %v851_v20, %v4069_v63  ;;  %v1468_v41 = vrot.slane %v1439_v22, %v4069_v63 }
 0x323   : > { %v919_v32 = vrot.slane %v911_v26, %v4072_v9  ;;  %v926_v33 = vrot.slane %v912_v27, %v4072_v9  ;;  %v1445_v36 = vpack.i.b16 %v1434_v31, %v1430_v2  ;;  %v997_v38 = vcombine.low %v885_v24, %v892_v25 }
 0x324   : > { %v3418_v39 = vcombine.high %v885_v24, %v892_v25  ;;  %v970_v43 = vrot.slane %v854_v28, %v4069_v63  ;;  %v1447_v44 = vshrl.u32 %v1434_v31, 16  ;;  %v859_v49 = vshrl.u32 %v836_v30, 16 }
 0x325   : > { %v1022_v42 = vcombine.low %v919_v32, %v926_v33  ;;  %v1476_v45 = vrot.slane %v1445_v36, %v4069_v63  ;;  %v3419_v48 = vcombine.high %v919_v32, %v926_v33  ;;  %v1502_v53 = vrot.slane %v1442_v35, %v4069_v63 }
 0x326   : > { %v832_v46 = vpop.permute.xlu1 %831  ;;  %v4090_v47 = vpop.permute.xlu0 %1431  ;;  %v1448_v54 = vpack.i.b16 %v1447_v44, %v1446_v34  ;;  %v1004_v57 = vrot.slane %v997_v38, %v4069_v63  ;;  %v1012_v58 = vrot.slane %v3418_v39, %v4069_v63 }
 0x327   : > { %v857_v50 = vpack.i.b16 %v836_v30, %v832_v46  ;;  %v858_v52 = vshrl.u32 %v832_v46, 16  ;;  %v1477_v55 = vcombine.low %v1468_v41, %v1476_v45  ;;  %v1478_v56 = vcombine.high %v1468_v41, %v1476_v45 }
 0x328   : > { %v1029_v61 = vrot.slane %v1022_v42, %v4069_v63  ;;  %v1510_v1 = vrot.slane %v1448_v54, %v4069_v63  ;;  %v1037_v4 = vrot.slane %v3419_v48, %v4069_v63  ;;  %v1013_v30 = vcombine.low %v1004_v57, %v1012_v58 }
 0x329   : > { %v860_v59 = vpack.i.b16 %v859_v49, %v858_v52  ;;  %v944_v60 = vrot.slane %v857_v50, %v4069_v63  ;;  %v1485_v62 = vrot.slane %v1477_v55, %v4072_v9  ;;  %v1492_v0 = vrot.slane %v1478_v56, %v4072_v9 }
 0x32a   : > { %v814_v2 = vpop.permute.xlu0 %813  ;;  %v1428_v3 = vpop.permute.xlu1 %1427  ;;  %v1511_v8 = vcombine.low %v1502_v53, %v1510_v1  ;;  %v1512_v10 = vcombine.high %v1502_v53, %v1510_v1  ;;  %v1038_v32 = vcombine.low %v1029_v61, %v1037_v4  ;;  %v1458_v36 = vshrl.u32 %v4090_v47, 16 }
 0x32b   : > { %v945_v5 = vcombine.low %v936_v40, %v944_v60  ;;  %v946_v6 = vcombine.high %v936_v40, %v944_v60  ;;  %v978_v7 = vrot.slane %v860_v59, %v4069_v63  ;;  %819 = vst.msk [vmem:[#allocation5] sm:$0xf] %vm802_vm3, %v814_v2  ;;  %v1597_v11 = vcombine.low %v1485_v62, %v1492_v0 }
 0x32c   : > { %v3426_v12 = vcombine.high %v1485_v62, %v1492_v0  ;;  %v1519_v17 = vrot.slane %v1511_v8, %v4072_v9  ;;  %v1526_v19 = vrot.slane %v1512_v10, %v4072_v9  ;;  %v1453_v29 = vshrl.u32 %v1428_v3, 16 }
 0x32d   : > { %v953_v13 = vrot.slane %v945_v5, %v4072_v9  ;;  %v960_v14 = vrot.slane %v946_v6, %v4072_v9  ;;  %v979_v15 = vcombine.low %v970_v43, %v978_v7  ;;  %v980_v16 = vcombine.high %v970_v43, %v978_v7 }
 0x32e   : > { %v1604_v20 = vrot.slane %v1597_v11, %v4069_v63  ;;  %v1612_v21 = vrot.slane %v3426_v12, %v4069_v63  ;;  %v1436_v22 = vpop.permute.xlu1 %1435  ;;  %v1622_v27 = vcombine.low %v1519_v17, %v1526_v19  ;;  %v3427_v28 = vcombine.high %v1519_v17, %v1526_v19 }
 0x32f   : > { %v987_v23 = vrot.slane %v979_v15, %v4072_v9  ;;  %v994_v24 = vrot.slane %v980_v16, %v4072_v9  ;;  %v1047_v25 = vcombine.low %v953_v13, %v960_v14  ;;  %v3420_v26 = vcombine.high %v953_v13, %v960_v14 }
 0x330   : > { %v1451_v31 = vpack.i.b16 %v1428_v3, %v4057_v51  ;;  %v1613_v33 = vcombine.low %v1604_v20, %v1612_v21  ;;  %v1629_v34 = vrot.slane %v1622_v27, %v4069_v63  ;;  %v1637_v35 = vrot.slane %v3427_v28, %v4069_v63 }
 0x331   : > { %v1054_v39 = vrot.slane %v1047_v25, %v4069_v63  ;;  %v1062_v40 = vrot.slane %v3420_v26, %v4069_v63  ;;  %v1072_v41 = vcombine.low %v987_v23, %v994_v24  ;;  %v1457_v42 = vpack.i.b16 %v1436_v22, %v4090_v47 }
 0x332   : > { %v816_v38 = vpop.permute.xlu1 %815  ;;  %v1638_v43 = vcombine.low %v1629_v34, %v1637_v35  ;;  %v1454_v44 = vpack.i.b16 %v1453_v29, %v1452_v37  ;;  %v1459_v45 = vshrl.u32 %v1436_v22, 16  ;;  %v1020_v46 = vrot.slane %v1013_v30, %v4072_v9 }
 0x333   : > { %820 = vst.msk [vmem:[#allocation5 + $0x4] sm:$0xf] %vm802_vm3, %v816_v38  ;;  %v3421_v48 = vcombine.high %v987_v23, %v994_v24  ;;  %v1536_v49 = vrot.slane %v1451_v31, %v4069_v63  ;;  %v1544_v50 = vrot.slane %v1457_v42, %v4069_v63  ;;  %v1045_v52 = vrot.slane %v1038_v32, %v4072_v9 }
 0x334   : > { %v4126_v53 = vrot.slane %v1613_v33, %v4072_v9  ;;  %v1460_v47 = vpack.i.b16 %v1459_v45, %v1458_v36  ;;  %v3840_v54 = vmov 0   ;;  %v4130_v51 = vrot.slane %v1638_v43, %v4072_v9 }
 0x335   : > { %v1021_v55 = vcombine.high %v1020_v46, %v3840_v54  ;;  %v1545_v37 = vcombine.low %v1536_v49, %v1544_v50  ;;  %v1546_v56 = vcombine.high %v1536_v49, %v1544_v50  ;;  %v1099_v57 = vpack.i.b16 %v1045_v52, %v1020_v46 }
 0x336   : > { %v1046_v58 = vcombine.high %v1045_v52, %v3840_v54  ;;  %v1079_v59 = vrot.slane %v1072_v41, %v4069_v63  ;;  %v1570_v60 = vrot.slane %v1454_v44, %v4069_v63  ;;  %v1578_v61 = vrot.slane %v1460_v47, %v4069_v63 }
 0x337   : > { %v1101_v62 = vshrl.u32 %v1045_v52, 16  ;;  %v1553_v0 = vrot.slane %v1545_v37, %v4072_v9  ;;  %v1560_v1 = vrot.slane %v1546_v56, %v4072_v9  ;;  %v1726_v2 = vsel %vm1721_vm4, %v1099_v57, 0 }
 0x338   : > { %v1105_v3 = vpack.i.b16 %v1046_v58, %v1021_v55  ;;  %v1087_v4 = vrot.slane %v3421_v48, %v4069_v63  ;;  %v1579_v5 = vcombine.low %v1570_v60, %v1578_v61  ;;  %v1580_v6 = vcombine.high %v1570_v60, %v1578_v61  ;;  %3541 = vmatpush3.bf16.xpose.msra.mxu0 %v1726_v2 }
 0x339   : > { %v1100_v7 = vshrl.u32 %v1020_v46, 16  ;;  %v1647_v8 = vcombine.low %v1553_v0, %v1560_v1  ;;  %v3428_v10 = vcombine.high %v1553_v0, %v1560_v1  ;;  %3546 = vmatprep.subr.bf16.mxu0 %v3831_v18  ;;  %v1646_v12 = vcombine.high %v4130_v51, %v3840_v54 }
 0x33a   : > { %v1818_v11 = vsel %vm1721_vm4, %v1105_v3, 0  ;;  %v1587_v13 = vrot.slane %v1579_v5, %v4072_v9  ;;  %v1594_v14 = vrot.slane %v1580_v6, %v4072_v9  ;;  %v1063_v15 = vcombine.low %v1054_v39, %v1062_v40 }
 0x33b   : > { %3553 = vmatpush3.bf16.xpose.msra.mxu1 %v1818_v11  ;;  %v1654_v16 = vrot.slane %v1647_v8, %v4069_v63  ;;  %v1699_v17 = vpack.i.b16 %v4130_v51, %v4126_v53  ;;  %v1102_v19 = vpack.i.b16 %v1101_v62, %v1100_v7  ;;  %v1621_v20 = vcombine.high %v4126_v53, %v3840_v54 }
 0x33c   : > { %3564 = vmatprep.subr.bf16.mxu1 %v3831_v18  ;;  %v1662_v21 = vrot.slane %v3428_v10, %v4069_v63  ;;  %v1672_v22 = vcombine.low %v1587_v13, %v1594_v14  ;;  %v3429_v23 = vcombine.high %v1587_v13, %v1594_v14  ;;  %v1088_v24 = vcombine.low %v1079_v59, %v1087_v4 }
 0x33d   : > { %v1705_v25 = vpack.i.b16 %v1646_v12, %v1621_v20  ;;  %v1070_v28 = vrot.slane %v1063_v15, %v4072_v9  ;;  %v1107_v30 = vshrl.u32 %v1046_v58, 16  ;;  %v1772_v31 = vsel %vm1721_vm4, %v1102_v19, 0 }
 0x33e   : > { %v1679_v26 = vrot.slane %v1672_v22, %v4069_v63  ;;  %v1687_v27 = vrot.slane %v3429_v23, %v4069_v63  ;;  %v1095_v29 = vrot.slane %v1088_v24, %v4072_v9  ;;  %v1663_v32 = vcombine.low %v1654_v16, %v1662_v21 }
 0x33f   : > { %3543 = vmatmul.mubr.msk.bf16.vlgmr.msra.gmra.mxu0 %vm1721_vm4, %v1699_v17  ;;  %v1106_v35 = vshrl.u32 %v1021_v55, 16  ;;  %v1701_v36 = vshrl.u32 %v4130_v51, 16  ;;  %v1700_v41 = vshrl.u32 %v4126_v53, 16  ;;  %v1071_v44 = vcombine.high %v1070_v28, %v3840_v54 }
 0x340   : > { %v1688_v33 = vcombine.low %v1679_v26, %v1687_v27  ;;  %3547 = vmatpush3.bf16.xpose.msra.mxu0 %v1772_v31  ;;  %v1111_v34 = vpack.i.b16 %v1095_v29, %v1070_v28  ;;  %3548 = vmatprep.mubr.msk.bf16.mxu0 %vm3832_vm2, %v3831_v18  ;;  %v1096_v40 = vcombine.high %v1095_v29, %v3840_v54  ;;  %v1113_v50 = vshrl.u32 %v1095_v29, 16 }
 0x341   : > { %3558 = vmatprep.subr.bf16.mxu0 %v3831_v18  ;;  %v1108_v42 = vpack.i.b16 %v1107_v30, %v1106_v35  ;;  %v1670_v43 = vrot.slane %v1663_v32, %v4072_v9  ;;  %v1702_v45 = vpack.i.b16 %v1701_v36, %v1700_v41  ;;  %v1707_v52 = vshrl.u32 %v1646_v12, 16 }
 0x342   : > { %3555 = vmatmul.mubr.msk.bf16.vlgmr.msra.gmra.mxu1 %vm1721_vm4, %v1705_v25  ;;  %v1910_v38 = vsel %vm1721_vm4, %v1111_v34, 0  ;;  %v1695_v39 = vrot.slane %v1688_v33, %v4072_v9  ;;  %v1117_v48 = vpack.i.b16 %v1096_v40, %v1071_v44  ;;  %v1112_v53 = vshrl.u32 %v1070_v28, 16 }
 0x343   : > { %3566 = vmatprep.mubr.msk.bf16.mxu1 %vm3832_vm2, %v3831_v18  ;;  %3565 = vmatpush3.bf16.xpose.msra.mxu1 %v1910_v38  ;;  %v1864_v49 = vsel %vm1721_vm4, %v1108_v42, 0  ;;  %v1706_v55 = vshrl.u32 %v1621_v20, 16  ;;  %v1671_v57 = vcombine.high %v1670_v43, %v3840_v54  ;;  %v1119_v59 = vshrl.u32 %v1096_v40, 16  ;;  %v1121_v42 = vld [vmem:[#allocation5] sm:$0xf] }
 0x344   : > { %3576 = vmatprep.subr.bf16.mxu1 %v3831_v18  ;;  %v1711_v46 = vpack.i.b16 %v1695_v39, %v1670_v43  ;;  %v2002_v47 = vsel %vm1721_vm4, %v1117_v48, 0  ;;  %v1114_v51 = vpack.i.b16 %v1113_v50, %v1112_v53  ;;  %v1696_v37 = vcombine.high %v1695_v39, %v3840_v54  ;;  %v4221_v53 = vld [vmem:[#allocation5 + $0x4] sm:$0xf] }
 0x345   : > { %v1708_v56 = vpack.i.b16 %v1707_v52, %v1706_v55  ;;  %v1713_v61 = vshrl.u32 %v1695_v39, 16  ;;  %v1118_v62 = vshrl.u32 %v1071_v44, 16  ;;  %v1712_v0 = vshrl.u32 %v1670_v43, 16 }
 0x346   : > { %v1956_v58 = vsel %vm1721_vm4, %v1114_v51, 0  ;;  %v1717_v60 = vpack.i.b16 %v1696_v37, %v1671_v57  ;;  %v1719_v4 = vshrl.u32 %v1696_v37, 16  ;;  %v1718_v5 = vshrl.u32 %v1671_v57, 16 }
 0x347   : > { %3549 = vmatmul.mubr.msk.bf16.vlgmr.msra.gmra.mxu0 %vm1721_vm4, %v1702_v45  ;;  %v1120_v1 = vpack.i.b16 %v1119_v59, %v1118_v62  ;;  %v1714_v2 = vpack.i.b16 %v1713_v61, %v1712_v0 }
 0x348   : > { %3559 = vmatpush3.bf16.xpose.msra.mxu0 %v1864_v49  ;;  %3560 = vmatprep.mubr.msk.bf16.mxu0 %vm3832_vm2, %v3831_v18  ;;  %v1720_v6 = vpack.i.b16 %v1719_v4, %v1718_v5 }
 0x349   : > { %3570 = vmatprep.subr.bf16.mxu0 %v3831_v18  ;;  %v2048_v3 = vsel %vm1721_vm4, %v1120_v1, 0 }
 0x34a   : > { %3567 = vmatmul.mubr.msk.bf16.vlgmr.msra.gmra.mxu1 %vm1721_vm4, %v1711_v46 }
 0x34b   : > { %3577 = vmatpush3.bf16.xpose.msra.mxu1 %v2002_v47  ;;  %3578 = vmatprep.mubr.msk.bf16.mxu1 %vm3832_vm2, %v3831_v18 }
 0x34c   : > { %3588 = vmatprep.subr.bf16.mxu1 %v3831_v18 }
 0x34f   : > { %3561 = vmatmul.mubr.msk.bf16.vlgmr.msra.gmra.mxu0 %vm1721_vm4, %v1708_v56 }
 0x350   : > { %3571 = vmatpush3.bf16.xpose.msra.mxu0 %v1956_v58  ;;  %3572 = vmatprep.mubr.msk.bf16.mxu0 %vm3832_vm2, %v3831_v18 }
 0x351   : > { %3582 = vmatprep.subr.bf16.mxu0 %v3831_v18 }
 0x352   : > { %3579 = vmatmul.mubr.msk.bf16.vlgmr.msra.gmra.mxu1 %vm1721_vm4, %v1717_v60 }
 0x353   : > { %3590 = vmatprep.mubr.msk.bf16.mxu1 %vm3832_vm2, %v3831_v18 }
 0x357   : > { %3573 = vmatmul.mubr.msk.bf16.vlgmr.msra.gmra.mxu0 %vm1721_vm4, %v1714_v2 }
 0x358   : > { %3583 = vmatpush3.bf16.xpose.msra.mxu0 %v2048_v3  ;;  %3584 = vmatprep.mubr.msk.bf16.mxu0 %vm3832_vm2, %v3831_v18 }
 0x359   : > { %3594 = vmatprep.subr.bf16.mxu0 %v3831_v18 }
 0x35f   : > { %3585 = vmatmul.mubr.msk.bf16.vlgmr.msra.gmra.mxu0 %vm1721_vm4, %v1720_v6 }
 0x360   : > { %3596 = vmatprep.mubr.msk.bf16.mxu0 %vm3832_vm2, %v3831_v18 }
 0x3ff   : > { %v1762_v7 = vpop.f32.mrf.mxu0 }
 0x400   : > { %v2090_v8 = vsel %vm1721_vm4, %v1762_v7, -inf }
 0x401   : > { %2091 = vmax.xlane.f32.xlu0 %v2090_v8  ;;  %v3544_v11 = vpop.f32.mrf.mxu0 }
 0x402   : > { %v1854_v10 = vpop.f32.mrf.mxu1 }
 0x403   : > { %v1765_v12 = vpop.f32.mrf.mxu0  ;;  %v2096_v14 = vsel %vm1721_vm4, %v1854_v10, -inf }
 0x404   : > { %v3556_v13 = vpop.f32.mrf.mxu1 }
 0x405   : > { %2097 = vmax.xlane.f32.xlu0 %v2096_v14  ;;  %v3545_v16 = vpop.f32.mrf.mxu0 }
 0x406   : > { %v1857_v15 = vpop.f32.mrf.mxu1 }
 0x407   : > { %v1808_v17 = vpop.f32.mrf.mxu0 }
 0x408   : > { %v3557_v19 = vpop.f32.mrf.mxu1  ;;  %v2093_v20 = vsel %vm1721_vm4, %v1808_v17, -inf }
 0x409   : > { %2094 = vmax.xlane.f32.xlu1 %v2093_v20  ;;  %v3550_v21 = vpop.f32.mrf.mxu0 }
 0x40a   : > { %v1946_v22 = vpop.f32.mrf.mxu1 }
 0x40b   : > { %v1811_v23 = vpop.f32.mrf.mxu0  ;;  %v2102_v24 = vsel %vm1721_vm4, %v1946_v22, -inf }
 0x40c   : > { %v3568_v25 = vpop.f32.mrf.mxu1  ;;  %2103 = vmax.xlane.f32.xlu0 %v2102_v24 }
 0x40d   : > { %v3551_v26 = vpop.f32.mrf.mxu0 }
 0x40e   : > { %v1949_v27 = vpop.f32.mrf.mxu1 }
 0x40f   : > { %v1900_v28 = vpop.f32.mrf.mxu0 }
 0x410   : > { %v3569_v29 = vpop.f32.mrf.mxu1  ;;  %v2099_v30 = vsel %vm1721_vm4, %v1900_v28, -inf }
 0x411   : > { %2100 = vmax.xlane.f32.xlu0 %v2099_v30  ;;  %v3562_v31 = vpop.f32.mrf.mxu0 }
 0x412   : > { %v4206_v32 = vpop.f32.mrf.mxu1 }
 0x413   : > { %v1903_v33 = vpop.f32.mrf.mxu0  ;;  %v2108_v34 = vsel %vm1721_vm4, %v4206_v32, -inf }
 0x414   : > { %v3580_v35 = vpop.f32.mrf.mxu1 }
 0x415   : > { %2109 = vmax.xlane.f32.xlu0 %v2108_v34  ;;  %v3563_v36 = vpop.f32.mrf.mxu0 }
 0x416   : > { %v2041_v38 = vpop.f32.mrf.mxu1 }
 0x417   : > { %v4210_v39 = vpop.f32.mrf.mxu0 }
 0x418   : > { %v3581_v40 = vpop.f32.mrf.mxu1  ;;  %v2105_v50 = vsel %vm1721_vm4, %v4210_v39, -inf }
 0x419   : > { %v3574_v41 = vpop.f32.mrf.mxu0 }
 0x41a   : > { %1129 = vrot.lane.b32.xlu1 %v1121_v42, %s3836_s29 }
 0x41b   : > { %v1995_v43 = vpop.f32.mrf.mxu0 }
 0x41d   : > { %v3575_v44 = vpop.f32.mrf.mxu0 }
 0x41e   : > { %1133 = vrot.lane.b32.xlu1 %v1121_v42, %s3834_s25 }
 0x41f   : > { %v4214_v45 = vpop.f32.mrf.mxu0 }
 0x420   : > { %v2111_v52 = vsel %vm1721_vm4, %v4214_v45, -inf }
 0x421   : > { %v3586_v46 = vpop.f32.mrf.mxu0 }
 0x423   : > { %v2087_v48 = vpop.f32.mrf.mxu0 }
 0x425   : > { %v3587_v49 = vpop.f32.mrf.mxu0 }
 0x42b   : > { %1125 = vrot.lane.b32.xlu0 %v1121_v42, %s3835_s23 }
 0x442   : > { %2106 = vmax.xlane.f32.xlu1 %v2105_v50 }
 0x446   : > { %2112 = vmax.xlane.f32.xlu1 %v2111_v52 }
 0x457   : > { %1127 = vrot.lane.b32.xlu1 %v4221_v53, %s3835_s23 }
 0x48a   : > { %v2092_v47 = vpop.xlane.xlu0 %2091 }
 0x48b   : > { %v2114_v55 = vsub.f32 %v1762_v7, %v2092_v47 }
 0x48d   : > { %v2122_v51 = vmul.f32 1.442695, %v2114_v55 }
 0x48e   : > { %v2098_v37 = vpop.xlane.xlu0 %2097 }
 0x48f   : > { %3735 = vpow2.f32 %v2122_v51  ;;  %v2116_v56 = vsub.f32 %v1854_v10, %v2098_v37 }
 0x491   : > { %v2126_v57 = vmul.f32 1.442695, %v2116_v56 }
 0x492   : > { %v2095_v58 = vpop.xlane.xlu1 %2094 }
 0x493   : > { %3737 = vpow2.f32 %v2126_v57  ;;  %v2115_v59 = vsub.f32 %v1808_v17, %v2095_v58  ;;  %v1140_v17 = vshrl.u32 %v1121_v42, 16 }
 0x495   : > { %v2124_v60 = vmul.f32 1.442695, %v2115_v59  ;;  %v2104_v61 = vpop.xlane.xlu0 %2103 }
 0x496   : > { %v2118_v62 = vsub.f32 %v1946_v22, %v2104_v61  ;;  %v1130_v0 = vpop.permute.xlu1 %1129 }
 0x497   : > { %3739 = vpow2.f32 %v2124_v60  ;;  %v1146_v12 = vshrl.u32 %v1130_v0, 16 }
 0x498   : > { %v2130_v1 = vmul.f32 1.442695, %v2118_v62 }
 0x49a   : > { %3741 = vpow2.f32 %v2130_v1  ;;  %v2101_v2 = vpop.xlane.xlu0 %2100  ;;  %v1134_v5 = vpop.permute.xlu1 %1133 }
 0x49b   : > { %v2117_v3 = vsub.f32 %v1900_v28, %v2101_v2  ;;  %v1147_v10 = vshrl.u32 %v1134_v5, 16  ;;  %v1145_v13 = vpack.i.b16 %v1134_v5, %v1130_v0 }
 0x49c   : > { %v4225_v4 = vpop.eup %3735 }
 0x49d   : > { %v2128_v6 = vmul.f32 1.442695, %v2117_v3  ;;  %v2138_v7 = vsel %vm1721_vm4, %v4225_v4, 0.0  ;;  %v1148_v16 = vpack.i.b16 %v1147_v10, %v1146_v12  ;;  %v1176_v22 = vrot.slane %v1145_v13, %v4069_v63 }
 0x49e   : > { %v4229_v8 = vpop.xlane.xlu0 %2109  ;;  %2139 = vadd.xlane.f32.xlu1 %v2138_v7 }
 0x49f   : > { %3743 = vpow2.f32 %v2128_v6  ;;  %v1210_v27 = vrot.slane %v1148_v16, %v4069_v63  ;;  %v2120_v7 = vsub.f32 %v4206_v32, %v4229_v8 }
 0x4a0   : > { %v4231_v11 = vpop.eup %3737 }
 0x4a1   : > { %v2144_v14 = vsel %vm1721_vm4, %v4231_v11, 0.0  ;;  %v2134_v10 = vmul.f32 1.442695, %v2120_v7 }
 0x4a2   : > { %v1126_v15 = vpop.permute.xlu0 %1125  ;;  %2145 = vadd.xlane.f32.xlu1 %v2144_v14 }
 0x4a3   : > { %v1139_v19 = vpack.i.b16 %v1126_v15, %v1121_v42  ;;  %v1141_v20 = vshrl.u32 %v1126_v15, 16  ;;  %3745 = vpow2.f32 %v2134_v10 }
 0x4a4   : > { %v4235_v21 = vpop.eup %3739 }
 0x4a5   : > { %v1142_v23 = vpack.i.b16 %v1141_v20, %v1140_v17  ;;  %v1168_v24 = vrot.slane %v1139_v19, %v4069_v63  ;;  %v2141_v25 = vsel %vm1721_vm4, %v4235_v21, 0.0 }
 0x4a6   : > { %2142 = vadd.xlane.f32.xlu0 %v2141_v25 }
 0x4a7   : > { %v4241_v26 = vpop.eup %3741  ;;  %v1177_v28 = vcombine.low %v1168_v24, %v1176_v22  ;;  %v1178_v29 = vcombine.high %v1168_v24, %v1176_v22  ;;  %v1202_v30 = vrot.slane %v1142_v23, %v4069_v63 }
 0x4a8   : > { %v2150_v31 = vsel %vm1721_vm4, %v4241_v26, 0.0 }
 0x4a9   : > { %v1185_v33 = vrot.slane %v1177_v28, %v4072_v9  ;;  %v1192_v34 = vrot.slane %v1178_v29, %v4072_v9  ;;  %v1211_v35 = vcombine.low %v1202_v30, %v1210_v27  ;;  %v1212_v36 = vcombine.high %v1202_v30, %v1210_v27 }
 0x4aa   : > { %2151 = vadd.xlane.f32.xlu0 %v2150_v31 }
 0x4ab   : > { %v1219_v38 = vrot.slane %v1211_v35, %v4072_v9  ;;  %v1226_v40 = vrot.slane %v1212_v36, %v4072_v9  ;;  %v1297_v41 = vcombine.low %v1185_v33, %v1192_v34  ;;  %v3422_v42 = vcombine.high %v1185_v33, %v1192_v34 }
 0x4ac   : > { %v4251_v43 = vpop.eup %3743 }
 0x4ad   : > { %v1304_v44 = vrot.slane %v1297_v41, %v4069_v63  ;;  %v1312_v46 = vrot.slane %v3422_v42, %v4069_v63  ;;  %v1322_v48 = vcombine.low %v1219_v38, %v1226_v40  ;;  %v3423_v49 = vcombine.high %v1219_v38, %v1226_v40 }
 0x4ae   : > { %v2147_v50 = vsel %vm1721_vm4, %v4251_v43, 0.0 }
 0x4af   : > { %v1329_v52 = vrot.slane %v1322_v48, %v4069_v63  ;;  %v1337_v47 = vrot.slane %v3423_v49, %v4069_v63  ;;  %2148 = vadd.xlane.f32.xlu0 %v2147_v50  ;;  %v1313_v55 = vcombine.low %v1304_v44, %v1312_v46  ;;  %v1152_v49 = vshrl.u32 %v4221_v53, 16 }
 0x4b0   : > { %v4272_v15 = vpop.eup %3745 }
 0x4b1   : > { %v1320_v51 = vrot.slane %v1313_v55, %v4072_v9  ;;  %v1338_v37 = vcombine.low %v1329_v52, %v1337_v47  ;;  %v2156_v16 = vsel %vm1721_vm4, %v4272_v15, 0.0 }
 0x4b3   : > { %1135 = vrot.lane.b32.xlu1 %v4221_v53, %s3834_s25  ;;  %v1345_v56 = vrot.slane %v1338_v37, %v4072_v9  ;;  %v1321_v57 = vcombine.high %v1320_v51, %v3840_v54  ;;  %v1400_v59 = vshrl.u32 %v1320_v51, 16 }
 0x4b5   : > { %v1399_v58 = vpack.i.b16 %v1345_v56, %v1320_v51  ;;  %v1401_v60 = vshrl.u32 %v1345_v56, 16  ;;  %v1346_v61 = vcombine.high %v1345_v56, %v3840_v54  ;;  %v1406_v62 = vshrl.u32 %v1321_v57, 16 }
 0x4b7   : > { %v2191_v0 = vsel %vm2189_vm5, %v1399_v58, 0  ;;  %v1402_v1 = vpack.i.b16 %v1401_v60, %v1400_v59  ;;  %v1405_v2 = vpack.i.b16 %v1346_v61, %v1321_v57  ;;  %v1407_v3 = vshrl.u32 %v1346_v61, 16 }
 0x4b8   : > { %3589 = vmatpush3.bf16.msra.mxu1 %v2191_v0 }
 0x4b9   : > { %v2237_v5 = vsel %vm2189_vm5, %v1402_v1, 0  ;;  %3600 = vmatprep.subr.bf16.mxu1 %v3831_v18  ;;  %v1408_v6 = vpack.i.b16 %v1407_v3, %v1406_v62  ;;  %v2283_v34 = vsel %vm2189_vm5, %v1405_v2, 0 }
 0x4ba   : > { %3595 = vmatpush3.bf16.msra.mxu0 %v2237_v5 }
 0x4bb   : > { %3606 = vmatprep.subr.bf16.mxu0 %v3831_v18  ;;  %v2329_v41 = vsel %vm2189_vm5, %v1408_v6, 0 }
 0x4cb   : > { %v2107_v12 = vpop.xlane.xlu1 %2106 }
 0x4cc   : > { %v2119_v13 = vsub.f32 %v4210_v39, %v2107_v12 }
 0x4ce   : > { %v2132_v14 = vmul.f32 1.442695, %v2119_v13 }
 0x4cf   : > { %v2113_v32 = vpop.xlane.xlu1 %2112 }
 0x4d0   : > { %3747 = vpow2.f32 %v2132_v14  ;;  %v2121_v39 = vsub.f32 %v4214_v45, %v2113_v32 }
 0x4d2   : > { %v2136_v8 = vmul.f32 1.442695, %v2121_v39 }
 0x4d3   : > { %v1128_v23 = vpop.permute.xlu1 %1127 }
 0x4d4   : > { %3749 = vpow2.f32 %v2136_v8  ;;  %v1153_v46 = vshrl.u32 %v1128_v23, 16  ;;  %v1151_v50 = vpack.i.b16 %v1128_v23, %v4221_v53 }
 0x4d6   : > { %v1154_v47 = vpack.i.b16 %v1153_v46, %v1152_v49 }
 0x4d7   : > { %2157 = vadd.xlane.f32.xlu1 %v2156_v16 }
 0x4d8   : > { %v1270_v58 = vrot.slane %v1154_v47, %v4069_v63 }
 0x4dd   : > { %v4276_v17 = vpop.eup %3747 }
 0x4de   : > { %v2153_v19 = vsel %vm1721_vm4, %v4276_v17, 0.0 }
 0x4df   : > { %2154 = vadd.xlane.f32.xlu0 %v2153_v19 }
 0x4e1   : > { %v4283_v20 = vpop.eup %3749 }
 0x4e2   : > { %v2159_v22 = vsel %vm1721_vm4, %v4283_v20, 0.0 }
 0x4f5   : > { %1131 = vrot.lane.b32.xlu0 %v4221_v53, %s3836_s29 }
 0x514   : > { %2160 = vadd.xlane.f32.xlu0 %v2159_v22 }
 0x527   : > { %v2140_v24 = vpop.xlane.xlu1 %2139 }
 0x528   : > { %3751 = vrcp.f32 %v2140_v24 }
 0x52b   : > { %v2146_v25 = vpop.xlane.xlu1 %2145 }
 0x52c   : > { %3753 = vrcp.f32 %v2146_v25 }
 0x52f   : > { %v2143_v27 = vpop.xlane.xlu0 %2142  ;;  %v1136_v48 = vpop.permute.xlu1 %1135 }
 0x530   : > { %3755 = vrcp.f32 %v2143_v27  ;;  %v1159_v55 = vshrl.u32 %v1136_v48, 16 }
 0x533   : > { %v2152_v28 = vpop.xlane.xlu0 %2151 }
 0x535   : > { %v3752_v29 = vpop.eup %3751 }
 0x536   : > { %v2170_v30 = vmul.f32 %v3752_v29, %v4225_v4 }
 0x538   : > { %v2149_v45 = vpop.xlane.xlu0 %2148  ;;  %v2178_v31 = vpack.c.bf16 %v2170_v30, %v2170_v30 }
 0x539   : > { %v3754_v33 = vpop.eup %3753  ;;  %3757 = vrcp.f32 %v2149_v45 }
 0x53a   : > { %3591 = vmatmul.mubr.msk.bf16.vlgmr.msra.gmra.mxu1 %vm1721_vm4, %v2178_v31  ;;  %v2172_v35 = vmul.f32 %v3754_v33, %v4231_v11  ;;  %3759 = vrcp.f32 %v2152_v28 }
 0x53b   : > { %3601 = vmatpush3.bf16.msra.mxu1 %v2283_v34  ;;  %3602 = vmatprep.mubr.msk.bf16.mxu1 %vm3832_vm2, %v3831_v18 }
 0x53c   : > { %3612 = vmatprep.subr.bf16.mxu1 %v3831_v18  ;;  %v2180_v40 = vpack.c.bf16 %v2172_v35, %v2172_v35 }
 0x53d   : > { %v3756_v36 = vpop.eup %3755 }
 0x53e   : > { %v2171_v38 = vmul.f32 %v3756_v36, %v4235_v21 }
 0x540   : > { %v2179_v4 = vpack.c.bf16 %v2171_v38, %v2171_v38 }
 0x542   : > { %3597 = vmatmul.mubr.msk.bf16.vlgmr.msra.gmra.mxu0 %vm1721_vm4, %v2179_v4  ;;  %3603 = vmatmul.mubr.msk.bf16.vlgmr.msra.gmra.mxu1 %vm1721_vm4, %v2180_v40 }
 0x543   : > { %3607 = vmatpush3.bf16.msra.mxu0 %v2329_v41  ;;  %3608 = vmatprep.mubr.msk.bf16.mxu0 %vm3832_vm2, %v3831_v18 }
 0x544   : > { %3618 = vmatprep.subr.bf16.mxu0 %v3831_v18  ;;  %3614 = vmatprep.mubr.msk.bf16.mxu1 %vm3832_vm2, %v3831_v18 }
 0x546   : > { %v3758_v11 = vpop.eup %3757 }
 0x547   : > { %v2173_v21 = vmul.f32 %v3758_v11, %v4251_v43  ;;  %v1236_v43 = vrot.slane %v1151_v50, %v4069_v63  ;;  %v3760_v39 = vpop.eup %3759 }
 0x548   : > { %v2174_v27 = vmul.f32 %v3760_v39, %v4241_v26 }
 0x549   : > { %v2181_v42 = vpack.c.bf16 %v2173_v21, %v2173_v21 }
 0x54a   : > { %v2182_v41 = vpack.c.bf16 %v2174_v27, %v2174_v27 }
 0x54b   : > { %3609 = vmatmul.mubr.msk.bf16.vlgmr.msra.gmra.mxu0 %vm1721_vm4, %v2181_v42 }
 0x54c   : > { %3620 = vmatprep.mubr.msk.bf16.mxu0 %vm3832_vm2, %v3831_v18 }
 0x560   : > { %v2158_v62 = vpop.xlane.xlu1 %2157 }
 0x568   : > { %v2155_v44 = vpop.xlane.xlu0 %2154 }
 0x569   : > { %3761 = vrcp.f32 %v2155_v44 }
 0x56a   : > { %3763 = vrcp.f32 %v2158_v62 }
 0x56c   : > { %v1132_v52 = vpop.permute.xlu0 %1131 }
 0x56d   : > { %v1157_v51 = vpack.i.b16 %v1136_v48, %v1132_v52  ;;  %v1158_v37 = vshrl.u32 %v1132_v52, 16 }
 0x56f   : > { %v1160_v56 = vpack.i.b16 %v1159_v55, %v1158_v37  ;;  %v1244_v57 = vrot.slane %v1157_v51, %v4069_v63 }
 0x571   : > { %v1245_v59 = vcombine.low %v1236_v43, %v1244_v57  ;;  %v1246_v60 = vcombine.high %v1236_v43, %v1244_v57  ;;  %v1278_v61 = vrot.slane %v1160_v56, %v4069_v63 }
 0x573   : > { %v1253_v53 = vrot.slane %v1245_v59, %v4072_v9  ;;  %v1260_v0 = vrot.slane %v1246_v60, %v4072_v9  ;;  %v1279_v1 = vcombine.low %v1270_v58, %v1278_v61  ;;  %v1280_v2 = vcombine.high %v1270_v58, %v1278_v61 }
 0x575   : > { %v1287_v3 = vrot.slane %v1279_v1, %v4072_v9  ;;  %v1294_v5 = vrot.slane %v1280_v2, %v4072_v9  ;;  %v1347_v6 = vcombine.low %v1253_v53, %v1260_v0  ;;  %v3424_v7 = vcombine.high %v1253_v53, %v1260_v0 }
 0x576   : > { %v3762_v23 = vpop.eup %3761 }
 0x577   : > { %v1354_v10 = vrot.slane %v1347_v6, %v4069_v63  ;;  %v1362_v12 = vrot.slane %v3424_v7, %v4069_v63  ;;  %v1372_v13 = vcombine.low %v1287_v3, %v1294_v5  ;;  %v3425_v14 = vcombine.high %v1287_v3, %v1294_v5  ;;  %v3764_v4 = vpop.eup %3763 }
 0x578   : > { %v2175_v31 = vmul.f32 %v3762_v23, %v4276_v17  ;;  %v2176_v42 = vmul.f32 %v3764_v4, %v4272_v15 }
 0x579   : > { %v1379_v16 = vrot.slane %v1372_v13, %v4069_v63  ;;  %v1387_v19 = vrot.slane %v3425_v14, %v4069_v63  ;;  %v1363_v32 = vcombine.low %v1354_v10, %v1362_v12 }
 0x57a   : > { %v2183_v17 = vpack.c.bf16 %v2175_v31, %v2175_v31  ;;  %v2184_v44 = vpack.c.bf16 %v2176_v42, %v2176_v42 }
 0x57b   : > { %v1370_v8 = vrot.slane %v1363_v32, %v4072_v9  ;;  %v1388_v22 = vcombine.low %v1379_v16, %v1387_v19  ;;  %v3719_v32 = vld [vmem:[%s4528_s27 + $0x8] sm:$0xff]  }
 0x57d   : > { %v1395_v24 = vrot.slane %v1388_v22, %v4072_v9  ;;  %v1371_v25 = vcombine.high %v1370_v8, %v3840_v54  ;;  %v1412_v29 = vshrl.u32 %v1370_v8, 16 }
 0x57f   : > { %v1411_v28 = vpack.i.b16 %v1395_v24, %v1370_v8  ;;  %v1413_v30 = vshrl.u32 %v1395_v24, 16  ;;  %v1396_v45 = vcombine.high %v1395_v24, %v3840_v54  ;;  %v1418_v33 = vshrl.u32 %v1371_v25, 16 }
 0x581   : > { %v2375_v34 = vsel %vm2189_vm5, %v1411_v28, 0  ;;  %v1414_v35 = vpack.i.b16 %v1413_v30, %v1412_v29  ;;  %v1417_v36 = vpack.i.b16 %v1396_v45, %v1371_v25  ;;  %v1419_v38 = vshrl.u32 %v1396_v45, 16 }
 0x582   : > { %3613 = vmatpush3.bf16.msra.mxu1 %v2375_v34 }
 0x583   : > { %v2421_v40 = vsel %vm2189_vm5, %v1414_v35, 0  ;;  %3624 = vmatprep.subr.bf16.mxu1 %v3831_v18  ;;  %v1420_v26 = vpack.i.b16 %v1419_v38, %v1418_v33  ;;  %v2467_v11 = vsel %vm2189_vm5, %v1417_v36, 0 }
 0x584   : > { %3619 = vmatpush3.bf16.msra.mxu0 %v2421_v40 }
 0x585   : > { %3615 = vmatmul.mubr.msk.bf16.vlgmr.msra.gmra.mxu1 %vm1721_vm4, %v2182_v41  ;;  %3630 = vmatprep.subr.bf16.mxu0 %v3831_v18  ;;  %v2513_v21 = vsel %vm2189_vm5, %v1420_v26, 0 }
 0x586   : > { %3625 = vmatpush3.bf16.msra.mxu1 %v2467_v11  ;;  %3626 = vmatprep.mubr.msk.bf16.mxu1 %vm3832_vm2, %v3831_v18 }
 0x587   : > { %3621 = vmatmul.mubr.msk.bf16.vlgmr.msra.gmra.mxu0 %vm1721_vm4, %v2183_v17  ;;  %3636 = vmatprep.subr.bf16.mxu1 %v3831_v18 }
 0x588   : > { %3631 = vmatpush3.bf16.msra.mxu0 %v2513_v21  ;;  %3632 = vmatprep.mubr.msk.bf16.mxu0 %vm3832_vm2, %v3831_v18 }
 0x589   : > { %3644 = vmatprep.subr.bf16.mxu0 %v3831_v18 }
 0x58d   : > { %3627 = vmatmul.mubr.msk.bf16.vlgmr.msra.gmra.mxu1 %vm1721_vm4, %v2184_v44 }
 0x58e   : > { %3640 = vmatprep.mubr.msk.bf16.mxu1 %vm3832_vm2, %v3831_v18  ;;  %3637 = vmatpush3.bf16.msra.mxu1 %v3719_v32 }
 0x58f   : > { %3638 = vmatprep.subr.bf16.mxu1 %v3831_v18 }
 0x59d   : > { %v2161_v46 = vpop.xlane.xlu0 %2160 }
 0x59e   : > { %3765 = vrcp.f32 %v2161_v46 }
 0x5ab   : > { %v3766_v48 = vpop.eup %3765 }
 0x5ac   : > { %v2177_v49 = vmul.f32 %v3766_v48, %v4283_v20 }
 0x5ae   : > { %v2185_v15 = vpack.c.bf16 %v2177_v49, %v2177_v49 }
 0x5b0   : > { %3633 = vmatmul.mubr.msk.bf16.vlgmr.msra.gmra.mxu0 %vm1721_vm4, %v2185_v15 }
 0x5b1   : > { %3648 = vmatprep.mubr.msk.bf16.mxu0 %vm3832_vm2, %v3831_v18 }
 0x5fa   : > { %v2227_v50 = vpop.f32.mrf.mxu1 }
 0x5fb   : > { %v2555_v51 = vpack.c.bf16 %v2227_v50, %v2227_v50 }
 0x5fc   : > { %v3592_v52 = vpop.f32.mrf.mxu1 }
 0x5fd   : > { %v2562_v59 = vrot.slane %v2555_v51, %v4069_v63 }
 0x5fe   : > { %v2230_v47 = vpop.f32.mrf.mxu1 }
 0x600   : > { %v3593_v55 = vpop.f32.mrf.mxu1 }
 0x602   : > { %v2273_v37 = vpop.f32.mrf.mxu0  ;;  %v2319_v43 = vpop.f32.mrf.mxu1 }
 0x603   : > { %v2563_v56 = vpack.c.bf16 %v2319_v43, %v2319_v43  ;;  %v2589_v2 = vpack.c.bf16 %v2273_v37, %v2273_v37 }
 0x604   : > { %v3598_v57 = vpop.f32.mrf.mxu0  ;;  %v3604_v58 = vpop.f32.mrf.mxu1 }
 0x605   : > { %v2570_v20 = vrot.slane %v2563_v56, %v4069_v63  ;;  %v2596_v10 = vrot.slane %v2589_v2, %v4069_v63 }
 0x606   : > { %v2276_v60 = vpop.f32.mrf.mxu0  ;;  %v2322_v61 = vpop.f32.mrf.mxu1 }
 0x607   : > { %v2571_v62 = vcombine.low %v2562_v59, %v2570_v20  ;;  %v2572_v53 = vcombine.high %v2562_v59, %v2570_v20 }
 0x608   : > { %v3599_v0 = vpop.f32.mrf.mxu0  ;;  %v3605_v1 = vpop.f32.mrf.mxu1 }
 0x609   : > { %v2579_v6 = vrot.slane %v2571_v62, %v4072_v9  ;;  %v2586_v13 = vrot.slane %v2572_v53, %v4072_v9 }
 0x60b   : > { %v2365_v3 = vpop.f32.mrf.mxu0  ;;  %v2587_v39 = vcombine.high %v2579_v6, %v3840_v54  ;;  %v2588_v24 = vcombine.high %v2586_v13, %v3840_v54  ;;  %v2695_v25 = vshrl.u32 %v2579_v6, 16  ;;  %v2711_v31 = vshrl.u32 %v2586_v13, 16 }
 0x60c   : > { %v2597_v5 = vpack.c.bf16 %v2365_v3, %v2365_v3 }
 0x60d   : > { %v3610_v7 = vpop.f32.mrf.mxu0  ;;  %v2703_v45 = vshrl.u32 %v2587_v39, 16  ;;  %v2719_v40 = vshrl.u32 %v2588_v24, 16 }
 0x60e   : > { %v2604_v12 = vrot.slane %v2597_v5, %v4069_v63 }
 0x60f   : > { %v2368_v14 = vpop.f32.mrf.mxu0 }
 0x610   : > { %v2605_v16 = vcombine.low %v2596_v10, %v2604_v12  ;;  %v2606_v19 = vcombine.high %v2596_v10, %v2604_v12 }
 0x611   : > { %v3611_v8 = vpop.f32.mrf.mxu0 }
 0x612   : > { %v2613_v22 = vrot.slane %v2605_v16, %v4072_v9  ;;  %v2620_v23 = vrot.slane %v2606_v19, %v4072_v9 }
 0x614   : > { %v2621_v27 = vcombine.high %v2613_v22, %v3840_v54  ;;  %v2622_v28 = vcombine.high %v2620_v23, %v3840_v54  ;;  %v2693_v29 = vpack.i.b16 %v2613_v22, %v2579_v6  ;;  %v2696_v30 = vshrl.u32 %v2613_v22, 16 }
 0x615   : > { %v2709_v33 = vpack.i.b16 %v2620_v23, %v2586_v13  ;;  %v2712_v34 = vshrl.u32 %v2620_v23, 16 }
 0x616   : > { %v2697_v35 = vpack.i.b16 %v2696_v30, %v2695_v25  ;;  %v2701_v36 = vpack.i.b16 %v2621_v27, %v2587_v39  ;;  %v2704_v38 = vshrl.u32 %v2621_v27, 16  ;;  %v2717_v4 = vpack.i.b16 %v2622_v28, %v2588_v24 }
 0x617   : > { %v2713_v41 = vpack.i.b16 %v2712_v34, %v2711_v31  ;;  %v2720_v26 = vshrl.u32 %v2622_v28, 16  ;;  %v2755_v11 = vcombine.low %v2693_v29, %v2709_v33 }
 0x618   : > { %v2705_v17 = vpack.i.b16 %v2704_v38, %v2703_v45  ;;  %v2763_v21 = vcombine.low %v2701_v36, %v2717_v4 }
 0x619   : > { %v2721_v42 = vpack.i.b16 %v2720_v26, %v2719_v40  ;;  %v2805_v44 = vcombine.low %v2697_v35, %v2713_v41  ;;  %v2762_v46 = vrot.slane %v2755_v11, %v4069_v63 }
 0x61a   : > { %v2770_v48 = vrot.slane %v2763_v21, %v4069_v63 }
 0x61b   : > { %v2813_v49 = vcombine.low %v2705_v17, %v2721_v42  ;;  %v4368_v50 = vrot.slane %v2805_v44, %v4069_v63 }
 0x61c   : > { %v4365_v15 = vcombine.low %v2762_v46, %v2770_v48 }
 0x61d   : > { %v4371_v52 = vrot.slane %v2813_v49, %v4069_v63 }
 0x61f   : > { %v2837_v47 = vcombine.low %v4368_v50, %v4371_v52 }
 0x645   : > { %v2411_v55 = vpop.f32.mrf.mxu1 }
 0x646   : > { %v2623_v0 = vpack.c.bf16 %v2411_v55, %v2411_v55 }
 0x647   : > { %v3616_v51 = vpop.f32.mrf.mxu1  ;;  %v2457_v37 = vpop.f32.mrf.mxu0 }
 0x648   : > { %v2630_v2 = vrot.slane %v2623_v0, %v4069_v63  ;;  %v2657_v5 = vpack.c.bf16 %v2457_v37, %v2457_v37  ;;  %v3720_v37 = vld [vmem:[%s4528_s27] sm:$0xff]  }
 0x649   : > { %v2414_v43 = vpop.f32.mrf.mxu1  ;;  %v3622_v56 = vpop.f32.mrf.mxu0  ;;  %3639 = vmatpush3.bf16.msra.mxu1 %v3720_v37 }
 0x64a   : > { %v2664_v14 = vrot.slane %v2657_v5, %v4069_v63  ;;  %3652 = vmatprep.subr.bf16.mxu1 %v3831_v18 }
 0x64b   : > { %v3617_v57 = vpop.f32.mrf.mxu1  ;;  %v2460_v58 = vpop.f32.mrf.mxu0 }
 0x64c   : > { %v2794_v57 = vrot.slane %v4365_v15, %v4072_v9 }
 0x64d   : > { %v3623_v59 = vpop.f32.mrf.mxu0  ;;  %v2503_v20 = vpop.f32.mrf.mxu1 }
 0x64e   : > { %v2631_v53 = vpack.c.bf16 %v2503_v20, %v2503_v20 }
 0x64f   : > { %v3628_v60 = vpop.f32.mrf.mxu1 }
 0x650   : > { %v2638_v1 = vrot.slane %v2631_v53, %v4069_v63 }
 0x651   : > { %v2506_v61 = vpop.f32.mrf.mxu1 }
 0x652   : > { %v2639_v3 = vcombine.low %v2630_v2, %v2638_v1  ;;  %v2640_v6 = vcombine.high %v2630_v2, %v2638_v1  ;;  %v2844_v61 = vrot.slane %v2837_v47, %v4072_v9 }
 0x653   : > { %v3629_v62 = vpop.f32.mrf.mxu1 }
 0x654   : > { %v2647_v12 = vrot.slane %v2639_v3, %v4072_v9  ;;  %v2654_v19 = vrot.slane %v2640_v6, %v4072_v9 }
 0x656   : > { %v2655_v22 = vcombine.high %v2647_v12, %v3840_v54  ;;  %v2656_v27 = vcombine.high %v2654_v19, %v3840_v54  ;;  %v2727_v28 = vshrl.u32 %v2647_v12, 16  ;;  %v2743_v34 = vshrl.u32 %v2654_v19, 16 }
 0x658   : > { %v2735_v33 = vshrl.u32 %v2655_v22, 16  ;;  %v2751_v26 = vshrl.u32 %v2656_v27, 16 }
 0x670   : > { %v2549_v7 = vpop.f32.mrf.mxu0 }
 0x671   : > { %v2665_v10 = vpack.c.bf16 %v2549_v7, %v2549_v7 }
 0x672   : > { %v3634_v13 = vpop.f32.mrf.mxu0 }
 0x673   : > { %v2672_v16 = vrot.slane %v2665_v10, %v4069_v63  ;;  %v3446_v13 = vld [vmem:[%s4529_s22] ss:$0 sm:$0xff] }
 0x674   : > { %v2552_v32 = vpop.f32.mrf.mxu0 }
 0x675   : > { %v2673_v39 = vcombine.low %v2664_v14, %v2672_v16  ;;  %v2674_v8 = vcombine.high %v2664_v14, %v2672_v16  ;;  %v2948_v16 = vld [vmem:[#allocation2] sm:$0xff] }
 0x676   : > { %v3635_v23 = vpop.f32.mrf.mxu0 }
 0x677   : > { %v2681_v24 = vrot.slane %v2673_v39, %v4072_v9  ;;  %v2688_v25 = vrot.slane %v2674_v8, %v4072_v9 }
 0x679   : > { %v2689_v29 = vcombine.high %v2681_v24, %v3840_v54  ;;  %v2690_v30 = vcombine.high %v2688_v25, %v3840_v54  ;;  %v2725_v45 = vpack.i.b16 %v2681_v24, %v2647_v12  ;;  %v2728_v31 = vshrl.u32 %v2681_v24, 16 }
 0x67a   : > { %v2741_v35 = vpack.i.b16 %v2688_v25, %v2654_v19  ;;  %v2744_v36 = vshrl.u32 %v2688_v25, 16 }
 0x67b   : > { %v2729_v38 = vpack.i.b16 %v2728_v31, %v2727_v28  ;;  %v2733_v4 = vpack.i.b16 %v2689_v29, %v2655_v22  ;;  %v2736_v40 = vshrl.u32 %v2689_v29, 16  ;;  %v2749_v41 = vpack.i.b16 %v2690_v30, %v2656_v27  ;;  %v2949_v22 = vld [vmem:[#allocation2 + $0x8] sm:$0xff] }
 0x67c   : > { %v2745_v11 = vpack.i.b16 %v2744_v36, %v2743_v34  ;;  %v2752_v17 = vshrl.u32 %v2690_v30, 16  ;;  %v2771_v21 = vcombine.low %v2725_v45, %v2741_v35 }
 0x67d   : > { %v2737_v42 = vpack.i.b16 %v2736_v40, %v2735_v33  ;;  %v2779_v44 = vcombine.low %v2733_v4, %v2749_v41 }
 0x67e   : > { %v2753_v46 = vpack.i.b16 %v2752_v17, %v2751_v26  ;;  %v2821_v48 = vcombine.low %v2729_v38, %v2745_v11  ;;  %v2778_v54 = vrot.slane %v2771_v21, %v4069_v63  ;;  %v3721_v26 = vld [vmem:[%s3984_s4 + $0x8] sm:$0xff]   ;;  %v3722_v11 = vld [vmem:[%s3984_s4] sm:$0xff]  }
 0x67f   : > { %v2786_v49 = vrot.slane %v2779_v44, %v4069_v63  ;;  %3645 = vmatpush3.bf16.msra.mxu0 %v3721_v26 }
 0x680   : > { %v2829_v55 = vcombine.low %v2737_v42, %v2753_v46  ;;  %v2828_v43 = vrot.slane %v2821_v48, %v4069_v63  ;;  %3646 = vmatprep.subr.bf16.mxu0 %v3831_v18 }
 0x681   : > { %v2795_v51 = vcombine.low %v2778_v54, %v2786_v49 }
 0x682   : > { %v2836_v56 = vrot.slane %v2829_v55, %v4069_v63  ;;  %v3450_v55 = vld [vmem:[%s645_s30] ss:$0 sm:$0xff] }
 0x683   : > { %v2802_v58 = vrot.slane %v2795_v51, %v4072_v9  ;;  %3647 = vmatpush3.bf16.msra.mxu0 %v3722_v11 }
 0x684   : > { %v2845_v59 = vcombine.low %v2828_v43, %v2836_v56  ;;  %v3451_v56 = vld [vmem:[%s648_s26] ss:$0 sm:$0xff] }
 0x685   : > { %v2804_v20 = vcombine.high %v2794_v57, %v2802_v58  ;;  %v2803_v60 = vcombine.low %v2794_v57, %v2802_v58 }
 0x686   : > { %v2852_v62 = vrot.slane %v2845_v59, %v4072_v9 }
 0x687   : > { %v2858_v0 = vshrl.u32 %v2803_v60, 16  ;;  %v2864_v1 = vshrl.u32 %v2804_v20, 16 }
 0x688   : > { %v2854_v53 = vcombine.high %v2844_v61, %v2852_v62  ;;  %v2853_v63 = vcombine.low %v2844_v61, %v2852_v62  ;;  %v3724_v61 = vld [vmem:[%s3994_s20 + $0x30] sm:$0xff]   ;;  %v3725_v62 = vld [vmem:[%s3994_s20 + $0x28] sm:$0xff]  }
 0x68a   : > { %v2863_v15 = vpack.i.b16 %v2854_v53, %v2804_v20  ;;  %v2859_v2 = vshrl.u32 %v2853_v63, 16  ;;  %v2865_v3 = vshrl.u32 %v2854_v53, 16  ;;  %v2857_v5 = vpack.i.b16 %v2853_v63, %v2803_v60  ;;  %v3723_v60 = vld [vmem:[%s3994_s20 + $0x38] sm:$0xff]   ;;  %v3726_v53 = vld [vmem:[%s3994_s20 + $0x20] sm:$0xff]  }
 0x68b   : > { %v3727_v63 = vld [vmem:[%s3994_s20 + $0x18] sm:$0xff]  }
 0x68c   : > { %2869 = vrot.lane.b32.xlu1 %v2863_v15, %s3841_s17  ;;  %v2860_v6 = vpack.i.b16 %v2859_v2, %v2858_v0  ;;  %v2866_v7 = vpack.i.b16 %v2865_v3, %v2864_v1  ;;  %v3728_v0 = vld [vmem:[%s3994_s20 + $0x10] sm:$0xff]   ;;  %v3729_v1 = vld [vmem:[%s3994_s20 + $0x8] sm:$0xff]   ;;  %v3730_v15 = vld [vmem:[%s3994_s20] sm:$0xff]  }
 0x68d   : > { %v3452_v2 = vld [vmem:[%s656_s6] ss:$0 sm:$0xff] }
 0x68e   : > { %2867 = vrot.lane.b32.xlu0 %v2860_v6, %s3842_s15 }
 0x690   : > { %2871 = vrot.lane.b32.xlu1 %v2866_v7, %s3843_s1 }
 0x6fe   : > { %v2870_v50 = vpop.permute.xlu1 %2869 }
 0x700   : > { %v2868_v9 = vpop.permute.xlu0 %2867 }
 0x701   : > { %v2875_v52 = vsel %vm1721_vm4, %v2857_v5, %v2868_v9 }
 0x702   : > { %v2872_v47 = vpop.permute.xlu1 %2871  ;;  %v2878_v10 = vsel %vm2876_vm6, %v2875_v52, %v2870_v50 }
 0x703   : > { %v2881_v12 = vsel %vm2879_vm7, %v2878_v10, %v2872_v47 }
 0x704   : > { %3641 = vmatmul.mubr.msk.bf16.vlgmr.msra.gmra.mxu1 %vm682_vm1, %v2881_v12 }
 0x705   : > { %3668 = vmatprep.mubr.msk.bf16.mxu1 %vm3832_vm2, %v3831_v18  ;;  %3653 = vmatpush3.bf16.msra.mxu1 %v3723_v60 }
 0x706   : > { %3654 = vmatprep.subr.bf16.mxu1 %v3831_v18 }
 0x709   : > { %3655 = vmatpush3.bf16.msra.mxu1 %v3724_v61 }
 0x70a   : > { %3656 = vmatprep.subr.bf16.mxu1 %v3831_v18 }
 0x70d   : > { %3657 = vmatpush3.bf16.msra.mxu1 %v3725_v62 }
 0x70e   : > { %3658 = vmatprep.subr.bf16.mxu1 %v3831_v18 }
 0x711   : > { %3659 = vmatpush3.bf16.msra.mxu1 %v3726_v53 }
 0x712   : > { %3660 = vmatprep.subr.bf16.mxu1 %v3831_v18 }
 0x715   : > { %3661 = vmatpush3.bf16.msra.mxu1 %v3727_v63 }
 0x716   : > { %3662 = vmatprep.subr.bf16.mxu1 %v3831_v18 }
 0x719   : > { %3663 = vmatpush3.bf16.msra.mxu1 %v3728_v0 }
 0x71a   : > { %3664 = vmatprep.subr.bf16.mxu1 %v3831_v18 }
 0x71d   : > { %3665 = vmatpush3.bf16.msra.mxu1 %v3729_v1 }
 0x71e   : > { %3666 = vmatprep.subr.bf16.mxu1 %v3831_v18 }
 0x721   : > { %3667 = vmatpush3.bf16.msra.mxu1 %v3730_v15 }
 0x7c4   : > { %v2941_v14 = vpop.f32.mrf.mxu1 }
 0x7c5   : > { %v2942_v19 = vadd.f32 %v3446_v13, %v2941_v14 }
 0x7c6   : > { %v3642_v32 = vpop.f32.mrf.mxu1 }
 0x7c7   : > { %v2950_v39 = vadd.f32 %v2948_v16, %v2942_v19 }
 0x7c8   : > { %v2944_v8 = vpop.f32.mrf.mxu1 }
 0x7c9   : > { %2952 = vst.msk [vmem:[#allocation2] sm:$0xff] %vm682_vm1, %v2950_v39  ;;  %v2945_v23 = vadd.f32 %v3446_v13, %v2944_v8 }
 0x7ca   : > { %v3643_v24 = vpop.f32.mrf.mxu1 }
 0x7cb   : > { %v2951_v25 = vadd.f32 %v2949_v22, %v2945_v23  ;;  %v3458_v23 = vld [vmem:[%s664_s24] ss:$0 sm:$0xff] }
 0x7cd   : > { %2953 = vst.msk [vmem:[#allocation2 + $0x8] sm:$0xff] %vm682_vm1, %v2951_v25 }
 0x7d0   : > { %v4412_v27 = vld [vmem:[#allocation2] sm:$0xff] }
 0x7d1   : > { %v2958_v28 = vsel %vm682_vm1, %v4412_v27, 0.0 }
 0x7d2   : > { %2959 = vadd.xlane.f32.xlu1 %v2958_v28 }
 0x7d4   : > { %v4416_v29 = vld [vmem:[#allocation2 + $0x8] sm:$0xff] }
 0x7d5   : > { %v2961_v30 = vsel %vm682_vm1, %v4416_v29, 0.0 }
 0x7d6   : > { %2962 = vadd.xlane.f32.xlu0 %v2961_v30 }
 0x85b   : > { %v2960_v45 = vpop.xlane.xlu1 %2959 }
 0x85c   : > { %v2964_v31 = vmul.f32 0.03125, %v2960_v45 }
 0x85e   : > { %v2966_v33 = vsub.f32 %v4412_v27, %v2964_v31 }
 0x85f   : > { %v2963_v34 = vpop.xlane.xlu0 %2962 }
 0x860   : > { %v2965_v35 = vmul.f32 0.03125, %v2963_v34  ;;  %v2968_v36 = vmul.f32 %v2966_v33, %v2966_v33 }
 0x862   : > { %v2967_v38 = vsub.f32 %v4416_v29, %v2965_v35  ;;  %v2970_v4 = vsel %vm682_vm1, %v2968_v36, 0.0 }
 0x863   : > { %2971 = vadd.xlane.f32.xlu0 %v2970_v4 }
 0x864   : > { %v2969_v40 = vmul.f32 %v2967_v38, %v2967_v38 }
 0x866   : > { %v2973_v41 = vsel %vm682_vm1, %v2969_v40, 0.0 }
 0x867   : > { %2974 = vadd.xlane.f32.xlu0 %v2973_v41 }
 0x8ec   : > { %v2972_v17 = vpop.xlane.xlu0 %2971 }
 0x8ed   : > { %v2976_v21 = vmul.f32 0.03125, %v2972_v17 }
 0x8ef   : > { %v2978_v42 = vadd.f32 1e-05, %v2976_v21 }
 0x8f0   : > { %v2975_v44 = vpop.xlane.xlu0 %2974 }
 0x8f1   : > { %3767 = vrsqrt.f32 %v2978_v42  ;;  %v2977_v46 = vmul.f32 0.03125, %v2975_v44 }
 0x8f3   : > { %v2979_v48 = vadd.f32 1e-05, %v2977_v46 }
 0x8f5   : > { %3769 = vrsqrt.f32 %v2979_v48 }
 0x8fe   : > { %v3768_v54 = vpop.eup %3767 }
 0x8ff   : > { %v2982_v49 = vmul.f32 %v3768_v54, %v2966_v33 }
 0x901   : > { %v2990_v43 = vmul.f32 %v3450_v55, %v2982_v49 }
 0x902   : > { %v3770_v51 = vpop.eup %3769 }
 0x903   : > { %v2983_v37 = vmul.f32 %v3770_v51, %v2967_v38  ;;  %v2998_v58 = vadd.f32 %v3451_v56, %v2990_v43 }
 0x905   : > { %v2991_v57 = vmul.f32 %v3450_v55, %v2983_v37 }
 0x907   : > { %v2999_v59 = vadd.f32 %v3451_v56, %v2991_v57 }
 0x909   : > { %v3000_v20 = vpack.c.bf16 %v2999_v59, %v2998_v58 }
 0x90b   : > { %3649 = vmatmul.mubr.msk.bf16.vlgmr.msra.gmra.mxu0 %vm682_vm1, %v3000_v20 }
 0x9cb   : > { %v3061_v3 = vpop.f32.mrf.mxu0 }
 0x9cc   : > { %v3062_v5 = vadd.f32 %v3452_v2, %v3061_v3 }
 0x9cd   : > { %v3650_v6 = vpop.f32.mrf.mxu0 }
 0x9ce   : > { %v3456_v7 = vmul.f32 -1.702, %v3062_v5 }
 0x9cf   : > { %v3064_v50 = vpop.f32.mrf.mxu0 }
 0x9d0   : > { %v3072_v9 = vmul.f32 1.442695, %v3456_v7  ;;  %v3065_v52 = vadd.f32 %v3452_v2, %v3064_v50 }
 0x9d1   : > { %v3651_v47 = vpop.f32.mrf.mxu0 }
 0x9d2   : > { %3771 = vpow2.f32 %v3072_v9  ;;  %v3457_v10 = vmul.f32 -1.702, %v3065_v52 }
 0x9d4   : > { %v3074_v12 = vmul.f32 1.442695, %v3457_v10 }
 0x9d6   : > { %3773 = vpow2.f32 %v3074_v12 }
 0x9df   : > { %v3772_v18 = vpop.eup %3771 }
 0x9e0   : > { %v3076_v13 = vadd.f32 1.0, %v3772_v18 }
 0x9e2   : > { %3775 = vrcp.f32 %v3076_v13 }
 0x9e3   : > { %v3774_v14 = vpop.eup %3773 }
 0x9e4   : > { %v3077_v16 = vadd.f32 1.0, %v3774_v14 }
 0x9e6   : > { %3777 = vrcp.f32 %v3077_v16 }
 0x9ef   : > { %v3776_v19 = vpop.eup %3775 }
 0x9f0   : > { %v3082_v39 = vmul.f32 %v3776_v19, %v3062_v5 }
 0x9f3   : > { %v3778_v32 = vpop.eup %3777 }
 0x9f4   : > { %v3083_v8 = vmul.f32 %v3778_v32, %v3065_v52 }
 0x9f6   : > { %v3084_v22 = vpack.c.bf16 %v3083_v8, %v3082_v39 }
 0x9f8   : > { %3669 = vmatmul.mubr.bf16.vlgmr.msra.gmra.mxu1 %v3084_v22 }
 0xab8   : > { %v3190_v24 = vpop.f32.mrf.mxu1 }
 0xab9   : > { %v3191_v25 = vadd.f32 %v3458_v23, %v3190_v24 }
 0xaba   : > { %v3670_v28 = vpop.f32.mrf.mxu1 }
 0xabb   : > { %v3197_v30 = vadd.f32 %v3191_v25, %v4412_v27 }
 0xabc   : > { %v3193_v45 = vpop.f32.mrf.mxu1 }
 0xabd   : > { %3199 = vst.msk [vmem:[#allocation2] sm:$0xff] %vm682_vm1, %v3197_v30  ;;  %v3194_v31 = vadd.f32 %v3458_v23, %v3193_v45  ;;  %3204 = sbr.rel (%p3467_p6) target bundleno = 2764 (0xacc), region = 84 }
 0xabe   : > { %v3671_v33 = vpop.f32.mrf.mxu1 }
 0xabf   : > { %v3198_v34 = vadd.f32 %v3194_v31, %v4416_v29 }
 0xac1   : > { %3200 = vst.msk [vmem:[#allocation2 + $0x8] sm:$0xff] %vm682_vm1, %v3198_v34 }
 0xac4   : > { %v3205_v35 = vld [vmem:[#allocation2] sm:$0xff] }
 0xac5   : > { %v3207_v38 = vpack.c.bf16 %v3205_v35, %v3205_v35 }
 0xac7   : > { %3209 = vst.msk [vmem:[#allocation6] sm:$0xf] %vm802_vm3, %v3207_v38 }
 0xac8   : > { %v3206_v36 = vld [vmem:[#allocation2 + $0x8] sm:$0xff] }
 0xac9   : > { %v3208_v4 = vpack.c.bf16 %v3206_v36, %v3206_v36 }
 0xacb   : > { %3210 = vst.msk [vmem:[#allocation6 + $0x4] sm:$0xf] %vm802_vm3, %v3208_v4 }
 0xacc PF: > { %s4530_s16 = sld [smem:[#allocation10_spill]]  ;;  %s3844_s27 = smov [#allocation6]  }
 0xacd   : > { %s3220_s17 = sshll.u32 %s3844_s27, 4  ;;  %s3221_s17 = int_to_ptr.vmem [resolvable:$true] %s3220_s17 }
 0xace   : > { %s3779_s28 = scalar_lea.vmem %s3221_s17, 128  ;;  %p3786_p11 = scmp.lt.s32.totalorder %s3221_s17, %s3221_s17 }
 0xacf   : > { %p3780_p8 = scmp.ne.s32.totalorder %s3221_s17, %s3779_s28  ;;  %p3787_p12 = scmp.lt.s32.totalorder %s3779_s28, %s3779_s28 }
 0xad1   : > { %p3788_p13 = por %p3787_p12, %p3786_p11 }
 0xad2   : > { %s4531_s24 = sadd.s32 4294967295, %s4530_s16  }
 0xad3   : > { %p4472_p7 = scmp.eq.s32.totalorder %s4531_s24, 1 }
 0xad5   : > { %p3781_p9 = pnand %p3780_p8, %p4472_p7 }
 0xad7   : > { %p3782_p10 = pneg %p3781_p9 }
 0xad9   : > { %p3789_p0 = pnand %p3788_p13, %p3782_p10 }
 0xadb   : > { %3792 = shalt.err (!%p3789_p0)
}
 0xadc   : > { %s3845_s15 = smov 4   ;;  %s4533_s19 = sld [smem:[#allocation15_spill]] }
 0xae2   : > { %3673 = dma.vmem_to_hbm [thread:$0]  (%p4472_p7), %s3221_s17, 128, %s4533_s19, [#allocation7], %s3837_s18, %s3837_s18, %s3845_s15  }
 0xae3   : > { %3816 = dma.done.wait (%p4472_p7), [#allocation7], 128  }
 0xae4   : > { %3818 = vsyncadd (%p4472_p7), [#allocation7], 4294967168 }
 0xae5 PF: > { %s4534_s22 = sld [smem:[#allocation10_spill]] }
 0xae6   : > { %s4535_s28 = sld [smem:[#allocation9_spill]] }
 0xae7   : > { %s4536_s29 = sld [smem:[#allocation11_spill]] }
 0xaeb   : > { %s25_s30 = sadd.s32 1, %s4534_s22  }
 0xaec   : > { %p22_p1 = scmp.ge.s32.totalorder %s25_s30, 4  }
 0xaee   :  { %24 = sbr.rel (!%p22_p1) target bundleno = 6 (0x6), region = 148 }
 0xaf3   :  { %3236 = vsyncpa [#allocation7], 1 }
 0xaf4   :  { %3238 = vsyncpa [#allocation7 + $0x1], 1 }

</bundles_post_ra>
